<compile_context>
chip_gen: v7x
topology: tpu7x:2x2x1
jax: 0.10.0
libtpu: 0.0.40
codegen_flags: <defaults>
</compile_context>

<pallas_src>
import functools
import math

import jax
import jax.numpy as jnp
from jax.experimental import pallas as pl
from jax.experimental.pallas import tpu as pltpu


VMEM_LIMIT = 48 * 1024 * 1024   # <= 64 MiB physical VMEM on v7x; fine on v5e/v6e


def _pick_n_tile(n, limit=1024, quantum=128):
    """Largest lane-dense output tile: full n if small, else a 128-multiple
    that divides n (e.g. 768 for 2304, 1024 for 3072)."""
    if n <= limit:
        return n
    top = limit - limit % quantum
    for t in range(top, 0, -quantum):
        if n % t == 0:
            return t
    return top  # ragged fallback (masked last tile)


# ----------------------------- Pallas kernels -----------------------------

def _fused_linear_kernel(*refs, has_ln, has_bias, has_res, activation,
                         l2_normalize, eps):
    """(optional LN, cached across N tiles) -> bf16 matmul -> (+bias)
    -> (QuickGELU) -> (+residual) -> (L2 normalize)."""
    it = list(refs)
    x_ref = it.pop(0)
    if has_ln:
        g_ref = it.pop(0)
        b_ref = it.pop(0)
    w_ref = it.pop(0)
    if has_bias:
        bias_ref = it.pop(0)
    if has_res:
        res_ref = it.pop(0)
    o_ref = it.pop(0)
    if has_ln:
        xc_ref = it.pop(0)          # (TM, K) bf16 scratch: LN'd x cache

    if has_ln:
        @pl.when(pl.program_id(1) == 0)      # recompute LN only once per M tile
        def _():
            xf = x_ref[...].astype(jnp.float32)
            mu = jnp.mean(xf, axis=-1, keepdims=True)
            var = jnp.mean(jnp.square(xf - mu), axis=-1, keepdims=True)
            xf = (xf - mu) * jax.lax.rsqrt(var + eps)    # EUP rsqrt, no divide
            xf = xf * g_ref[...] + b_ref[...]
            xc_ref[...] = xf.astype(jnp.bfloat16)
        xb = xc_ref[...]
    else:
        xb = x_ref[...].astype(jnp.bfloat16)

    y = jnp.dot(xb, w_ref[...], preferred_element_type=jnp.float32)
    if has_bias:
        y = y + bias_ref[...]
    if activation == "quick_gelu":                       # CLIP's QuickGELU
        y = y * jax.nn.sigmoid(1.702 * y)
    if has_res:
        y = y + res_ref[...].astype(jnp.float32)
    if l2_normalize:
        y = y * jax.lax.rsqrt(
            jnp.maximum(jnp.sum(y * y, axis=-1, keepdims=True), 1e-12))
    o_ref[...] = y.astype(o_ref.dtype)


def fused_linear(x, w, *, ln=None, bias=None, residual=None, activation=None,
                 l2_normalize=False, out_dtype=jnp.bfloat16, eps=1e-5):
    """y = norm?([LN(x)] @ w (+bias) (QuickGELU) (+residual)).  bf16 MXU matmul
    with f32 accumulation.  x:(M,K), w:(K,N).  Tiled over M ("parallel") and N
    ("arbitrary", so the LN cache is valid); K kept whole for the fused LN."""
    M, K = x.shape
    N = w.shape[1]
    TM = M if M <= 512 else 512          # multiple of 8 (sublanes)
    TN = _pick_n_tile(N)                 # lane-dense, divides N when tiled
    gm = pl.cdiv(M, TM)
    gn = pl.cdiv(N, TN)
    if l2_normalize:
        assert gn == 1, "row-normalisation needs the full row in one tile"

    args = [x]
    in_specs = [pl.BlockSpec((TM, K), lambda i, j: (i, 0))]
    nbytes = x.size * x.dtype.itemsize
    if ln is not None:
        g, b = ln
        args += [g.reshape(1, K).astype(jnp.float32),
                 b.reshape(1, K).astype(jnp.float32)]
        in_specs += [pl.BlockSpec((1, K), lambda i, j: (0, 0)),
                     pl.BlockSpec((1, K), lambda i, j: (0, 0))]
        nbytes += 2 * K * 4
    args.append(w.astype(jnp.bfloat16))
    in_specs.append(pl.BlockSpec((K, TN), lambda i, j: (0, j)))
    nbytes += K * N * 2
    if bias is not None:
        args.append(bias.reshape(1, N).astype(jnp.float32))
        in_specs.append(pl.BlockSpec((1, TN), lambda i, j: (0, j)))
        nbytes += N * 4
    if residual is not None:
        args.append(residual)
        in_specs.append(pl.BlockSpec((TM, TN), lambda i, j: (i, j)))
        nbytes += residual.size * residual.dtype.itemsize
    nbytes += M * N * jnp.dtype(out_dtype).itemsize

    scratch_shapes = []
    if ln is not None:
        scratch_shapes.append(pltpu.VMEM((TM, K), jnp.bfloat16))

    flops = 2 * M * K * N
    trans = M * N if activation == "quick_gelu" else 0

    return pl.pallas_call(
        functools.partial(_fused_linear_kernel,
                          has_ln=ln is not None,
                          has_bias=bias is not None,
                          has_res=residual is not None,
                          activation=activation,
                          l2_normalize=l2_normalize, eps=eps),
        out_shape=jax.ShapeDtypeStruct((M, N), out_dtype),
        grid=(gm, gn),
        in_specs=in_specs,
        out_specs=pl.BlockSpec((TM, TN), lambda i, j: (i, j)),
        scratch_shapes=scratch_shapes,
        compiler_params=pltpu.CompilerParams(
            dimension_semantics=("parallel", "arbitrary"),
            vmem_limit_bytes=VMEM_LIMIT),
        cost_estimate=pl.CostEstimate(flops=int(flops),
                                      transcendentals=int(trans),
                                      bytes_accessed=int(nbytes)),
    )(*args)


def _attn_proj_kernel(qkv_ref, wo_ref, bo_ref, res_ref, o_ref, attn_ref, *,
                      n_heads, d_model, causal):
    """All heads of one batch element.  The attention scale is pre-folded into
    the QKV weights.  Per-head softmax(q k^T) v is written into a (L, D) bf16
    VMEM scratch (bounds live ranges of the head loop); then ONE full-depth
    (L,D)@(D,D) out-projection matmul + bias + residual."""
    qkv = qkv_ref[0]                              # (L, 3D) bf16
    L = qkv.shape[0]
    dh = d_model // n_heads

    if causal:
        row = jax.lax.broadcasted_iota(jnp.int32, (L, L), 0)
        col = jax.lax.broadcasted_iota(jnp.int32, (L, L), 1)
        keep = col <= row

    for h in range(n_heads):
        q = qkv[:, h * dh:(h + 1) * dh]                                # scaled
        k = qkv[:, d_model + h * dh:d_model + (h + 1) * dh]
        v = qkv[:, 2 * d_model + h * dh:2 * d_model + (h + 1) * dh]

        s = jax.lax.dot_general(q, k, (((1,), (1,)), ((), ())),
                                preferred_element_type=jnp.float32)    # (L, L)
        if causal:
            s = jnp.where(keep, s, jnp.float32(-1e9))
        m = jnp.max(s, axis=-1, keepdims=True)
        p = jnp.exp(s - m)
        denom = jnp.sum(p, axis=-1, keepdims=True)
        p = p * pl.reciprocal(denom, approx=True)                      # EUP

        o_h = jnp.dot(p.astype(jnp.bfloat16), v,
                      preferred_element_type=jnp.float32)              # (L, dh)
        attn_ref[:, h * dh:(h + 1) * dh] = o_h.astype(jnp.bfloat16)

    y = jnp.dot(attn_ref[...], wo_ref[...],
                preferred_element_type=jnp.float32)                    # (L, D)
    y = y + bo_ref[...] + res_ref[0].astype(jnp.float32)
    o_ref[0] = y.astype(o_ref.dtype)


def attention_outproj(qkv, w_o, b_o, residual, *, n_heads, causal):
    """qkv:(B,L,3D) bf16, residual:(B,L,D) bf16 -> residual + attn(qkv) @ w_o."""
    B, L, D3 = qkv.shape
    D = D3 // 3
    flops = B * (4 * L * L * D + 2 * L * D * D)
    trans = B * n_heads * L * L
    nbytes = int(qkv.size * 2 + D * D * 2 + D * 4
                 + residual.size * 2 + B * L * D * 2)

    return pl.pallas_call(
        functools.partial(_attn_proj_kernel, n_heads=n_heads, d_model=D,
                          causal=causal),
        out_shape=jax.ShapeDtypeStruct((B, L, D), jnp.bfloat16),
        grid=(B,),
        in_specs=[pl.BlockSpec((1, L, D3), lambda b: (b, 0, 0)),
                  pl.BlockSpec((D, D), lambda b: (0, 0)),
                  pl.BlockSpec((1, D), lambda b: (0, 0)),
                  pl.BlockSpec((1, L, D), lambda b: (b, 0, 0))],
        out_specs=pl.BlockSpec((1, L, D), lambda b: (b, 0, 0)),
        scratch_shapes=[pltpu.VMEM((L, D), jnp.bfloat16)],
        compiler_params=pltpu.CompilerParams(
            dimension_semantics=("parallel",),
            vmem_limit_bytes=VMEM_LIMIT),
        cost_estimate=pl.CostEstimate(flops=int(flops),
                                      transcendentals=int(trans),
                                      bytes_accessed=nbytes),
    )(qkv, w_o.astype(jnp.bfloat16), b_o.reshape(1, D).astype(jnp.float32),
      residual)


def _addpos_ln_kernel(x_ref, pos_ref, g_ref, b_ref, o_ref, *, eps):
    """x + positional_embedding, then LayerNorm (ViT ln_pre), fused."""
    x = x_ref[0].astype(jnp.float32) + pos_ref[...].astype(jnp.float32)
    mu = jnp.mean(x, axis=-1, keepdims=True)
    var = jnp.mean(jnp.square(x - mu), axis=-1, keepdims=True)
    y = (x - mu) * jax.lax.rsqrt(var + eps)
    o_ref[0] = (y * g_ref[...] + b_ref[...]).astype(o_ref.dtype)


def add_pos_layernorm(x, pos, g, b, eps=1e-5):
    B, L, D = x.shape
    return pl.pallas_call(
        functools.partial(_addpos_ln_kernel, eps=eps),
        out_shape=jax.ShapeDtypeStruct((B, L, D), jnp.bfloat16),
        grid=(B,),
        in_specs=[pl.BlockSpec((1, L, D), lambda i: (i, 0, 0)),
                  pl.BlockSpec((L, D), lambda i: (0, 0)),
                  pl.BlockSpec((1, D), lambda i: (0, 0)),
                  pl.BlockSpec((1, D), lambda i: (0, 0))],
        out_specs=pl.BlockSpec((1, L, D), lambda i: (i, 0, 0)),
        compiler_params=pltpu.CompilerParams(
            dimension_semantics=("parallel",)),
    )(x, pos.astype(jnp.float32), g.reshape(1, D).astype(jnp.float32),
      b.reshape(1, D).astype(jnp.float32))


def _logits_kernel(img_ref, txt_ref, ls_ref, o_ref):
    # features arrive already L2-normalised (done inside their projections)
    sim = jax.lax.dot_general(img_ref[...], txt_ref[...],
                              (((1,), (1,)), ((), ())),
                              preferred_element_type=jnp.float32)
    o_ref[...] = (jnp.exp(ls_ref[0, 0]) * sim).astype(o_ref.dtype)


def clip_logits(image_features, text_features, logit_scale):
    B, E = image_features.shape
    C, _ = text_features.shape
    TB = B if B <= 256 else 256
    ls = jnp.reshape(logit_scale, (1, 1)).astype(jnp.float32)
    return pl.pallas_call(
        _logits_kernel,
        out_shape=jax.ShapeDtypeStruct((B, C), jnp.float32),
        grid=(pl.cdiv(B, TB),),
        in_specs=[pl.BlockSpec((TB, E), lambda i: (i, 0)),
                  pl.BlockSpec((C, E), lambda i: (0, 0)),
                  pl.BlockSpec((1, 1), lambda i: (0, 0))],
        out_specs=pl.BlockSpec((TB, C), lambda i: (i, 0)),
        compiler_params=pltpu.CompilerParams(
            dimension_semantics=("parallel",)),
    )(image_features, text_features, ls)


# ----------------------------- model (glue) -----------------------------

def resblock(x, p, n_heads, causal):
    """x: (B, L, D) bf16.  4 fused pallas_calls, no XLA element-wise glue."""
    B, L, D = x.shape
    x2d = x.reshape(B * L, D)
    # LN1 -> QKV (scale pre-folded into Q columns; bf16 feeds attention)
    qkv = fused_linear(x2d, p["w_qkv"], ln=(p["ln1_g"], p["ln1_b"]),
                       bias=p["b_qkv"], out_dtype=jnp.bfloat16)
    qkv = qkv.reshape(B, L, 3 * D)
    # attention (all heads) + single full-depth out-proj + residual
    x = attention_outproj(qkv, p["w_o"], p["b_o"], x,
                          n_heads=n_heads, causal=causal)
    x2d = x.reshape(B * L, D)
    # LN2 -> FC + QuickGELU (bf16 intermediate)
    h = fused_linear(x2d, p["w_fc"], ln=(p["ln2_g"], p["ln2_b"]),
                     bias=p["b_fc"], activation="quick_gelu",
                     out_dtype=jnp.bfloat16)
    # proj + bias + residual
    x2d = fused_linear(h, p["w_proj"], bias=p["b_proj"], residual=x2d,
                       out_dtype=jnp.bfloat16)
    return x2d.reshape(B, L, D)


def image_encoder(image, p, cfg):
    B, C, H, W = image.shape
    ps, width = cfg["patch"], cfg["v_width"]
    gh, gw = H // ps, W // ps
    # conv1 (kernel==stride==patch, no bias) as patch-extraction + matmul
    patches = image.reshape(B, C, gh, ps, gw, ps).transpose(0, 2, 4, 1, 3, 5)
    patches = patches.reshape(B * gh * gw, C * ps * ps).astype(jnp.float32)
    x = fused_linear(patches, p["conv1_w"],
                     out_dtype=jnp.bfloat16).reshape(B, gh * gw, width)
    cls = jnp.broadcast_to(
        p["class_emb"].reshape(1, 1, width).astype(jnp.bfloat16), (B, 1, width))
    x = jnp.concatenate([cls, x], axis=1)                 # (B, L, width) bf16
    # positional add + ln_pre fused in one kernel
    x = add_pos_layernorm(x, p["v_pos_emb"], p["ln_pre_g"], p["ln_pre_b"])
    for lp in p["layers"]:
        x = resblock(x, lp, cfg["v_heads"], causal=False)  # no mask in vision
    # ln_post applies only to the CLS token; fuse LN + projection + L2 norm.
    return fused_linear(x[:, 0, :], p["v_proj"],
                        ln=(p["ln_post_g"], p["ln_post_b"]),
                        l2_normalize=True, out_dtype=jnp.float32)


def prompt_learner_forward(p):
    # class_token_position == 'end': cat([prefix, ctx, suffix], dim=1)
    return jnp.concatenate([p["token_prefix"], p["ctx"], p["token_suffix"]],
                           axis=1)


def text_encoder(prompts, tokenized_prompts, p, cfg):
    n_cls, L, D = prompts.shape
    x = (prompts + p["t_pos_emb"][None]).astype(jnp.bfloat16)
    for lp in p["layers"]:
        x = resblock(x, lp, cfg["t_heads"], causal=True)   # causal text mask
    # per-token LN commutes with the EOT gather -> gather first, then fuse
    # ln_final with the text projection + L2 normalisation.
    eot = jnp.argmax(tokenized_prompts, axis=-1)            # (n_cls,)
    x_eot = jnp.take_along_axis(x, eot[:, None, None], axis=1)[:, 0, :]
    return fused_linear(x_eot, p["text_projection"],
                        ln=(p["ln_final_g"], p["ln_final_b"]),
                        l2_normalize=True, out_dtype=jnp.float32)


def coop_forward(image, params, cfg):
    image_features = image_encoder(image, params["visual"], cfg)
    prompts = prompt_learner_forward(params["prompt"])
    text_features = text_encoder(prompts, params["prompt"]["tokenized_prompts"],
                                 params["text"], cfg)
    return clip_logits(image_features, text_features, params["logit_scale"])


# ----------------------------- parameter init -----------------------------

def _init_layer(key, width, heads):
    std = 0.02
    k = jax.random.split(key, 4)
    bf = jnp.bfloat16
    dh = width // heads
    scale = 1.0 / math.sqrt(dh)
    # fold the attention scale into the Q columns of the QKV projection
    w_qkv = std * jax.random.normal(k[0], (width, 3 * width), jnp.float32)
    w_qkv = w_qkv.at[:, :width].multiply(scale)
    b_qkv = jnp.zeros((3 * width,), jnp.float32).at[:width].multiply(scale)
    return dict(
        ln1_g=jnp.ones((width,), jnp.float32),
        ln1_b=jnp.zeros((width,), jnp.float32),
        w_qkv=w_qkv.astype(bf),
        b_qkv=b_qkv,
        w_o=(std * jax.random.normal(k[1], (width, width),
                                     jnp.float32)).astype(bf),
        b_o=jnp.zeros((width,), jnp.float32),
        ln2_g=jnp.ones((width,), jnp.float32),
        ln2_b=jnp.zeros((width,), jnp.float32),
        w_fc=(std * jax.random.normal(k[2], (width, 4 * width),
                                      jnp.float32)).astype(bf),
        b_fc=jnp.zeros((4 * width,), jnp.float32),
        w_proj=(std * jax.random.normal(k[3], (4 * width, width),
                                        jnp.float32)).astype(bf),
        b_proj=jnp.zeros((width,), jnp.float32),
    )


def init_coop_params(key, cfg):
    std = 0.02
    bf = jnp.bfloat16
    keys = jax.random.split(key, 12)
    Dv, Dt, E = cfg["v_width"], cfg["t_width"], cfg["embed_dim"]
    ps, img = cfg["patch"], cfg["img_size"]
    n_tok = (img // ps) ** 2 + 1
    n_cls, n_ctx, Lt = cfg["n_cls"], cfg["n_ctx"], cfg["ctx_len"]

    visual = dict(
        conv1_w=(std * jax.random.normal(keys[0], (3 * ps * ps, Dv),
                                         jnp.float32)).astype(bf),
        class_emb=std * jax.random.normal(keys[1], (Dv,), jnp.float32),
        v_pos_emb=std * jax.random.normal(keys[2], (n_tok, Dv), jnp.float32),
        ln_pre_g=jnp.ones((Dv,), jnp.float32),
        ln_pre_b=jnp.zeros((Dv,), jnp.float32),
        ln_post_g=jnp.ones((Dv,), jnp.float32),
        ln_post_b=jnp.zeros((Dv,), jnp.float32),
        v_proj=(std * jax.random.normal(keys[3], (Dv, E),
                                        jnp.float32)).astype(bf),
        layers=[_init_layer(k, Dv, cfg["v_heads"])
                for k in jax.random.split(keys[4], cfg["v_layers"])],
    )

    text = dict(
        t_pos_emb=std * jax.random.normal(keys[5], (Lt, Dt), jnp.float32),
        ln_final_g=jnp.ones((Dt,), jnp.float32),
        ln_final_b=jnp.zeros((Dt,), jnp.float32),
        text_projection=(std * jax.random.normal(keys[6], (Dt, E),
                                                 jnp.float32)).astype(bf),
        layers=[_init_layer(k, Dt, cfg["t_heads"])
                for k in jax.random.split(keys[7], cfg["t_layers"])],
    )

    # PromptLearner: class-specific contexts (CSC=True); prefix/suffix buffers
    # stand in for CLIP token embeddings of "<SOS>" and "classname . <EOS> ...".
    suffix_len = Lt - 1 - n_ctx
    eot_pos = (1 + n_ctx + 1) + jnp.arange(n_cls) % suffix_len
    tokenized = jnp.ones((n_cls, Lt), jnp.int32)
    tokenized = tokenized.at[jnp.arange(n_cls), eot_pos].set(49407)
    prompt = dict(
        ctx=std * jax.random.normal(keys[8], (n_cls, n_ctx, Dt), jnp.float32),
        token_prefix=std * jax.random.normal(keys[9], (n_cls, 1, Dt),
                                             jnp.float32),
        token_suffix=std * jax.random.normal(keys[10], (n_cls, suffix_len, Dt),
                                             jnp.float32),
        tokenized_prompts=tokenized,
    )

    return dict(visual=visual, text=text, prompt=prompt,
                logit_scale=jnp.array(math.log(1.0 / 0.07), jnp.float32))


# ----------------------------- main -----------------------------

if __name__ == "__main__":
    cfg = dict(img_size=16, patch=8,
               v_width=64, v_heads=4, v_layers=2,
               t_width=64, t_heads=4, t_layers=2,
               embed_dim=64, n_cls=4, n_ctx=16, ctx_len=24)

    key = jax.random.PRNGKey(0)
    params = init_coop_params(key, cfg)
    image = jax.random.normal(jax.random.fold_in(key, 123),
                              (2, 3, cfg["img_size"], cfg["img_size"]),
                              jnp.float32)

    fwd = jax.jit(lambda img, prm: coop_forward(img, prm, cfg))
    logits = fwd(image, params)
    jax.block_until_ready(logits)

    assert logits.shape == (2, cfg["n_cls"]), logits.shape
    assert bool(jnp.all(jnp.isfinite(logits)))
    print("KERNEL_OK")
</pallas_src>

<mosaic_0001>
module attributes {stable_mosaic.version = 11 : i64} {
  func.func @_fused_linear_kernel(%arg0: i32, %arg1: i32, %arg2: memref<8x192xf32, #tpu.memory_space<vmem>>, %arg3: memref<192x64xbf16, #tpu.memory_space<vmem>>, %arg4: memref<8x64xbf16, #tpu.memory_space<vmem>>) attributes {dimension_semantics = [#tpu.dimension_semantics<parallel>, #tpu.dimension_semantics<arbitrary>], iteration_bounds = array<i64: 1, 1>, scalar_prefetch = 0 : i64, scratch_operands = 0 : i64, tpu.core_type = #tpu.core_type<tc>, window_params = [{transform_indices = @transform_0, window_bounds = array<i64: 8, 192>}, {transform_indices = @transform_1, window_bounds = array<i64: 192, 64>}, {transform_indices = @transform_2, window_bounds = array<i64: 8, 64>}]} {
    %c0 = arith.constant 0 : index
    %c0_0 = arith.constant 0 : index
    %0 = vector.load %arg2[%c0, %c0_0] : memref<8x192xf32, #tpu.memory_space<vmem>>, vector<8x192xf32>
    %1 = arith.truncf %0 : vector<8x192xf32> to vector<8x192xbf16>
    %c0_1 = arith.constant 0 : index
    %c0_2 = arith.constant 0 : index
    %2 = vector.load %arg3[%c0_1, %c0_2] : memref<192x64xbf16, #tpu.memory_space<vmem>>, vector<192x64xbf16>
    %cst = arith.constant dense<0.000000e+00> : vector<8x64xf32>
    %3 = tpu.matmul %1, %2, %cst {dimension_numbers = #tpu.dot_dimension_numbers<[1], [0], [0], [1], [0, 0, 1, 1], [], []>} : vector<8x192xbf16>, vector<192x64xbf16>, vector<8x64xf32> -> vector<8x64xf32>
    %4 = arith.truncf %3 : vector<8x64xf32> to vector<8x64xbf16>
    %c0_3 = arith.constant 0 : index
    %c0_4 = arith.constant 0 : index
    %5 = vector.load %arg4[%c0_3, %c0_4] : memref<8x64xbf16, #tpu.memory_space<vmem>>, vector<8x64xbf16>
    tpu.vector_store %arg4[%c0_3, %c0_4], %4 {strides = array<i32>} : memref<8x64xbf16, #tpu.memory_space<vmem>>, vector<8x64xbf16>,
    return
  }
  func.func @transform_0(%arg0: i32, %arg1: i32) -> (i32, i32) {
    %c0_i32 = arith.constant 0 : i32
    %c0_i32_0 = arith.constant 0 : i32
    return %arg0, %c0_i32 : i32, i32
  }
  func.func @transform_1(%arg0: i32, %arg1: i32) -> (i32, i32) {
    %c0_i32 = arith.constant 0 : i32
    %c0_i32_0 = arith.constant 0 : i32
    return %c0_i32, %arg1 : i32, i32
  }
  func.func @transform_2(%arg0: i32, %arg1: i32) -> (i32, i32) {
    %c0_i32 = arith.constant 0 : i32
    return %arg0, %arg1 : i32, i32
  }
}

module attributes {stable_mosaic.version = 11 : i64} {
  func.func @_fused_linear_kernel(%arg0: i32, %arg1: i32, %arg2: memref<10x64xbf16, #tpu.memory_space<vmem>>, %arg3: memref<1x64xf32, #tpu.memory_space<vmem>>, %arg4: memref<1x64xf32, #tpu.memory_space<vmem>>, %arg5: memref<64x192xbf16, #tpu.memory_space<vmem>>, %arg6: memref<1x192xf32, #tpu.memory_space<vmem>>, %arg7: memref<10x192xbf16, #tpu.memory_space<vmem>>, %arg8: memref<10x64xbf16, #tpu.memory_space<vmem>>) attributes {dimension_semantics = [#tpu.dimension_semantics<parallel>, #tpu.dimension_semantics<arbitrary>], iteration_bounds = array<i64: 1, 1>, scalar_prefetch = 0 : i64, scratch_operands = 1 : i64, tpu.core_type = #tpu.core_type<tc>, window_params = [{transform_indices = @transform_0, window_bounds = array<i64: 10, 64>}, {pipeline_mode = #tpu.pipeline_mode<synchronous>, transform_indices = @transform_1, window_bounds = array<i64: 1, 64>}, {pipeline_mode = #tpu.pipeline_mode<synchronous>, transform_indices = @transform_2, window_bounds = array<i64: 1, 64>}, {transform_indices = @transform_3, window_bounds = array<i64: 64, 192>}, {transform_indices = @transform_4, window_bounds = array<i64: 1, 192>}, {transform_indices = @transform_5, window_bounds = array<i64: 10, 192>}]} {
    %c0_i32 = arith.constant 0 : i32
    %0 = arith.cmpi eq, %arg1, %c0_i32 : i32
    %1 = arith.extui %0 : i1 to i32
    %c0_i32_0 = arith.constant 0 : i32
    %2 = arith.cmpi ne, %1, %c0_i32_0 : i32
    scf.if %2 {
      %c0_8 = arith.constant 0 : index
      %c0_9 = arith.constant 0 : index
      %11 = vector.load %arg2[%c0_8, %c0_9] : memref<10x64xbf16, #tpu.memory_space<vmem>>, vector<10x64xbf16>
      %12 = arith.extf %11 : vector<10x64xbf16> to vector<10x64xf32>
      %cst_10 = arith.constant dense<0.000000e+00> : vector<10xf32>
      %13 = vector.multi_reduction <add>, %12, %cst_10 [1] : vector<10x64xf32> to vector<10xf32>
      %14 = vector.shape_cast %13 : vector<10xf32> to vector<10x1xf32>
      %cst_11 = arith.constant 6.400000e+01 : f32
      %15 = vector.broadcast %cst_11 : f32 to vector<10x1xf32>
      %16 = arith.divf %14, %15 : vector<10x1xf32>
      %17 = vector.broadcast %16 : vector<10x1xf32> to vector<10x64xf32>
      %18 = arith.subf %12, %17 : vector<10x64xf32>
      %19 = arith.mulf %18, %18 : vector<10x64xf32>
      %cst_12 = arith.constant dense<0.000000e+00> : vector<10xf32>
      %20 = vector.multi_reduction <add>, %19, %cst_12 [1] : vector<10x64xf32> to vector<10xf32>
      %21 = vector.shape_cast %20 : vector<10xf32> to vector<10x1xf32>
      %cst_13 = arith.constant 6.400000e+01 : f32
      %22 = vector.broadcast %cst_13 : f32 to vector<10x1xf32>
      %23 = arith.divf %21, %22 : vector<10x1xf32>
      %24 = vector.broadcast %16 : vector<10x1xf32> to vector<10x64xf32>
      %25 = arith.subf %12, %24 : vector<10x64xf32>
      %cst_14 = arith.constant 9.99999974E-6 : f32
      %26 = vector.broadcast %cst_14 : f32 to vector<10x1xf32>
      %27 = arith.addf %23, %26 : vector<10x1xf32>
      %28 = math.rsqrt %27 : vector<10x1xf32>
      %29 = vector.broadcast %28 : vector<10x1xf32> to vector<10x64xf32>
      %30 = arith.mulf %25, %29 : vector<10x64xf32>
      %c0_15 = arith.constant 0 : index
      %c0_16 = arith.constant 0 : index
      %31 = vector.load %arg3[%c0_15, %c0_16] : memref<1x64xf32, #tpu.memory_space<vmem>>, vector<1x64xf32>
      %32 = vector.broadcast %31 : vector<1x64xf32> to vector<10x64xf32>
      %33 = arith.mulf %30, %32 : vector<10x64xf32>
      %c0_17 = arith.constant 0 : index
      %c0_18 = arith.constant 0 : index
      %34 = vector.load %arg4[%c0_17, %c0_18] : memref<1x64xf32, #tpu.memory_space<vmem>>, vector<1x64xf32>
      %35 = vector.broadcast %34 : vector<1x64xf32> to vector<10x64xf32>
      %36 = arith.addf %33, %35 : vector<10x64xf32>
      %37 = arith.truncf %36 : vector<10x64xf32> to vector<10x64xbf16>
      %c0_19 = arith.constant 0 : index
      %c0_20 = arith.constant 0 : index
      %38 = vector.load %arg8[%c0_19, %c0_20] : memref<10x64xbf16, #tpu.memory_space<vmem>>, vector<10x64xbf16>
      tpu.vector_store %arg8[%c0_19, %c0_20], %37 {strides = array<i32>} : memref<10x64xbf16, #tpu.memory_space<vmem>>, vector<10x64xbf16>,
    } else {
    }
    %c0 = arith.constant 0 : index
    %c0_1 = arith.constant 0 : index
    %3 = vector.load %arg8[%c0, %c0_1] : memref<10x64xbf16, #tpu.memory_space<vmem>>, vector<10x64xbf16>
    %c0_2 = arith.constant 0 : index
    %c0_3 = arith.constant 0 : index
    %4 = vector.load %arg5[%c0_2, %c0_3] : memref<64x192xbf16, #tpu.memory_space<vmem>>, vector<64x192xbf16>
    %cst = arith.constant dense<0.000000e+00> : vector<10x192xf32>
    %5 = tpu.matmul %3, %4, %cst {dimension_numbers = #tpu.dot_dimension_numbers<[1], [0], [0], [1], [0, 0, 1, 1], [], []>} : vector<10x64xbf16>, vector<64x192xbf16>, vector<10x192xf32> -> vector<10x192xf32>
    %c0_4 = arith.constant 0 : index
    %c0_5 = arith.constant 0 : index
    %6 = vector.load %arg6[%c0_4, %c0_5] : memref<1x192xf32, #tpu.memory_space<vmem>>, vector<1x192xf32>
    %7 = vector.broadcast %6 : vector<1x192xf32> to vector<10x192xf32>
    %8 = arith.addf %5, %7 : vector<10x192xf32>
    %9 = arith.truncf %8 : vector<10x192xf32> to vector<10x192xbf16>
    %c0_6 = arith.constant 0 : index
    %c0_7 = arith.constant 0 : index
    %10 = vector.load %arg7[%c0_6, %c0_7] : memref<10x192xbf16, #tpu.memory_space<vmem>>, vector<10x192xbf16>
    tpu.vector_store %arg7[%c0_6, %c0_7], %9 {strides = array<i32>} : memref<10x192xbf16, #tpu.memory_space<vmem>>, vector<10x192xbf16>,
    return
  }
  func.func @transform_0(%arg0: i32, %arg1: i32) -> (i32, i32) {
    %c0_i32 = arith.constant 0 : i32
    %c0_i32_0 = arith.constant 0 : i32
    return %arg0, %c0_i32 : i32, i32
  }
  func.func @transform_1(%arg0: i32, %arg1: i32) -> (i32, i32) {
    %c0_i32 = arith.constant 0 : i32
    %c0_i32_0 = arith.constant 0 : i32
    %c0_i32_1 = arith.constant 0 : i32
    return %c0_i32, %c0_i32_0 : i32, i32
  }
  func.func @transform_2(%arg0: i32, %arg1: i32) -> (i32, i32) {
    %c0_i32 = arith.constant 0 : i32
    %c0_i32_0 = arith.constant 0 : i32
    %c0_i32_1 = arith.constant 0 : i32
    return %c0_i32, %c0_i32_0 : i32, i32
  }
  func.func @transform_3(%arg0: i32, %arg1: i32) -> (i32, i32) {
    %c0_i32 = arith.constant 0 : i32
    %c0_i32_0 = arith.constant 0 : i32
    return %c0_i32, %arg1 : i32, i32
  }
  func.func @transform_4(%arg0: i32, %arg1: i32) -> (i32, i32) {
    %c0_i32 = arith.constant 0 : i32
    %c0_i32_0 = arith.constant 0 : i32
    return %c0_i32, %arg1 : i32, i32
  }
  func.func @transform_5(%arg0: i32, %arg1: i32) -> (i32, i32) {
    %c0_i32 = arith.constant 0 : i32
    return %arg0, %arg1 : i32, i32
  }
}

module attributes {stable_mosaic.version = 11 : i64} {
  func.func @_addpos_ln_kernel(%arg0: i32, %arg1: memref<1x5x64xbf16, #tpu.memory_space<vmem>>, %arg2: memref<5x64xf32, #tpu.memory_space<vmem>>, %arg3: memref<1x64xf32, #tpu.memory_space<vmem>>, %arg4: memref<1x64xf32, #tpu.memory_space<vmem>>, %arg5: memref<1x5x64xbf16, #tpu.memory_space<vmem>>) attributes {dimension_semantics = [#tpu.dimension_semantics<parallel>], iteration_bounds = array<i64: 2>, scalar_prefetch = 0 : i64, scratch_operands = 0 : i64, tpu.core_type = #tpu.core_type<tc>, window_params = [{transform_indices = @transform_0, window_bounds = array<i64: 1, 5, 64>}, {pipeline_mode = #tpu.pipeline_mode<synchronous>, transform_indices = @transform_1, window_bounds = array<i64: 5, 64>}, {pipeline_mode = #tpu.pipeline_mode<synchronous>, transform_indices = @transform_2, window_bounds = array<i64: 1, 64>}, {pipeline_mode = #tpu.pipeline_mode<synchronous>, transform_indices = @transform_3, window_bounds = array<i64: 1, 64>}, {transform_indices = @transform_4, window_bounds = array<i64: 1, 5, 64>}]} {
    %c0 = arith.constant 0 : index
    %c0_0 = arith.constant 0 : index
    %c0_1 = arith.constant 0 : index
    %0 = vector.load %arg1[%c0, %c0_0, %c0_1] : memref<1x5x64xbf16, #tpu.memory_space<vmem>>, vector<1x5x64xbf16>
    %1 = vector.shape_cast %0 : vector<1x5x64xbf16> to vector<5x64xbf16>
    %2 = arith.extf %1 : vector<5x64xbf16> to vector<5x64xf32>
    %c0_2 = arith.constant 0 : index
    %c0_3 = arith.constant 0 : index
    %3 = vector.load %arg2[%c0_2, %c0_3] : memref<5x64xf32, #tpu.memory_space<vmem>>, vector<5x64xf32>
    %4 = arith.addf %2, %3 : vector<5x64xf32>
    %cst = arith.constant dense<0.000000e+00> : vector<5xf32>
    %5 = vector.multi_reduction <add>, %4, %cst [1] : vector<5x64xf32> to vector<5xf32>
    %6 = vector.shape_cast %5 : vector<5xf32> to vector<5x1xf32>
    %cst_4 = arith.constant 6.400000e+01 : f32
    %7 = vector.broadcast %cst_4 : f32 to vector<5x1xf32>
    %8 = arith.divf %6, %7 : vector<5x1xf32>
    %9 = vector.broadcast %8 : vector<5x1xf32> to vector<5x64xf32>
    %10 = arith.subf %4, %9 : vector<5x64xf32>
    %11 = arith.mulf %10, %10 : vector<5x64xf32>
    %cst_5 = arith.constant dense<0.000000e+00> : vector<5xf32>
    %12 = vector.multi_reduction <add>, %11, %cst_5 [1] : vector<5x64xf32> to vector<5xf32>
    %13 = vector.shape_cast %12 : vector<5xf32> to vector<5x1xf32>
    %cst_6 = arith.constant 6.400000e+01 : f32
    %14 = vector.broadcast %cst_6 : f32 to vector<5x1xf32>
    %15 = arith.divf %13, %14 : vector<5x1xf32>
    %16 = vector.broadcast %8 : vector<5x1xf32> to vector<5x64xf32>
    %17 = arith.subf %4, %16 : vector<5x64xf32>
    %cst_7 = arith.constant 9.99999974E-6 : f32
    %18 = vector.broadcast %cst_7 : f32 to vector<5x1xf32>
    %19 = arith.addf %15, %18 : vector<5x1xf32>
    %20 = math.rsqrt %19 : vector<5x1xf32>
    %21 = vector.broadcast %20 : vector<5x1xf32> to vector<5x64xf32>
    %22 = arith.mulf %17, %21 : vector<5x64xf32>
    %c0_8 = arith.constant 0 : index
    %c0_9 = arith.constant 0 : index
    %23 = vector.load %arg3[%c0_8, %c0_9] : memref<1x64xf32, #tpu.memory_space<vmem>>, vector<1x64xf32>
    %24 = vector.broadcast %23 : vector<1x64xf32> to vector<5x64xf32>
    %25 = arith.mulf %22, %24 : vector<5x64xf32>
    %c0_10 = arith.constant 0 : index
    %c0_11 = arith.constant 0 : index
    %26 = vector.load %arg4[%c0_10, %c0_11] : memref<1x64xf32, #tpu.memory_space<vmem>>, vector<1x64xf32>
    %27 = vector.broadcast %26 : vector<1x64xf32> to vector<5x64xf32>
    %28 = arith.addf %25, %27 : vector<5x64xf32>
    %29 = arith.truncf %28 : vector<5x64xf32> to vector<5x64xbf16>
    %c0_12 = arith.constant 0 : index
    %c0_13 = arith.constant 0 : index
    %c0_14 = arith.constant 0 : index
    %30 = vector.load %arg5[%c0_12, %c0_13, %c0_14] : memref<1x5x64xbf16, #tpu.memory_space<vmem>>, vector<1x5x64xbf16>
    %31 = vector.shape_cast %30 : vector<1x5x64xbf16> to vector<5x64xbf16>
    %32 = vector.shape_cast %29 : vector<5x64xbf16> to vector<1x5x64xbf16>
    tpu.vector_store %arg5[%c0_12, %c0_13, %c0_14], %32 {strides = array<i32>} : memref<1x5x64xbf16, #tpu.memory_space<vmem>>, vector<1x5x64xbf16>,
    return
  }
  func.func @transform_0(%arg0: i32) -> (i32, i32, i32) {
    %c0_i32 = arith.constant 0 : i32
    %c0_i32_0 = arith.constant 0 : i32
    %c0_i32_1 = arith.constant 0 : i32
    return %arg0, %c0_i32, %c0_i32_0 : i32, i32, i32
  }
  func.func @transform_1(%arg0: i32) -> (i32, i32) {
    %c0_i32 = arith.constant 0 : i32
    %c0_i32_0 = arith.constant 0 : i32
    %c0_i32_1 = arith.constant 0 : i32
    return %c0_i32, %c0_i32_0 : i32, i32
  }
  func.func @transform_2(%arg0: i32) -> (i32, i32) {
    %c0_i32 = arith.constant 0 : i32
    %c0_i32_0 = arith.constant 0 : i32
    %c0_i32_1 = arith.constant 0 : i32
    return %c0_i32, %c0_i32_0 : i32, i32
  }
  func.func @transform_3(%arg0: i32) -> (i32, i32) {
    %c0_i32 = arith.constant 0 : i32
    %c0_i32_0 = arith.constant 0 : i32
    %c0_i32_1 = arith.constant 0 : i32
    return %c0_i32, %c0_i32_0 : i32, i32
  }
  func.func @transform_4(%arg0: i32) -> (i32, i32, i32) {
    %c0_i32 = arith.constant 0 : i32
    %c0_i32_0 = arith.constant 0 : i32
    %c0_i32_1 = arith.constant 0 : i32
    return %arg0, %c0_i32, %c0_i32_0 : i32, i32, i32
  }
}

module attributes {stable_mosaic.version = 11 : i64} {
  func.func @_attn_proj_kernel(%arg0: i32, %arg1: memref<1x5x192xbf16, #tpu.memory_space<vmem>>, %arg2: memref<64x64xbf16, #tpu.memory_space<vmem>>, %arg3: memref<1x64xf32, #tpu.memory_space<vmem>>, %arg4: memref<1x5x64xbf16, #tpu.memory_space<vmem>>, %arg5: memref<1x5x64xbf16, #tpu.memory_space<vmem>>, %arg6: memref<5x64xbf16, #tpu.memory_space<vmem>>) attributes {dimension_semantics = [#tpu.dimension_semantics<parallel>], iteration_bounds = array<i64: 2>, scalar_prefetch = 0 : i64, scratch_operands = 1 : i64, tpu.core_type = #tpu.core_type<tc>, window_params = [{transform_indices = @transform_0, window_bounds = array<i64: 1, 5, 192>}, {pipeline_mode = #tpu.pipeline_mode<synchronous>, transform_indices = @transform_1, window_bounds = array<i64: 64, 64>}, {pipeline_mode = #tpu.pipeline_mode<synchronous>, transform_indices = @transform_2, window_bounds = array<i64: 1, 64>}, {transform_indices = @transform_3, window_bounds = array<i64: 1, 5, 64>}, {transform_indices = @transform_4, window_bounds = array<i64: 1, 5, 64>}]} {
    %c0 = arith.constant 0 : index
    %c0_0 = arith.constant 0 : index
    %c0_1 = arith.constant 0 : index
    %0 = vector.load %arg1[%c0, %c0_0, %c0_1] : memref<1x5x192xbf16, #tpu.memory_space<vmem>>, vector<1x5x192xbf16>
    %1 = vector.shape_cast %0 : vector<1x5x192xbf16> to vector<5x192xbf16>
    %2 = vector.extract_strided_slice %1 {offsets = [0, 0], sizes = [5, 16], strides = [1, 1]} : vector<5x192xbf16> to vector<5x16xbf16>
    %3 = vector.extract_strided_slice %1 {offsets = [0, 64], sizes = [5, 16], strides = [1, 1]} : vector<5x192xbf16> to vector<5x16xbf16>
    %4 = vector.extract_strided_slice %1 {offsets = [0, 128], sizes = [5, 16], strides = [1, 1]} : vector<5x192xbf16> to vector<5x16xbf16>
    %cst = arith.constant dense<0.000000e+00> : vector<5x5xf32>
    %5 = tpu.matmul %2, %3, %cst {dimension_numbers = #tpu.dot_dimension_numbers<[1], [1], [0], [0], [0, 0, 1, 0], [], []>} : vector<5x16xbf16>, vector<5x16xbf16>, vector<5x5xf32> -> vector<5x5xf32>
    %cst_2 = arith.constant dense<0xFF800000> : vector<5xf32>
    %6 = vector.multi_reduction <maximumf>, %5, %cst_2 [1] : vector<5x5xf32> to vector<5xf32>
    %7 = vector.shape_cast %6 : vector<5xf32> to vector<5x1xf32>
    %8 = vector.broadcast %7 : vector<5x1xf32> to vector<5x5xf32>
    %9 = arith.subf %5, %8 : vector<5x5xf32>
    %10 = math.exp %9 : vector<5x5xf32>
    %cst_3 = arith.constant dense<0.000000e+00> : vector<5xf32>
    %11 = vector.multi_reduction <add>, %10, %cst_3 [1] : vector<5x5xf32> to vector<5xf32>
    %12 = vector.shape_cast %11 : vector<5xf32> to vector<5x1xf32>
    %13 = tpu.reciprocal %12 {approx = true} : vector<5x1xf32> -> vector<5x1xf32>
    %14 = vector.broadcast %13 : vector<5x1xf32> to vector<5x5xf32>
    %15 = arith.mulf %10, %14 : vector<5x5xf32>
    %16 = arith.truncf %15 : vector<5x5xf32> to vector<5x5xbf16>
    %cst_4 = arith.constant dense<0.000000e+00> : vector<5x16xf32>
    %17 = tpu.matmul %16, %4, %cst_4 {dimension_numbers = #tpu.dot_dimension_numbers<[1], [0], [0], [1], [0, 0, 1, 1], [], []>} : vector<5x5xbf16>, vector<5x16xbf16>, vector<5x16xf32> -> vector<5x16xf32>
    %18 = arith.truncf %17 : vector<5x16xf32> to vector<5x16xbf16>
    %c0_5 = arith.constant 0 : index
    %c0_6 = arith.constant 0 : index
    %19 = vector.load %arg6[%c0_5, %c0_6] : memref<5x64xbf16, #tpu.memory_space<vmem>>, vector<5x16xbf16>
    tpu.vector_store %arg6[%c0_5, %c0_6], %18 {strides = array<i32>} : memref<5x64xbf16, #tpu.memory_space<vmem>>, vector<5x16xbf16>,
    %20 = vector.extract_strided_slice %1 {offsets = [0, 16], sizes = [5, 16], strides = [1, 1]} : vector<5x192xbf16> to vector<5x16xbf16>
    %21 = vector.extract_strided_slice %1 {offsets = [0, 80], sizes = [5, 16], strides = [1, 1]} : vector<5x192xbf16> to vector<5x16xbf16>
    %22 = vector.extract_strided_slice %1 {offsets = [0, 144], sizes = [5, 16], strides = [1, 1]} : vector<5x192xbf16> to vector<5x16xbf16>
    %cst_7 = arith.constant dense<0.000000e+00> : vector<5x5xf32>
    %23 = tpu.matmul %20, %21, %cst_7 {dimension_numbers = #tpu.dot_dimension_numbers<[1], [1], [0], [0], [0, 0, 1, 0], [], []>} : vector<5x16xbf16>, vector<5x16xbf16>, vector<5x5xf32> -> vector<5x5xf32>
    %cst_8 = arith.constant dense<0xFF800000> : vector<5xf32>
    %24 = vector.multi_reduction <maximumf>, %23, %cst_8 [1] : vector<5x5xf32> to vector<5xf32>
    %25 = vector.shape_cast %24 : vector<5xf32> to vector<5x1xf32>
    %26 = vector.broadcast %25 : vector<5x1xf32> to vector<5x5xf32>
    %27 = arith.subf %23, %26 : vector<5x5xf32>
    %28 = math.exp %27 : vector<5x5xf32>
    %cst_9 = arith.constant dense<0.000000e+00> : vector<5xf32>
    %29 = vector.multi_reduction <add>, %28, %cst_9 [1] : vector<5x5xf32> to vector<5xf32>
    %30 = vector.shape_cast %29 : vector<5xf32> to vector<5x1xf32>
    %31 = tpu.reciprocal %30 {approx = true} : vector<5x1xf32> -> vector<5x1xf32>
    %32 = vector.broadcast %31 : vector<5x1xf32> to vector<5x5xf32>
    %33 = arith.mulf %28, %32 : vector<5x5xf32>
    %34 = arith.truncf %33 : vector<5x5xf32> to vector<5x5xbf16>
    %cst_10 = arith.constant dense<0.000000e+00> : vector<5x16xf32>
    %35 = tpu.matmul %34, %22, %cst_10 {dimension_numbers = #tpu.dot_dimension_numbers<[1], [0], [0], [1], [0, 0, 1, 1], [], []>} : vector<5x5xbf16>, vector<5x16xbf16>, vector<5x16xf32> -> vector<5x16xf32>
    %36 = arith.truncf %35 : vector<5x16xf32> to vector<5x16xbf16>
    %c0_11 = arith.constant 0 : index
    %c16 = arith.constant 16 : index
    %37 = vector.load %arg6[%c0_11, %c16] : memref<5x64xbf16, #tpu.memory_space<vmem>>, vector<5x16xbf16>
    tpu.vector_store %arg6[%c0_11, %c16], %36 {strides = array<i32>} : memref<5x64xbf16, #tpu.memory_space<vmem>>, vector<5x16xbf16>,
    %38 = vector.extract_strided_slice %1 {offsets = [0, 32], sizes = [5, 16], strides = [1, 1]} : vector<5x192xbf16> to vector<5x16xbf16>
    %39 = vector.extract_strided_slice %1 {offsets = [0, 96], sizes = [5, 16], strides = [1, 1]} : vector<5x192xbf16> to vector<5x16xbf16>
    %40 = vector.extract_strided_slice %1 {offsets = [0, 160], sizes = [5, 16], strides = [1, 1]} : vector<5x192xbf16> to vector<5x16xbf16>
    %cst_12 = arith.constant dense<0.000000e+00> : vector<5x5xf32>
    %41 = tpu.matmul %38, %39, %cst_12 {dimension_numbers = #tpu.dot_dimension_numbers<[1], [1], [0], [0], [0, 0, 1, 0], [], []>} : vector<5x16xbf16>, vector<5x16xbf16>, vector<5x5xf32> -> vector<5x5xf32>
    %cst_13 = arith.constant dense<0xFF800000> : vector<5xf32>
    %42 = vector.multi_reduction <maximumf>, %41, %cst_13 [1] : vector<5x5xf32> to vector<5xf32>
    %43 = vector.shape_cast %42 : vector<5xf32> to vector<5x1xf32>
    %44 = vector.broadcast %43 : vector<5x1xf32> to vector<5x5xf32>
    %45 = arith.subf %41, %44 : vector<5x5xf32>
    %46 = math.exp %45 : vector<5x5xf32>
    %cst_14 = arith.constant dense<0.000000e+00> : vector<5xf32>
    %47 = vector.multi_reduction <add>, %46, %cst_14 [1] : vector<5x5xf32> to vector<5xf32>
    %48 = vector.shape_cast %47 : vector<5xf32> to vector<5x1xf32>
    %49 = tpu.reciprocal %48 {approx = true} : vector<5x1xf32> -> vector<5x1xf32>
    %50 = vector.broadcast %49 : vector<5x1xf32> to vector<5x5xf32>
    %51 = arith.mulf %46, %50 : vector<5x5xf32>
    %52 = arith.truncf %51 : vector<5x5xf32> to vector<5x5xbf16>
    %cst_15 = arith.constant dense<0.000000e+00> : vector<5x16xf32>
    %53 = tpu.matmul %52, %40, %cst_15 {dimension_numbers = #tpu.dot_dimension_numbers<[1], [0], [0], [1], [0, 0, 1, 1], [], []>} : vector<5x5xbf16>, vector<5x16xbf16>, vector<5x16xf32> -> vector<5x16xf32>
    %54 = arith.truncf %53 : vector<5x16xf32> to vector<5x16xbf16>
    %c0_16 = arith.constant 0 : index
    %c32 = arith.constant 32 : index
    %55 = vector.load %arg6[%c0_16, %c32] : memref<5x64xbf16, #tpu.memory_space<vmem>>, vector<5x16xbf16>
    tpu.vector_store %arg6[%c0_16, %c32], %54 {strides = array<i32>} : memref<5x64xbf16, #tpu.memory_space<vmem>>, vector<5x16xbf16>,
    %56 = vector.extract_strided_slice %1 {offsets = [0, 48], sizes = [5, 16], strides = [1, 1]} : vector<5x192xbf16> to vector<5x16xbf16>
    %57 = vector.extract_strided_slice %1 {offsets = [0, 112], sizes = [5, 16], strides = [1, 1]} : vector<5x192xbf16> to vector<5x16xbf16>
    %58 = vector.extract_strided_slice %1 {offsets = [0, 176], sizes = [5, 16], strides = [1, 1]} : vector<5x192xbf16> to vector<5x16xbf16>
    %cst_17 = arith.constant dense<0.000000e+00> : vector<5x5xf32>
    %59 = tpu.matmul %56, %57, %cst_17 {dimension_numbers = #tpu.dot_dimension_numbers<[1], [1], [0], [0], [0, 0, 1, 0], [], []>} : vector<5x16xbf16>, vector<5x16xbf16>, vector<5x5xf32> -> vector<5x5xf32>
    %cst_18 = arith.constant dense<0xFF800000> : vector<5xf32>
    %60 = vector.multi_reduction <maximumf>, %59, %cst_18 [1] : vector<5x5xf32> to vector<5xf32>
    %61 = vector.shape_cast %60 : vector<5xf32> to vector<5x1xf32>
    %62 = vector.broadcast %61 : vector<5x1xf32> to vector<5x5xf32>
    %63 = arith.subf %59, %62 : vector<5x5xf32>
    %64 = math.exp %63 : vector<5x5xf32>
    %cst_19 = arith.constant dense<0.000000e+00> : vector<5xf32>
    %65 = vector.multi_reduction <add>, %64, %cst_19 [1] : vector<5x5xf32> to vector<5xf32>
    %66 = vector.shape_cast %65 : vector<5xf32> to vector<5x1xf32>
    %67 = tpu.reciprocal %66 {approx = true} : vector<5x1xf32> -> vector<5x1xf32>
    %68 = vector.broadcast %67 : vector<5x1xf32> to vector<5x5xf32>
    %69 = arith.mulf %64, %68 : vector<5x5xf32>
    %70 = arith.truncf %69 : vector<5x5xf32> to vector<5x5xbf16>
    %cst_20 = arith.constant dense<0.000000e+00> : vector<5x16xf32>
    %71 = tpu.matmul %70, %58, %cst_20 {dimension_numbers = #tpu.dot_dimension_numbers<[1], [0], [0], [1], [0, 0, 1, 1], [], []>} : vector<5x5xbf16>, vector<5x16xbf16>, vector<5x16xf32> -> vector<5x16xf32>
    %72 = arith.truncf %71 : vector<5x16xf32> to vector<5x16xbf16>
    %c0_21 = arith.constant 0 : index
    %c48 = arith.constant 48 : index
    %73 = vector.load %arg6[%c0_21, %c48] : memref<5x64xbf16, #tpu.memory_space<vmem>>, vector<5x16xbf16>
    tpu.vector_store %arg6[%c0_21, %c48], %72 {strides = array<i32>} : memref<5x64xbf16, #tpu.memory_space<vmem>>, vector<5x16xbf16>,
    %c0_22 = arith.constant 0 : index
    %c0_23 = arith.constant 0 : index
    %74 = vector.load %arg6[%c0_22, %c0_23] : memref<5x64xbf16, #tpu.memory_space<vmem>>, vector<5x64xbf16>
    %c0_24 = arith.constant 0 : index
    %c0_25 = arith.constant 0 : index
    %75 = vector.load %arg2[%c0_24, %c0_25] : memref<64x64xbf16, #tpu.memory_space<vmem>>, vector<64x64xbf16>
    %cst_26 = arith.constant dense<0.000000e+00> : vector<5x64xf32>
    %76 = tpu.matmul %74, %75, %cst_26 {dimension_numbers = #tpu.dot_dimension_numbers<[1], [0], [0], [1], [0, 0, 1, 1], [], []>} : vector<5x64xbf16>, vector<64x64xbf16>, vector<5x64xf32> -> vector<5x64xf32>
    %c0_27 = arith.constant 0 : index
    %c0_28 = arith.constant 0 : index
    %77 = vector.load %arg3[%c0_27, %c0_28] : memref<1x64xf32, #tpu.memory_space<vmem>>, vector<1x64xf32>
    %78 = vector.broadcast %77 : vector<1x64xf32> to vector<5x64xf32>
    %79 = arith.addf %76, %78 : vector<5x64xf32>
    %c0_29 = arith.constant 0 : index
    %c0_30 = arith.constant 0 : index
    %c0_31 = arith.constant 0 : index
    %80 = vector.load %arg4[%c0_29, %c0_30, %c0_31] : memref<1x5x64xbf16, #tpu.memory_space<vmem>>, vector<1x5x64xbf16>
    %81 = vector.shape_cast %80 : vector<1x5x64xbf16> to vector<5x64xbf16>
    %82 = arith.extf %81 : vector<5x64xbf16> to vector<5x64xf32>
    %83 = arith.addf %79, %82 : vector<5x64xf32>
    %84 = arith.truncf %83 : vector<5x64xf32> to vector<5x64xbf16>
    %c0_32 = arith.constant 0 : index
    %c0_33 = arith.constant 0 : index
    %c0_34 = arith.constant 0 : index
    %85 = vector.load %arg5[%c0_32, %c0_33, %c0_34] : memref<1x5x64xbf16, #tpu.memory_space<vmem>>, vector<1x5x64xbf16>
    %86 = vector.shape_cast %85 : vector<1x5x64xbf16> to vector<5x64xbf16>
    %87 = vector.shape_cast %84 : vector<5x64xbf16> to vector<1x5x64xbf16>
    tpu.vector_store %arg5[%c0_32, %c0_33, %c0_34], %87 {strides = array<i32>} : memref<1x5x64xbf16, #tpu.memory_space<vmem>>, vector<1x5x64xbf16>,
    return
  }
  func.func @transform_0(%arg0: i32) -> (i32, i32, i32) {
    %c0_i32 = arith.constant 0 : i32
    %c0_i32_0 = arith.constant 0 : i32
    %c0_i32_1 = arith.constant 0 : i32
    return %arg0, %c0_i32, %c0_i32_0 : i32, i32, i32
  }
  func.func @transform_1(%arg0: i32) -> (i32, i32) {
    %c0_i32 = arith.constant 0 : i32
    %c0_i32_0 = arith.constant 0 : i32
    %c0_i32_1 = arith.constant 0 : i32
    return %c0_i32, %c0_i32_0 : i32, i32
  }
  func.func @transform_2(%arg0: i32) -> (i32, i32) {
    %c0_i32 = arith.constant 0 : i32
    %c0_i32_0 = arith.constant 0 : i32
    %c0_i32_1 = arith.constant 0 : i32
    return %c0_i32, %c0_i32_0 : i32, i32
  }
  func.func @transform_3(%arg0: i32) -> (i32, i32, i32) {
    %c0_i32 = arith.constant 0 : i32
    %c0_i32_0 = arith.constant 0 : i32
    %c0_i32_1 = arith.constant 0 : i32
    return %arg0, %c0_i32, %c0_i32_0 : i32, i32, i32
  }
  func.func @transform_4(%arg0: i32) -> (i32, i32, i32) {
    %c0_i32 = arith.constant 0 : i32
    %c0_i32_0 = arith.constant 0 : i32
    %c0_i32_1 = arith.constant 0 : i32
    return %arg0, %c0_i32, %c0_i32_0 : i32, i32, i32
  }
}

module attributes {stable_mosaic.version = 11 : i64} {
  func.func @_fused_linear_kernel(%arg0: i32, %arg1: i32, %arg2: memref<10x64xbf16, #tpu.memory_space<vmem>>, %arg3: memref<1x64xf32, #tpu.memory_space<vmem>>, %arg4: memref<1x64xf32, #tpu.memory_space<vmem>>, %arg5: memref<64x256xbf16, #tpu.memory_space<vmem>>, %arg6: memref<1x256xf32, #tpu.memory_space<vmem>>, %arg7: memref<10x256xbf16, #tpu.memory_space<vmem>>, %arg8: memref<10x64xbf16, #tpu.memory_space<vmem>>) attributes {dimension_semantics = [#tpu.dimension_semantics<parallel>, #tpu.dimension_semantics<arbitrary>], iteration_bounds = array<i64: 1, 1>, scalar_prefetch = 0 : i64, scratch_operands = 1 : i64, tpu.core_type = #tpu.core_type<tc>, window_params = [{transform_indices = @transform_0, window_bounds = array<i64: 10, 64>}, {pipeline_mode = #tpu.pipeline_mode<synchronous>, transform_indices = @transform_1, window_bounds = array<i64: 1, 64>}, {pipeline_mode = #tpu.pipeline_mode<synchronous>, transform_indices = @transform_2, window_bounds = array<i64: 1, 64>}, {transform_indices = @transform_3, window_bounds = array<i64: 64, 256>}, {transform_indices = @transform_4, window_bounds = array<i64: 1, 256>}, {transform_indices = @transform_5, window_bounds = array<i64: 10, 256>}]} {
    %c0_i32 = arith.constant 0 : i32
    %0 = arith.cmpi eq, %arg1, %c0_i32 : i32
    %1 = arith.extui %0 : i1 to i32
    %c0_i32_0 = arith.constant 0 : i32
    %2 = arith.cmpi ne, %1, %c0_i32_0 : i32
    scf.if %2 {
      %c0_10 = arith.constant 0 : index
      %c0_11 = arith.constant 0 : index
      %19 = vector.load %arg2[%c0_10, %c0_11] : memref<10x64xbf16, #tpu.memory_space<vmem>>, vector<10x64xbf16>
      %20 = arith.extf %19 : vector<10x64xbf16> to vector<10x64xf32>
      %cst_12 = arith.constant dense<0.000000e+00> : vector<10xf32>
      %21 = vector.multi_reduction <add>, %20, %cst_12 [1] : vector<10x64xf32> to vector<10xf32>
      %22 = vector.shape_cast %21 : vector<10xf32> to vector<10x1xf32>
      %cst_13 = arith.constant 6.400000e+01 : f32
      %23 = vector.broadcast %cst_13 : f32 to vector<10x1xf32>
      %24 = arith.divf %22, %23 : vector<10x1xf32>
      %25 = vector.broadcast %24 : vector<10x1xf32> to vector<10x64xf32>
      %26 = arith.subf %20, %25 : vector<10x64xf32>
      %27 = arith.mulf %26, %26 : vector<10x64xf32>
      %cst_14 = arith.constant dense<0.000000e+00> : vector<10xf32>
      %28 = vector.multi_reduction <add>, %27, %cst_14 [1] : vector<10x64xf32> to vector<10xf32>
      %29 = vector.shape_cast %28 : vector<10xf32> to vector<10x1xf32>
      %cst_15 = arith.constant 6.400000e+01 : f32
      %30 = vector.broadcast %cst_15 : f32 to vector<10x1xf32>
      %31 = arith.divf %29, %30 : vector<10x1xf32>
      %32 = vector.broadcast %24 : vector<10x1xf32> to vector<10x64xf32>
      %33 = arith.subf %20, %32 : vector<10x64xf32>
      %cst_16 = arith.constant 9.99999974E-6 : f32
      %34 = vector.broadcast %cst_16 : f32 to vector<10x1xf32>
      %35 = arith.addf %31, %34 : vector<10x1xf32>
      %36 = math.rsqrt %35 : vector<10x1xf32>
      %37 = vector.broadcast %36 : vector<10x1xf32> to vector<10x64xf32>
      %38 = arith.mulf %33, %37 : vector<10x64xf32>
      %c0_17 = arith.constant 0 : index
      %c0_18 = arith.constant 0 : index
      %39 = vector.load %arg3[%c0_17, %c0_18] : memref<1x64xf32, #tpu.memory_space<vmem>>, vector<1x64xf32>
      %40 = vector.broadcast %39 : vector<1x64xf32> to vector<10x64xf32>
      %41 = arith.mulf %38, %40 : vector<10x64xf32>
      %c0_19 = arith.constant 0 : index
      %c0_20 = arith.constant 0 : index
      %42 = vector.load %arg4[%c0_19, %c0_20] : memref<1x64xf32, #tpu.memory_space<vmem>>, vector<1x64xf32>
      %43 = vector.broadcast %42 : vector<1x64xf32> to vector<10x64xf32>
      %44 = arith.addf %41, %43 : vector<10x64xf32>
      %45 = arith.truncf %44 : vector<10x64xf32> to vector<10x64xbf16>
      %c0_21 = arith.constant 0 : index
      %c0_22 = arith.constant 0 : index
      %46 = vector.load %arg8[%c0_21, %c0_22] : memref<10x64xbf16, #tpu.memory_space<vmem>>, vector<10x64xbf16>
      tpu.vector_store %arg8[%c0_21, %c0_22], %45 {strides = array<i32>} : memref<10x64xbf16, #tpu.memory_space<vmem>>, vector<10x64xbf16>,
    } else {
    }
    %c0 = arith.constant 0 : index
    %c0_1 = arith.constant 0 : index
    %3 = vector.load %arg8[%c0, %c0_1] : memref<10x64xbf16, #tpu.memory_space<vmem>>, vector<10x64xbf16>
    %c0_2 = arith.constant 0 : index
    %c0_3 = arith.constant 0 : index
    %4 = vector.load %arg5[%c0_2, %c0_3] : memref<64x256xbf16, #tpu.memory_space<vmem>>, vector<64x256xbf16>
    %cst = arith.constant dense<0.000000e+00> : vector<10x256xf32>
    %5 = tpu.matmul %3, %4, %cst {dimension_numbers = #tpu.dot_dimension_numbers<[1], [0], [0], [1], [0, 0, 1, 1], [], []>} : vector<10x64xbf16>, vector<64x256xbf16>, vector<10x256xf32> -> vector<10x256xf32>
    %c0_4 = arith.constant 0 : index
    %c0_5 = arith.constant 0 : index
    %6 = vector.load %arg6[%c0_4, %c0_5] : memref<1x256xf32, #tpu.memory_space<vmem>>, vector<1x256xf32>
    %7 = vector.broadcast %6 : vector<1x256xf32> to vector<10x256xf32>
    %8 = arith.addf %5, %7 : vector<10x256xf32>
    %cst_6 = arith.constant 1.702000e+00 : f32
    %9 = vector.broadcast %cst_6 : f32 to vector<10x256xf32>
    %10 = arith.mulf %9, %8 : vector<10x256xf32>
    %11 = arith.negf %10 : vector<10x256xf32>
    %12 = math.exp %11 : vector<10x256xf32>
    %cst_7 = arith.constant 1.000000e+00 : f32
    %13 = vector.broadcast %cst_7 : f32 to vector<10x256xf32>
    %14 = arith.addf %13, %12 : vector<10x256xf32>
    %15 = arith.divf %13, %14 : vector<10x256xf32>
    %16 = arith.mulf %8, %15 : vector<10x256xf32>
    %17 = arith.truncf %16 : vector<10x256xf32> to vector<10x256xbf16>
    %c0_8 = arith.constant 0 : index
    %c0_9 = arith.constant 0 : index
    %18 = vector.load %arg7[%c0_8, %c0_9] : memref<10x256xbf16, #tpu.memory_space<vmem>>, vector<10x256xbf16>
    tpu.vector_store %arg7[%c0_8, %c0_9], %17 {strides = array<i32>} : memref<10x256xbf16, #tpu.memory_space<vmem>>, vector<10x256xbf16>,
    return
  }
  func.func @transform_0(%arg0: i32, %arg1: i32) -> (i32, i32) {
    %c0_i32 = arith.constant 0 : i32
    %c0_i32_0 = arith.constant 0 : i32
    return %arg0, %c0_i32 : i32, i32
  }
  func.func @transform_1(%arg0: i32, %arg1: i32) -> (i32, i32) {
    %c0_i32 = arith.constant 0 : i32
    %c0_i32_0 = arith.constant 0 : i32
    %c0_i32_1 = arith.constant 0 : i32
    return %c0_i32, %c0_i32_0 : i32, i32
  }
  func.func @transform_2(%arg0: i32, %arg1: i32) -> (i32, i32) {
    %c0_i32 = arith.constant 0 : i32
    %c0_i32_0 = arith.constant 0 : i32
    %c0_i32_1 = arith.constant 0 : i32
    return %c0_i32, %c0_i32_0 : i32, i32
  }
  func.func @transform_3(%arg0: i32, %arg1: i32) -> (i32, i32) {
    %c0_i32 = arith.constant 0 : i32
    %c0_i32_0 = arith.constant 0 : i32
    return %c0_i32, %arg1 : i32, i32
  }
  func.func @transform_4(%arg0: i32, %arg1: i32) -> (i32, i32) {
    %c0_i32 = arith.constant 0 : i32
    %c0_i32_0 = arith.constant 0 : i32
    return %c0_i32, %arg1 : i32, i32
  }
  func.func @transform_5(%arg0: i32, %arg1: i32) -> (i32, i32) {
    %c0_i32 = arith.constant 0 : i32
    return %arg0, %arg1 : i32, i32
  }
}

module attributes {stable_mosaic.version = 11 : i64} {
  func.func @_fused_linear_kernel(%arg0: i32, %arg1: i32, %arg2: memref<10x256xbf16, #tpu.memory_space<vmem>>, %arg3: memref<256x64xbf16, #tpu.memory_space<vmem>>, %arg4: memref<1x64xf32, #tpu.memory_space<vmem>>, %arg5: memref<10x64xbf16, #tpu.memory_space<vmem>>, %arg6: memref<10x64xbf16, #tpu.memory_space<vmem>>) attributes {dimension_semantics = [#tpu.dimension_semantics<parallel>, #tpu.dimension_semantics<arbitrary>], iteration_bounds = array<i64: 1, 1>, scalar_prefetch = 0 : i64, scratch_operands = 0 : i64, tpu.core_type = #tpu.core_type<tc>, window_params = [{transform_indices = @transform_0, window_bounds = array<i64: 10, 256>}, {transform_indices = @transform_1, window_bounds = array<i64: 256, 64>}, {transform_indices = @transform_2, window_bounds = array<i64: 1, 64>}, {transform_indices = @transform_3, window_bounds = array<i64: 10, 64>}, {transform_indices = @transform_4, window_bounds = array<i64: 10, 64>}]} {
    %c0 = arith.constant 0 : index
    %c0_0 = arith.constant 0 : index
    %0 = vector.load %arg2[%c0, %c0_0] : memref<10x256xbf16, #tpu.memory_space<vmem>>, vector<10x256xbf16>
    %c0_1 = arith.constant 0 : index
    %c0_2 = arith.constant 0 : index
    %1 = vector.load %arg3[%c0_1, %c0_2] : memref<256x64xbf16, #tpu.memory_space<vmem>>, vector<256x64xbf16>
    %cst = arith.constant dense<0.000000e+00> : vector<10x64xf32>
    %2 = tpu.matmul %0, %1, %cst {dimension_numbers = #tpu.dot_dimension_numbers<[1], [0], [0], [1], [0, 0, 1, 1], [], []>} : vector<10x256xbf16>, vector<256x64xbf16>, vector<10x64xf32> -> vector<10x64xf32>
    %c0_3 = arith.constant 0 : index
    %c0_4 = arith.constant 0 : index
    %3 = vector.load %arg4[%c0_3, %c0_4] : memref<1x64xf32, #tpu.memory_space<vmem>>, vector<1x64xf32>
    %4 = vector.broadcast %3 : vector<1x64xf32> to vector<10x64xf32>
    %5 = arith.addf %2, %4 : vector<10x64xf32>
    %c0_5 = arith.constant 0 : index
    %c0_6 = arith.constant 0 : index
    %6 = vector.load %arg5[%c0_5, %c0_6] : memref<10x64xbf16, #tpu.memory_space<vmem>>, vector<10x64xbf16>
    %7 = arith.extf %6 : vector<10x64xbf16> to vector<10x64xf32>
    %8 = arith.addf %5, %7 : vector<10x64xf32>
    %9 = arith.truncf %8 : vector<10x64xf32> to vector<10x64xbf16>
    %c0_7 = arith.constant 0 : index
    %c0_8 = arith.constant 0 : index
    %10 = vector.load %arg6[%c0_7, %c0_8] : memref<10x64xbf16, #tpu.memory_space<vmem>>, vector<10x64xbf16>
    tpu.vector_store %arg6[%c0_7, %c0_8], %9 {strides = array<i32>} : memref<10x64xbf16, #tpu.memory_space<vmem>>, vector<10x64xbf16>,
    return
  }
  func.func @transform_0(%arg0: i32, %arg1: i32) -> (i32, i32) {
    %c0_i32 = arith.constant 0 : i32
    %c0_i32_0 = arith.constant 0 : i32
    return %arg0, %c0_i32 : i32, i32
  }
  func.func @transform_1(%arg0: i32, %arg1: i32) -> (i32, i32) {
    %c0_i32 = arith.constant 0 : i32
    %c0_i32_0 = arith.constant 0 : i32
    return %c0_i32, %arg1 : i32, i32
  }
  func.func @transform_2(%arg0: i32, %arg1: i32) -> (i32, i32) {
    %c0_i32 = arith.constant 0 : i32
    %c0_i32_0 = arith.constant 0 : i32
    return %c0_i32, %arg1 : i32, i32
  }
  func.func @transform_3(%arg0: i32, %arg1: i32) -> (i32, i32) {
    %c0_i32 = arith.constant 0 : i32
    return %arg0, %arg1 : i32, i32
  }
  func.func @transform_4(%arg0: i32, %arg1: i32) -> (i32, i32) {
    %c0_i32 = arith.constant 0 : i32
    return %arg0, %arg1 : i32, i32
  }
}

module attributes {stable_mosaic.version = 11 : i64} {
  func.func @_fused_linear_kernel(%arg0: i32, %arg1: i32, %arg2: memref<2x64xbf16, #tpu.memory_space<vmem>>, %arg3: memref<1x64xf32, #tpu.memory_space<vmem>>, %arg4: memref<1x64xf32, #tpu.memory_space<vmem>>, %arg5: memref<64x64xbf16, #tpu.memory_space<vmem>>, %arg6: memref<2x64xf32, #tpu.memory_space<vmem>>, %arg7: memref<2x64xbf16, #tpu.memory_space<vmem>>) attributes {dimension_semantics = [#tpu.dimension_semantics<parallel>, #tpu.dimension_semantics<arbitrary>], iteration_bounds = array<i64: 1, 1>, scalar_prefetch = 0 : i64, scratch_operands = 1 : i64, tpu.core_type = #tpu.core_type<tc>, window_params = [{transform_indices = @transform_0, window_bounds = array<i64: 2, 64>}, {pipeline_mode = #tpu.pipeline_mode<synchronous>, transform_indices = @transform_1, window_bounds = array<i64: 1, 64>}, {pipeline_mode = #tpu.pipeline_mode<synchronous>, transform_indices = @transform_2, window_bounds = array<i64: 1, 64>}, {transform_indices = @transform_3, window_bounds = array<i64: 64, 64>}, {transform_indices = @transform_4, window_bounds = array<i64: 2, 64>}]} {
    %c0_i32 = arith.constant 0 : i32
    %0 = arith.cmpi eq, %arg1, %c0_i32 : i32
    %1 = arith.extui %0 : i1 to i32
    %c0_i32_0 = arith.constant 0 : i32
    %2 = arith.cmpi ne, %1, %c0_i32_0 : i32
    scf.if %2 {
      %c0_8 = arith.constant 0 : index
      %c0_9 = arith.constant 0 : index
      %15 = vector.load %arg2[%c0_8, %c0_9] : memref<2x64xbf16, #tpu.memory_space<vmem>>, vector<2x64xbf16>
      %16 = arith.extf %15 : vector<2x64xbf16> to vector<2x64xf32>
      %cst_10 = arith.constant dense<0.000000e+00> : vector<2xf32>
      %17 = vector.multi_reduction <add>, %16, %cst_10 [1] : vector<2x64xf32> to vector<2xf32>
      %18 = vector.shape_cast %17 : vector<2xf32> to vector<2x1xf32>
      %cst_11 = arith.constant 6.400000e+01 : f32
      %19 = vector.broadcast %cst_11 : f32 to vector<2x1xf32>
      %20 = arith.divf %18, %19 : vector<2x1xf32>
      %21 = vector.broadcast %20 : vector<2x1xf32> to vector<2x64xf32>
      %22 = arith.subf %16, %21 : vector<2x64xf32>
      %23 = arith.mulf %22, %22 : vector<2x64xf32>
      %cst_12 = arith.constant dense<0.000000e+00> : vector<2xf32>
      %24 = vector.multi_reduction <add>, %23, %cst_12 [1] : vector<2x64xf32> to vector<2xf32>
      %25 = vector.shape_cast %24 : vector<2xf32> to vector<2x1xf32>
      %cst_13 = arith.constant 6.400000e+01 : f32
      %26 = vector.broadcast %cst_13 : f32 to vector<2x1xf32>
      %27 = arith.divf %25, %26 : vector<2x1xf32>
      %28 = vector.broadcast %20 : vector<2x1xf32> to vector<2x64xf32>
      %29 = arith.subf %16, %28 : vector<2x64xf32>
      %cst_14 = arith.constant 9.99999974E-6 : f32
      %30 = vector.broadcast %cst_14 : f32 to vector<2x1xf32>
      %31 = arith.addf %27, %30 : vector<2x1xf32>
      %32 = math.rsqrt %31 : vector<2x1xf32>
      %33 = vector.broadcast %32 : vector<2x1xf32> to vector<2x64xf32>
      %34 = arith.mulf %29, %33 : vector<2x64xf32>
      %c0_15 = arith.constant 0 : index
      %c0_16 = arith.constant 0 : index
      %35 = vector.load %arg3[%c0_15, %c0_16] : memref<1x64xf32, #tpu.memory_space<vmem>>, vector<1x64xf32>
      %36 = vector.broadcast %35 : vector<1x64xf32> to vector<2x64xf32>
      %37 = arith.mulf %34, %36 : vector<2x64xf32>
      %c0_17 = arith.constant 0 : index
      %c0_18 = arith.constant 0 : index
      %38 = vector.load %arg4[%c0_17, %c0_18] : memref<1x64xf32, #tpu.memory_space<vmem>>, vector<1x64xf32>
      %39 = vector.broadcast %38 : vector<1x64xf32> to vector<2x64xf32>
      %40 = arith.addf %37, %39 : vector<2x64xf32>
      %41 = arith.truncf %40 : vector<2x64xf32> to vector<2x64xbf16>
      %c0_19 = arith.constant 0 : index
      %c0_20 = arith.constant 0 : index
      %42 = vector.load %arg7[%c0_19, %c0_20] : memref<2x64xbf16, #tpu.memory_space<vmem>>, vector<2x64xbf16>
      tpu.vector_store %arg7[%c0_19, %c0_20], %41 {strides = array<i32>} : memref<2x64xbf16, #tpu.memory_space<vmem>>, vector<2x64xbf16>,
    } else {
    }
    %c0 = arith.constant 0 : index
    %c0_1 = arith.constant 0 : index
    %3 = vector.load %arg7[%c0, %c0_1] : memref<2x64xbf16, #tpu.memory_space<vmem>>, vector<2x64xbf16>
    %c0_2 = arith.constant 0 : index
    %c0_3 = arith.constant 0 : index
    %4 = vector.load %arg5[%c0_2, %c0_3] : memref<64x64xbf16, #tpu.memory_space<vmem>>, vector<64x64xbf16>
    %cst = arith.constant dense<0.000000e+00> : vector<2x64xf32>
    %5 = tpu.matmul %3, %4, %cst {dimension_numbers = #tpu.dot_dimension_numbers<[1], [0], [0], [1], [0, 0, 1, 1], [], []>} : vector<2x64xbf16>, vector<64x64xbf16>, vector<2x64xf32> -> vector<2x64xf32>
    %6 = arith.mulf %5, %5 : vector<2x64xf32>
    %cst_4 = arith.constant dense<0.000000e+00> : vector<2xf32>
    %7 = vector.multi_reduction <add>, %6, %cst_4 [1] : vector<2x64xf32> to vector<2xf32>
    %8 = vector.shape_cast %7 : vector<2xf32> to vector<2x1xf32>
    %cst_5 = arith.constant 9.99999996E-13 : f32
    %9 = vector.broadcast %cst_5 : f32 to vector<2x1xf32>
    %10 = arith.maximumf %8, %9 : vector<2x1xf32>
    %11 = math.rsqrt %10 : vector<2x1xf32>
    %12 = vector.broadcast %11 : vector<2x1xf32> to vector<2x64xf32>
    %13 = arith.mulf %5, %12 : vector<2x64xf32>
    %c0_6 = arith.constant 0 : index
    %c0_7 = arith.constant 0 : index
    %14 = vector.load %arg6[%c0_6, %c0_7] : memref<2x64xf32, #tpu.memory_space<vmem>>, vector<2x64xf32>
    tpu.vector_store %arg6[%c0_6, %c0_7], %13 {strides = array<i32>} : memref<2x64xf32, #tpu.memory_space<vmem>>, vector<2x64xf32>,
    return
  }
  func.func @transform_0(%arg0: i32, %arg1: i32) -> (i32, i32) {
    %c0_i32 = arith.constant 0 : i32
    %c0_i32_0 = arith.constant 0 : i32
    return %arg0, %c0_i32 : i32, i32
  }
  func.func @transform_1(%arg0: i32, %arg1: i32) -> (i32, i32) {
    %c0_i32 = arith.constant 0 : i32
    %c0_i32_0 = arith.constant 0 : i32
    %c0_i32_1 = arith.constant 0 : i32
    return %c0_i32, %c0_i32_0 : i32, i32
  }
  func.func @transform_2(%arg0: i32, %arg1: i32) -> (i32, i32) {
    %c0_i32 = arith.constant 0 : i32
    %c0_i32_0 = arith.constant 0 : i32
    %c0_i32_1 = arith.constant 0 : i32
    return %c0_i32, %c0_i32_0 : i32, i32
  }
  func.func @transform_3(%arg0: i32, %arg1: i32) -> (i32, i32) {
    %c0_i32 = arith.constant 0 : i32
    %c0_i32_0 = arith.constant 0 : i32
    return %c0_i32, %arg1 : i32, i32
  }
  func.func @transform_4(%arg0: i32, %arg1: i32) -> (i32, i32) {
    %c0_i32 = arith.constant 0 : i32
    return %arg0, %arg1 : i32, i32
  }
}

module attributes {stable_mosaic.version = 11 : i64} {
  func.func @_fused_linear_kernel(%arg0: i32, %arg1: i32, %arg2: memref<96x64xbf16, #tpu.memory_space<vmem>>, %arg3: memref<1x64xf32, #tpu.memory_space<vmem>>, %arg4: memref<1x64xf32, #tpu.memory_space<vmem>>, %arg5: memref<64x192xbf16, #tpu.memory_space<vmem>>, %arg6: memref<1x192xf32, #tpu.memory_space<vmem>>, %arg7: memref<96x192xbf16, #tpu.memory_space<vmem>>, %arg8: memref<96x64xbf16, #tpu.memory_space<vmem>>) attributes {dimension_semantics = [#tpu.dimension_semantics<parallel>, #tpu.dimension_semantics<arbitrary>], iteration_bounds = array<i64: 1, 1>, scalar_prefetch = 0 : i64, scratch_operands = 1 : i64, tpu.core_type = #tpu.core_type<tc>, window_params = [{transform_indices = @transform_0, window_bounds = array<i64: 96, 64>}, {pipeline_mode = #tpu.pipeline_mode<synchronous>, transform_indices = @transform_1, window_bounds = array<i64: 1, 64>}, {pipeline_mode = #tpu.pipeline_mode<synchronous>, transform_indices = @transform_2, window_bounds = array<i64: 1, 64>}, {transform_indices = @transform_3, window_bounds = array<i64: 64, 192>}, {transform_indices = @transform_4, window_bounds = array<i64: 1, 192>}, {transform_indices = @transform_5, window_bounds = array<i64: 96, 192>}]} {
    %c0_i32 = arith.constant 0 : i32
    %0 = arith.cmpi eq, %arg1, %c0_i32 : i32
    %1 = arith.extui %0 : i1 to i32
    %c0_i32_0 = arith.constant 0 : i32
    %2 = arith.cmpi ne, %1, %c0_i32_0 : i32
    scf.if %2 {
      %c0_8 = arith.constant 0 : index
      %c0_9 = arith.constant 0 : index
      %11 = vector.load %arg2[%c0_8, %c0_9] : memref<96x64xbf16, #tpu.memory_space<vmem>>, vector<96x64xbf16>
      %12 = arith.extf %11 : vector<96x64xbf16> to vector<96x64xf32>
      %cst_10 = arith.constant dense<0.000000e+00> : vector<96xf32>
      %13 = vector.multi_reduction <add>, %12, %cst_10 [1] : vector<96x64xf32> to vector<96xf32>
      %14 = vector.shape_cast %13 : vector<96xf32> to vector<96x1xf32>
      %cst_11 = arith.constant 6.400000e+01 : f32
      %15 = vector.broadcast %cst_11 : f32 to vector<96x1xf32>
      %16 = arith.divf %14, %15 : vector<96x1xf32>
      %17 = vector.broadcast %16 : vector<96x1xf32> to vector<96x64xf32>
      %18 = arith.subf %12, %17 : vector<96x64xf32>
      %19 = arith.mulf %18, %18 : vector<96x64xf32>
      %cst_12 = arith.constant dense<0.000000e+00> : vector<96xf32>
      %20 = vector.multi_reduction <add>, %19, %cst_12 [1] : vector<96x64xf32> to vector<96xf32>
      %21 = vector.shape_cast %20 : vector<96xf32> to vector<96x1xf32>
      %cst_13 = arith.constant 6.400000e+01 : f32
      %22 = vector.broadcast %cst_13 : f32 to vector<96x1xf32>
      %23 = arith.divf %21, %22 : vector<96x1xf32>
      %24 = vector.broadcast %16 : vector<96x1xf32> to vector<96x64xf32>
      %25 = arith.subf %12, %24 : vector<96x64xf32>
      %cst_14 = arith.constant 9.99999974E-6 : f32
      %26 = vector.broadcast %cst_14 : f32 to vector<96x1xf32>
      %27 = arith.addf %23, %26 : vector<96x1xf32>
      %28 = math.rsqrt %27 : vector<96x1xf32>
      %29 = vector.broadcast %28 : vector<96x1xf32> to vector<96x64xf32>
      %30 = arith.mulf %25, %29 : vector<96x64xf32>
      %c0_15 = arith.constant 0 : index
      %c0_16 = arith.constant 0 : index
      %31 = vector.load %arg3[%c0_15, %c0_16] : memref<1x64xf32, #tpu.memory_space<vmem>>, vector<1x64xf32>
      %32 = vector.broadcast %31 : vector<1x64xf32> to vector<96x64xf32>
      %33 = arith.mulf %30, %32 : vector<96x64xf32>
      %c0_17 = arith.constant 0 : index
      %c0_18 = arith.constant 0 : index
      %34 = vector.load %arg4[%c0_17, %c0_18] : memref<1x64xf32, #tpu.memory_space<vmem>>, vector<1x64xf32>
      %35 = vector.broadcast %34 : vector<1x64xf32> to vector<96x64xf32>
      %36 = arith.addf %33, %35 : vector<96x64xf32>
      %37 = arith.truncf %36 : vector<96x64xf32> to vector<96x64xbf16>
      %c0_19 = arith.constant 0 : index
      %c0_20 = arith.constant 0 : index
      %38 = vector.load %arg8[%c0_19, %c0_20] : memref<96x64xbf16, #tpu.memory_space<vmem>>, vector<96x64xbf16>
      tpu.vector_store %arg8[%c0_19, %c0_20], %37 {strides = array<i32>} : memref<96x64xbf16, #tpu.memory_space<vmem>>, vector<96x64xbf16>,
    } else {
    }
    %c0 = arith.constant 0 : index
    %c0_1 = arith.constant 0 : index
    %3 = vector.load %arg8[%c0, %c0_1] : memref<96x64xbf16, #tpu.memory_space<vmem>>, vector<96x64xbf16>
    %c0_2 = arith.constant 0 : index
    %c0_3 = arith.constant 0 : index
    %4 = vector.load %arg5[%c0_2, %c0_3] : memref<64x192xbf16, #tpu.memory_space<vmem>>, vector<64x192xbf16>
    %cst = arith.constant dense<0.000000e+00> : vector<96x192xf32>
    %5 = tpu.matmul %3, %4, %cst {dimension_numbers = #tpu.dot_dimension_numbers<[1], [0], [0], [1], [0, 0, 1, 1], [], []>} : vector<96x64xbf16>, vector<64x192xbf16>, vector<96x192xf32> -> vector<96x192xf32>
    %c0_4 = arith.constant 0 : index
    %c0_5 = arith.constant 0 : index
    %6 = vector.load %arg6[%c0_4, %c0_5] : memref<1x192xf32, #tpu.memory_space<vmem>>, vector<1x192xf32>
    %7 = vector.broadcast %6 : vector<1x192xf32> to vector<96x192xf32>
    %8 = arith.addf %5, %7 : vector<96x192xf32>
    %9 = arith.truncf %8 : vector<96x192xf32> to vector<96x192xbf16>
    %c0_6 = arith.constant 0 : index
    %c0_7 = arith.constant 0 : index
    %10 = vector.load %arg7[%c0_6, %c0_7] : memref<96x192xbf16, #tpu.memory_space<vmem>>, vector<96x192xbf16>
    tpu.vector_store %arg7[%c0_6, %c0_7], %9 {strides = array<i32>} : memref<96x192xbf16, #tpu.memory_space<vmem>>, vector<96x192xbf16>,
    return
  }
  func.func @transform_0(%arg0: i32, %arg1: i32) -> (i32, i32) {
    %c0_i32 = arith.constant 0 : i32
    %c0_i32_0 = arith.constant 0 : i32
    return %arg0, %c0_i32 : i32, i32
  }
  func.func @transform_1(%arg0: i32, %arg1: i32) -> (i32, i32) {
    %c0_i32 = arith.constant 0 : i32
    %c0_i32_0 = arith.constant 0 : i32
    %c0_i32_1 = arith.constant 0 : i32
    return %c0_i32, %c0_i32_0 : i32, i32
  }
  func.func @transform_2(%arg0: i32, %arg1: i32) -> (i32, i32) {
    %c0_i32 = arith.constant 0 : i32
    %c0_i32_0 = arith.constant 0 : i32
    %c0_i32_1 = arith.constant 0 : i32
    return %c0_i32, %c0_i32_0 : i32, i32
  }
  func.func @transform_3(%arg0: i32, %arg1: i32) -> (i32, i32) {
    %c0_i32 = arith.constant 0 : i32
    %c0_i32_0 = arith.constant 0 : i32
    return %c0_i32, %arg1 : i32, i32
  }
  func.func @transform_4(%arg0: i32, %arg1: i32) -> (i32, i32) {
    %c0_i32 = arith.constant 0 : i32
    %c0_i32_0 = arith.constant 0 : i32
    return %c0_i32, %arg1 : i32, i32
  }
  func.func @transform_5(%arg0: i32, %arg1: i32) -> (i32, i32) {
    %c0_i32 = arith.constant 0 : i32
    return %arg0, %arg1 : i32, i32
  }
}

module attributes {stable_mosaic.version = 11 : i64} {
  func.func @_attn_proj_kernel(%arg0: i32, %arg1: memref<1x24x192xbf16, #tpu.memory_space<vmem>>, %arg2: memref<64x64xbf16, #tpu.memory_space<vmem>>, %arg3: memref<1x64xf32, #tpu.memory_space<vmem>>, %arg4: memref<1x24x64xbf16, #tpu.memory_space<vmem>>, %arg5: memref<1x24x64xbf16, #tpu.memory_space<vmem>>, %arg6: memref<24x64xbf16, #tpu.memory_space<vmem>>) attributes {dimension_semantics = [#tpu.dimension_semantics<parallel>], iteration_bounds = array<i64: 4>, scalar_prefetch = 0 : i64, scratch_operands = 1 : i64, tpu.core_type = #tpu.core_type<tc>, window_params = [{transform_indices = @transform_0, window_bounds = array<i64: 1, 24, 192>}, {pipeline_mode = #tpu.pipeline_mode<synchronous>, transform_indices = @transform_1, window_bounds = array<i64: 64, 64>}, {pipeline_mode = #tpu.pipeline_mode<synchronous>, transform_indices = @transform_2, window_bounds = array<i64: 1, 64>}, {transform_indices = @transform_3, window_bounds = array<i64: 1, 24, 64>}, {transform_indices = @transform_4, window_bounds = array<i64: 1, 24, 64>}]} {
    %c0 = arith.constant 0 : index
    %c0_0 = arith.constant 0 : index
    %c0_1 = arith.constant 0 : index
    %0 = vector.load %arg1[%c0, %c0_0, %c0_1] : memref<1x24x192xbf16, #tpu.memory_space<vmem>>, vector<1x24x192xbf16>
    %1 = vector.shape_cast %0 : vector<1x24x192xbf16> to vector<24x192xbf16>
    %2 = tpu.iota {dimensions = array<i32: 0>} : vector<24x24xi32>
    %3 = tpu.iota {dimensions = array<i32: 1>} : vector<24x24xi32>
    %4 = arith.cmpi sle, %3, %2 : vector<24x24xi32>
    %5 = vector.extract_strided_slice %1 {offsets = [0, 0], sizes = [24, 16], strides = [1, 1]} : vector<24x192xbf16> to vector<24x16xbf16>
    %6 = vector.extract_strided_slice %1 {offsets = [0, 64], sizes = [24, 16], strides = [1, 1]} : vector<24x192xbf16> to vector<24x16xbf16>
    %7 = vector.extract_strided_slice %1 {offsets = [0, 128], sizes = [24, 16], strides = [1, 1]} : vector<24x192xbf16> to vector<24x16xbf16>
    %cst = arith.constant dense<0.000000e+00> : vector<24x24xf32>
    %8 = tpu.matmul %5, %6, %cst {dimension_numbers = #tpu.dot_dimension_numbers<[1], [1], [0], [0], [0, 0, 1, 0], [], []>} : vector<24x16xbf16>, vector<24x16xbf16>, vector<24x24xf32> -> vector<24x24xf32>
    %cst_2 = arith.constant -1.000000e+09 : f32
    %9 = vector.broadcast %cst_2 : f32 to vector<24x24xf32>
    %10 = arith.select %4, %8, %9 : vector<24x24xi1>, vector<24x24xf32>
    %cst_3 = arith.constant dense<0xFF800000> : vector<24xf32>
    %11 = vector.multi_reduction <maximumf>, %10, %cst_3 [1] : vector<24x24xf32> to vector<24xf32>
    %12 = vector.shape_cast %11 : vector<24xf32> to vector<24x1xf32>
    %13 = vector.broadcast %12 : vector<24x1xf32> to vector<24x24xf32>
    %14 = arith.subf %10, %13 : vector<24x24xf32>
    %15 = math.exp %14 : vector<24x24xf32>
    %cst_4 = arith.constant dense<0.000000e+00> : vector<24xf32>
    %16 = vector.multi_reduction <add>, %15, %cst_4 [1] : vector<24x24xf32> to vector<24xf32>
    %17 = vector.shape_cast %16 : vector<24xf32> to vector<24x1xf32>
    %18 = tpu.reciprocal %17 {approx = true} : vector<24x1xf32> -> vector<24x1xf32>
    %19 = vector.broadcast %18 : vector<24x1xf32> to vector<24x24xf32>
    %20 = arith.mulf %15, %19 : vector<24x24xf32>
    %21 = arith.truncf %20 : vector<24x24xf32> to vector<24x24xbf16>
    %cst_5 = arith.constant dense<0.000000e+00> : vector<24x16xf32>
    %22 = tpu.matmul %21, %7, %cst_5 {dimension_numbers = #tpu.dot_dimension_numbers<[1], [0], [0], [1], [0, 0, 1, 1], [], []>} : vector<24x24xbf16>, vector<24x16xbf16>, vector<24x16xf32> -> vector<24x16xf32>
    %23 = arith.truncf %22 : vector<24x16xf32> to vector<24x16xbf16>
    %c0_6 = arith.constant 0 : index
    %c0_7 = arith.constant 0 : index
    %24 = vector.load %arg6[%c0_6, %c0_7] : memref<24x64xbf16, #tpu.memory_space<vmem>>, vector<24x16xbf16>
    tpu.vector_store %arg6[%c0_6, %c0_7], %23 {strides = array<i32>} : memref<24x64xbf16, #tpu.memory_space<vmem>>, vector<24x16xbf16>,
    %25 = vector.extract_strided_slice %1 {offsets = [0, 16], sizes = [24, 16], strides = [1, 1]} : vector<24x192xbf16> to vector<24x16xbf16>
    %26 = vector.extract_strided_slice %1 {offsets = [0, 80], sizes = [24, 16], strides = [1, 1]} : vector<24x192xbf16> to vector<24x16xbf16>
    %27 = vector.extract_strided_slice %1 {offsets = [0, 144], sizes = [24, 16], strides = [1, 1]} : vector<24x192xbf16> to vector<24x16xbf16>
    %cst_8 = arith.constant dense<0.000000e+00> : vector<24x24xf32>
    %28 = tpu.matmul %25, %26, %cst_8 {dimension_numbers = #tpu.dot_dimension_numbers<[1], [1], [0], [0], [0, 0, 1, 0], [], []>} : vector<24x16xbf16>, vector<24x16xbf16>, vector<24x24xf32> -> vector<24x24xf32>
    %cst_9 = arith.constant -1.000000e+09 : f32
    %29 = vector.broadcast %cst_9 : f32 to vector<24x24xf32>
    %30 = arith.select %4, %28, %29 : vector<24x24xi1>, vector<24x24xf32>
    %cst_10 = arith.constant dense<0xFF800000> : vector<24xf32>
    %31 = vector.multi_reduction <maximumf>, %30, %cst_10 [1] : vector<24x24xf32> to vector<24xf32>
    %32 = vector.shape_cast %31 : vector<24xf32> to vector<24x1xf32>
    %33 = vector.broadcast %32 : vector<24x1xf32> to vector<24x24xf32>
    %34 = arith.subf %30, %33 : vector<24x24xf32>
    %35 = math.exp %34 : vector<24x24xf32>
    %cst_11 = arith.constant dense<0.000000e+00> : vector<24xf32>
    %36 = vector.multi_reduction <add>, %35, %cst_11 [1] : vector<24x24xf32> to vector<24xf32>
    %37 = vector.shape_cast %36 : vector<24xf32> to vector<24x1xf32>
    %38 = tpu.reciprocal %37 {approx = true} : vector<24x1xf32> -> vector<24x1xf32>
    %39 = vector.broadcast %38 : vector<24x1xf32> to vector<24x24xf32>
    %40 = arith.mulf %35, %39 : vector<24x24xf32>
    %41 = arith.truncf %40 : vector<24x24xf32> to vector<24x24xbf16>
    %cst_12 = arith.constant dense<0.000000e+00> : vector<24x16xf32>
    %42 = tpu.matmul %41, %27, %cst_12 {dimension_numbers = #tpu.dot_dimension_numbers<[1], [0], [0], [1], [0, 0, 1, 1], [], []>} : vector<24x24xbf16>, vector<24x16xbf16>, vector<24x16xf32> -> vector<24x16xf32>
    %43 = arith.truncf %42 : vector<24x16xf32> to vector<24x16xbf16>
    %c0_13 = arith.constant 0 : index
    %c16 = arith.constant 16 : index
    %44 = vector.load %arg6[%c0_13, %c16] : memref<24x64xbf16, #tpu.memory_space<vmem>>, vector<24x16xbf16>
    tpu.vector_store %arg6[%c0_13, %c16], %43 {strides = array<i32>} : memref<24x64xbf16, #tpu.memory_space<vmem>>, vector<24x16xbf16>,
    %45 = vector.extract_strided_slice %1 {offsets = [0, 32], sizes = [24, 16], strides = [1, 1]} : vector<24x192xbf16> to vector<24x16xbf16>
    %46 = vector.extract_strided_slice %1 {offsets = [0, 96], sizes = [24, 16], strides = [1, 1]} : vector<24x192xbf16> to vector<24x16xbf16>
    %47 = vector.extract_strided_slice %1 {offsets = [0, 160], sizes = [24, 16], strides = [1, 1]} : vector<24x192xbf16> to vector<24x16xbf16>
    %cst_14 = arith.constant dense<0.000000e+00> : vector<24x24xf32>
    %48 = tpu.matmul %45, %46, %cst_14 {dimension_numbers = #tpu.dot_dimension_numbers<[1], [1], [0], [0], [0, 0, 1, 0], [], []>} : vector<24x16xbf16>, vector<24x16xbf16>, vector<24x24xf32> -> vector<24x24xf32>
    %cst_15 = arith.constant -1.000000e+09 : f32
    %49 = vector.broadcast %cst_15 : f32 to vector<24x24xf32>
    %50 = arith.select %4, %48, %49 : vector<24x24xi1>, vector<24x24xf32>
    %cst_16 = arith.constant dense<0xFF800000> : vector<24xf32>
    %51 = vector.multi_reduction <maximumf>, %50, %cst_16 [1] : vector<24x24xf32> to vector<24xf32>
    %52 = vector.shape_cast %51 : vector<24xf32> to vector<24x1xf32>
    %53 = vector.broadcast %52 : vector<24x1xf32> to vector<24x24xf32>
    %54 = arith.subf %50, %53 : vector<24x24xf32>
    %55 = math.exp %54 : vector<24x24xf32>
    %cst_17 = arith.constant dense<0.000000e+00> : vector<24xf32>
    %56 = vector.multi_reduction <add>, %55, %cst_17 [1] : vector<24x24xf32> to vector<24xf32>
    %57 = vector.shape_cast %56 : vector<24xf32> to vector<24x1xf32>
    %58 = tpu.reciprocal %57 {approx = true} : vector<24x1xf32> -> vector<24x1xf32>
    %59 = vector.broadcast %58 : vector<24x1xf32> to vector<24x24xf32>
    %60 = arith.mulf %55, %59 : vector<24x24xf32>
    %61 = arith.truncf %60 : vector<24x24xf32> to vector<24x24xbf16>
    %cst_18 = arith.constant dense<0.000000e+00> : vector<24x16xf32>
    %62 = tpu.matmul %61, %47, %cst_18 {dimension_numbers = #tpu.dot_dimension_numbers<[1], [0], [0], [1], [0, 0, 1, 1], [], []>} : vector<24x24xbf16>, vector<24x16xbf16>, vector<24x16xf32> -> vector<24x16xf32>
    %63 = arith.truncf %62 : vector<24x16xf32> to vector<24x16xbf16>
    %c0_19 = arith.constant 0 : index
    %c32 = arith.constant 32 : index
    %64 = vector.load %arg6[%c0_19, %c32] : memref<24x64xbf16, #tpu.memory_space<vmem>>, vector<24x16xbf16>
    tpu.vector_store %arg6[%c0_19, %c32], %63 {strides = array<i32>} : memref<24x64xbf16, #tpu.memory_space<vmem>>, vector<24x16xbf16>,
    %65 = vector.extract_strided_slice %1 {offsets = [0, 48], sizes = [24, 16], strides = [1, 1]} : vector<24x192xbf16> to vector<24x16xbf16>
    %66 = vector.extract_strided_slice %1 {offsets = [0, 112], sizes = [24, 16], strides = [1, 1]} : vector<24x192xbf16> to vector<24x16xbf16>
    %67 = vector.extract_strided_slice %1 {offsets = [0, 176], sizes = [24, 16], strides = [1, 1]} : vector<24x192xbf16> to vector<24x16xbf16>
    %cst_20 = arith.constant dense<0.000000e+00> : vector<24x24xf32>
    %68 = tpu.matmul %65, %66, %cst_20 {dimension_numbers = #tpu.dot_dimension_numbers<[1], [1], [0], [0], [0, 0, 1, 0], [], []>} : vector<24x16xbf16>, vector<24x16xbf16>, vector<24x24xf32> -> vector<24x24xf32>
    %cst_21 = arith.constant -1.000000e+09 : f32
    %69 = vector.broadcast %cst_21 : f32 to vector<24x24xf32>
    %70 = arith.select %4, %68, %69 : vector<24x24xi1>, vector<24x24xf32>
    %cst_22 = arith.constant dense<0xFF800000> : vector<24xf32>
    %71 = vector.multi_reduction <maximumf>, %70, %cst_22 [1] : vector<24x24xf32> to vector<24xf32>
    %72 = vector.shape_cast %71 : vector<24xf32> to vector<24x1xf32>
    %73 = vector.broadcast %72 : vector<24x1xf32> to vector<24x24xf32>
    %74 = arith.subf %70, %73 : vector<24x24xf32>
    %75 = math.exp %74 : vector<24x24xf32>
    %cst_23 = arith.constant dense<0.000000e+00> : vector<24xf32>
    %76 = vector.multi_reduction <add>, %75, %cst_23 [1] : vector<24x24xf32> to vector<24xf32>
    %77 = vector.shape_cast %76 : vector<24xf32> to vector<24x1xf32>
    %78 = tpu.reciprocal %77 {approx = true} : vector<24x1xf32> -> vector<24x1xf32>
    %79 = vector.broadcast %78 : vector<24x1xf32> to vector<24x24xf32>
    %80 = arith.mulf %75, %79 : vector<24x24xf32>
    %81 = arith.truncf %80 : vector<24x24xf32> to vector<24x24xbf16>
    %cst_24 = arith.constant dense<0.000000e+00> : vector<24x16xf32>
    %82 = tpu.matmul %81, %67, %cst_24 {dimension_numbers = #tpu.dot_dimension_numbers<[1], [0], [0], [1], [0, 0, 1, 1], [], []>} : vector<24x24xbf16>, vector<24x16xbf16>, vector<24x16xf32> -> vector<24x16xf32>
    %83 = arith.truncf %82 : vector<24x16xf32> to vector<24x16xbf16>
    %c0_25 = arith.constant 0 : index
    %c48 = arith.constant 48 : index
    %84 = vector.load %arg6[%c0_25, %c48] : memref<24x64xbf16, #tpu.memory_space<vmem>>, vector<24x16xbf16>
    tpu.vector_store %arg6[%c0_25, %c48], %83 {strides = array<i32>} : memref<24x64xbf16, #tpu.memory_space<vmem>>, vector<24x16xbf16>,
    %c0_26 = arith.constant 0 : index
    %c0_27 = arith.constant 0 : index
    %85 = vector.load %arg6[%c0_26, %c0_27] : memref<24x64xbf16, #tpu.memory_space<vmem>>, vector<24x64xbf16>
    %c0_28 = arith.constant 0 : index
    %c0_29 = arith.constant 0 : index
    %86 = vector.load %arg2[%c0_28, %c0_29] : memref<64x64xbf16, #tpu.memory_space<vmem>>, vector<64x64xbf16>
    %cst_30 = arith.constant dense<0.000000e+00> : vector<24x64xf32>
    %87 = tpu.matmul %85, %86, %cst_30 {dimension_numbers = #tpu.dot_dimension_numbers<[1], [0], [0], [1], [0, 0, 1, 1], [], []>} : vector<24x64xbf16>, vector<64x64xbf16>, vector<24x64xf32> -> vector<24x64xf32>
    %c0_31 = arith.constant 0 : index
    %c0_32 = arith.constant 0 : index
    %88 = vector.load %arg3[%c0_31, %c0_32] : memref<1x64xf32, #tpu.memory_space<vmem>>, vector<1x64xf32>
    %89 = vector.broadcast %88 : vector<1x64xf32> to vector<24x64xf32>
    %90 = arith.addf %87, %89 : vector<24x64xf32>
    %c0_33 = arith.constant 0 : index
    %c0_34 = arith.constant 0 : index
    %c0_35 = arith.constant 0 : index
    %91 = vector.load %arg4[%c0_33, %c0_34, %c0_35] : memref<1x24x64xbf16, #tpu.memory_space<vmem>>, vector<1x24x64xbf16>
    %92 = vector.shape_cast %91 : vector<1x24x64xbf16> to vector<24x64xbf16>
    %93 = arith.extf %92 : vector<24x64xbf16> to vector<24x64xf32>
    %94 = arith.addf %90, %93 : vector<24x64xf32>
    %95 = arith.truncf %94 : vector<24x64xf32> to vector<24x64xbf16>
    %c0_36 = arith.constant 0 : index
    %c0_37 = arith.constant 0 : index
    %c0_38 = arith.constant 0 : index
    %96 = vector.load %arg5[%c0_36, %c0_37, %c0_38] : memref<1x24x64xbf16, #tpu.memory_space<vmem>>, vector<1x24x64xbf16>
    %97 = vector.shape_cast %96 : vector<1x24x64xbf16> to vector<24x64xbf16>
    %98 = vector.shape_cast %95 : vector<24x64xbf16> to vector<1x24x64xbf16>
    tpu.vector_store %arg5[%c0_36, %c0_37, %c0_38], %98 {strides = array<i32>} : memref<1x24x64xbf16, #tpu.memory_space<vmem>>, vector<1x24x64xbf16>,
    return
  }
  func.func @transform_0(%arg0: i32) -> (i32, i32, i32) {
    %c0_i32 = arith.constant 0 : i32
    %c0_i32_0 = arith.constant 0 : i32
    %c0_i32_1 = arith.constant 0 : i32
    return %arg0, %c0_i32, %c0_i32_0 : i32, i32, i32
  }
  func.func @transform_1(%arg0: i32) -> (i32, i32) {
    %c0_i32 = arith.constant 0 : i32
    %c0_i32_0 = arith.constant 0 : i32
    %c0_i32_1 = arith.constant 0 : i32
    return %c0_i32, %c0_i32_0 : i32, i32
  }
  func.func @transform_2(%arg0: i32) -> (i32, i32) {
    %c0_i32 = arith.constant 0 : i32
    %c0_i32_0 = arith.constant 0 : i32
    %c0_i32_1 = arith.constant 0 : i32
    return %c0_i32, %c0_i32_0 : i32, i32
  }
  func.func @transform_3(%arg0: i32) -> (i32, i32, i32) {
    %c0_i32 = arith.constant 0 : i32
    %c0_i32_0 = arith.constant 0 : i32
    %c0_i32_1 = arith.constant 0 : i32
    return %arg0, %c0_i32, %c0_i32_0 : i32, i32, i32
  }
  func.func @transform_4(%arg0: i32) -> (i32, i32, i32) {
    %c0_i32 = arith.constant 0 : i32
    %c0_i32_0 = arith.constant 0 : i32
    %c0_i32_1 = arith.constant 0 : i32
    return %arg0, %c0_i32, %c0_i32_0 : i32, i32, i32
  }
}

module attributes {stable_mosaic.version = 11 : i64} {
  func.func @_fused_linear_kernel(%arg0: i32, %arg1: i32, %arg2: memref<96x256xbf16, #tpu.memory_space<vmem>>, %arg3: memref<256x64xbf16, #tpu.memory_space<vmem>>, %arg4: memref<1x64xf32, #tpu.memory_space<vmem>>, %arg5: memref<96x64xbf16, #tpu.memory_space<vmem>>, %arg6: memref<96x64xbf16, #tpu.memory_space<vmem>>) attributes {dimension_semantics = [#tpu.dimension_semantics<parallel>, #tpu.dimension_semantics<arbitrary>], iteration_bounds = array<i64: 1, 1>, scalar_prefetch = 0 : i64, scratch_operands = 0 : i64, tpu.core_type = #tpu.core_type<tc>, window_params = [{transform_indices = @transform_0, window_bounds = array<i64: 96, 256>}, {transform_indices = @transform_1, window_bounds = array<i64: 256, 64>}, {transform_indices = @transform_2, window_bounds = array<i64: 1, 64>}, {transform_indices = @transform_3, window_bounds = array<i64: 96, 64>}, {transform_indices = @transform_4, window_bounds = array<i64: 96, 64>}]} {
    %c0 = arith.constant 0 : index
    %c0_0 = arith.constant 0 : index
    %0 = vector.load %arg2[%c0, %c0_0] : memref<96x256xbf16, #tpu.memory_space<vmem>>, vector<96x256xbf16>
    %c0_1 = arith.constant 0 : index
    %c0_2 = arith.constant 0 : index
    %1 = vector.load %arg3[%c0_1, %c0_2] : memref<256x64xbf16, #tpu.memory_space<vmem>>, vector<256x64xbf16>
    %cst = arith.constant dense<0.000000e+00> : vector<96x64xf32>
    %2 = tpu.matmul %0, %1, %cst {dimension_numbers = #tpu.dot_dimension_numbers<[1], [0], [0], [1], [0, 0, 1, 1], [], []>} : vector<96x256xbf16>, vector<256x64xbf16>, vector<96x64xf32> -> vector<96x64xf32>
    %c0_3 = arith.constant 0 : index
    %c0_4 = arith.constant 0 : index
    %3 = vector.load %arg4[%c0_3, %c0_4] : memref<1x64xf32, #tpu.memory_space<vmem>>, vector<1x64xf32>
    %4 = vector.broadcast %3 : vector<1x64xf32> to vector<96x64xf32>
    %5 = arith.addf %2, %4 : vector<96x64xf32>
    %c0_5 = arith.constant 0 : index
    %c0_6 = arith.constant 0 : index
    %6 = vector.load %arg5[%c0_5, %c0_6] : memref<96x64xbf16, #tpu.memory_space<vmem>>, vector<96x64xbf16>
    %7 = arith.extf %6 : vector<96x64xbf16> to vector<96x64xf32>
    %8 = arith.addf %5, %7 : vector<96x64xf32>
    %9 = arith.truncf %8 : vector<96x64xf32> to vector<96x64xbf16>
    %c0_7 = arith.constant 0 : index
    %c0_8 = arith.constant 0 : index
    %10 = vector.load %arg6[%c0_7, %c0_8] : memref<96x64xbf16, #tpu.memory_space<vmem>>, vector<96x64xbf16>
    tpu.vector_store %arg6[%c0_7, %c0_8], %9 {strides = array<i32>} : memref<96x64xbf16, #tpu.memory_space<vmem>>, vector<96x64xbf16>,
    return
  }
  func.func @transform_0(%arg0: i32, %arg1: i32) -> (i32, i32) {
    %c0_i32 = arith.constant 0 : i32
    %c0_i32_0 = arith.constant 0 : i32
    return %arg0, %c0_i32 : i32, i32
  }
  func.func @transform_1(%arg0: i32, %arg1: i32) -> (i32, i32) {
    %c0_i32 = arith.constant 0 : i32
    %c0_i32_0 = arith.constant 0 : i32
    return %c0_i32, %arg1 : i32, i32
  }
  func.func @transform_2(%arg0: i32, %arg1: i32) -> (i32, i32) {
    %c0_i32 = arith.constant 0 : i32
    %c0_i32_0 = arith.constant 0 : i32
    return %c0_i32, %arg1 : i32, i32
  }
  func.func @transform_3(%arg0: i32, %arg1: i32) -> (i32, i32) {
    %c0_i32 = arith.constant 0 : i32
    return %arg0, %arg1 : i32, i32
  }
  func.func @transform_4(%arg0: i32, %arg1: i32) -> (i32, i32) {
    %c0_i32 = arith.constant 0 : i32
    return %arg0, %arg1 : i32, i32
  }
}

module attributes {stable_mosaic.version = 11 : i64} {
  func.func @_fused_linear_kernel(%arg0: i32, %arg1: i32, %arg2: memref<96x64xbf16, #tpu.memory_space<vmem>>, %arg3: memref<1x64xf32, #tpu.memory_space<vmem>>, %arg4: memref<1x64xf32, #tpu.memory_space<vmem>>, %arg5: memref<64x256xbf16, #tpu.memory_space<vmem>>, %arg6: memref<1x256xf32, #tpu.memory_space<vmem>>, %arg7: memref<96x256xbf16, #tpu.memory_space<vmem>>, %arg8: memref<96x64xbf16, #tpu.memory_space<vmem>>) attributes {dimension_semantics = [#tpu.dimension_semantics<parallel>, #tpu.dimension_semantics<arbitrary>], iteration_bounds = array<i64: 1, 1>, scalar_prefetch = 0 : i64, scratch_operands = 1 : i64, tpu.core_type = #tpu.core_type<tc>, window_params = [{transform_indices = @transform_0, window_bounds = array<i64: 96, 64>}, {pipeline_mode = #tpu.pipeline_mode<synchronous>, transform_indices = @transform_1, window_bounds = array<i64: 1, 64>}, {pipeline_mode = #tpu.pipeline_mode<synchronous>, transform_indices = @transform_2, window_bounds = array<i64: 1, 64>}, {transform_indices = @transform_3, window_bounds = array<i64: 64, 256>}, {transform_indices = @transform_4, window_bounds = array<i64: 1, 256>}, {transform_indices = @transform_5, window_bounds = array<i64: 96, 256>}]} {
    %c0_i32 = arith.constant 0 : i32
    %0 = arith.cmpi eq, %arg1, %c0_i32 : i32
    %1 = arith.extui %0 : i1 to i32
    %c0_i32_0 = arith.constant 0 : i32
    %2 = arith.cmpi ne, %1, %c0_i32_0 : i32
    scf.if %2 {
      %c0_10 = arith.constant 0 : index
      %c0_11 = arith.constant 0 : index
      %19 = vector.load %arg2[%c0_10, %c0_11] : memref<96x64xbf16, #tpu.memory_space<vmem>>, vector<96x64xbf16>
      %20 = arith.extf %19 : vector<96x64xbf16> to vector<96x64xf32>
      %cst_12 = arith.constant dense<0.000000e+00> : vector<96xf32>
      %21 = vector.multi_reduction <add>, %20, %cst_12 [1] : vector<96x64xf32> to vector<96xf32>
      %22 = vector.shape_cast %21 : vector<96xf32> to vector<96x1xf32>
      %cst_13 = arith.constant 6.400000e+01 : f32
      %23 = vector.broadcast %cst_13 : f32 to vector<96x1xf32>
      %24 = arith.divf %22, %23 : vector<96x1xf32>
      %25 = vector.broadcast %24 : vector<96x1xf32> to vector<96x64xf32>
      %26 = arith.subf %20, %25 : vector<96x64xf32>
      %27 = arith.mulf %26, %26 : vector<96x64xf32>
      %cst_14 = arith.constant dense<0.000000e+00> : vector<96xf32>
      %28 = vector.multi_reduction <add>, %27, %cst_14 [1] : vector<96x64xf32> to vector<96xf32>
      %29 = vector.shape_cast %28 : vector<96xf32> to vector<96x1xf32>
      %cst_15 = arith.constant 6.400000e+01 : f32
      %30 = vector.broadcast %cst_15 : f32 to vector<96x1xf32>
      %31 = arith.divf %29, %30 : vector<96x1xf32>
      %32 = vector.broadcast %24 : vector<96x1xf32> to vector<96x64xf32>
      %33 = arith.subf %20, %32 : vector<96x64xf32>
      %cst_16 = arith.constant 9.99999974E-6 : f32
      %34 = vector.broadcast %cst_16 : f32 to vector<96x1xf32>
      %35 = arith.addf %31, %34 : vector<96x1xf32>
      %36 = math.rsqrt %35 : vector<96x1xf32>
      %37 = vector.broadcast %36 : vector<96x1xf32> to vector<96x64xf32>
      %38 = arith.mulf %33, %37 : vector<96x64xf32>
      %c0_17 = arith.constant 0 : index
      %c0_18 = arith.constant 0 : index
      %39 = vector.load %arg3[%c0_17, %c0_18] : memref<1x64xf32, #tpu.memory_space<vmem>>, vector<1x64xf32>
      %40 = vector.broadcast %39 : vector<1x64xf32> to vector<96x64xf32>
      %41 = arith.mulf %38, %40 : vector<96x64xf32>
      %c0_19 = arith.constant 0 : index
      %c0_20 = arith.constant 0 : index
      %42 = vector.load %arg4[%c0_19, %c0_20] : memref<1x64xf32, #tpu.memory_space<vmem>>, vector<1x64xf32>
      %43 = vector.broadcast %42 : vector<1x64xf32> to vector<96x64xf32>
      %44 = arith.addf %41, %43 : vector<96x64xf32>
      %45 = arith.truncf %44 : vector<96x64xf32> to vector<96x64xbf16>
      %c0_21 = arith.constant 0 : index
      %c0_22 = arith.constant 0 : index
      %46 = vector.load %arg8[%c0_21, %c0_22] : memref<96x64xbf16, #tpu.memory_space<vmem>>, vector<96x64xbf16>
      tpu.vector_store %arg8[%c0_21, %c0_22], %45 {strides = array<i32>} : memref<96x64xbf16, #tpu.memory_space<vmem>>, vector<96x64xbf16>,
    } else {
    }
    %c0 = arith.constant 0 : index
    %c0_1 = arith.constant 0 : index
    %3 = vector.load %arg8[%c0, %c0_1] : memref<96x64xbf16, #tpu.memory_space<vmem>>, vector<96x64xbf16>
    %c0_2 = arith.constant 0 : index
    %c0_3 = arith.constant 0 : index
    %4 = vector.load %arg5[%c0_2, %c0_3] : memref<64x256xbf16, #tpu.memory_space<vmem>>, vector<64x256xbf16>
    %cst = arith.constant dense<0.000000e+00> : vector<96x256xf32>
    %5 = tpu.matmul %3, %4, %cst {dimension_numbers = #tpu.dot_dimension_numbers<[1], [0], [0], [1], [0, 0, 1, 1], [], []>} : vector<96x64xbf16>, vector<64x256xbf16>, vector<96x256xf32> -> vector<96x256xf32>
    %c0_4 = arith.constant 0 : index
    %c0_5 = arith.constant 0 : index
    %6 = vector.load %arg6[%c0_4, %c0_5] : memref<1x256xf32, #tpu.memory_space<vmem>>, vector<1x256xf32>
    %7 = vector.broadcast %6 : vector<1x256xf32> to vector<96x256xf32>
    %8 = arith.addf %5, %7 : vector<96x256xf32>
    %cst_6 = arith.constant 1.702000e+00 : f32
    %9 = vector.broadcast %cst_6 : f32 to vector<96x256xf32>
    %10 = arith.mulf %9, %8 : vector<96x256xf32>
    %11 = arith.negf %10 : vector<96x256xf32>
    %12 = math.exp %11 : vector<96x256xf32>
    %cst_7 = arith.constant 1.000000e+00 : f32
    %13 = vector.broadcast %cst_7 : f32 to vector<96x256xf32>
    %14 = arith.addf %13, %12 : vector<96x256xf32>
    %15 = arith.divf %13, %14 : vector<96x256xf32>
    %16 = arith.mulf %8, %15 : vector<96x256xf32>
    %17 = arith.truncf %16 : vector<96x256xf32> to vector<96x256xbf16>
    %c0_8 = arith.constant 0 : index
    %c0_9 = arith.constant 0 : index
    %18 = vector.load %arg7[%c0_8, %c0_9] : memref<96x256xbf16, #tpu.memory_space<vmem>>, vector<96x256xbf16>
    tpu.vector_store %arg7[%c0_8, %c0_9], %17 {strides = array<i32>} : memref<96x256xbf16, #tpu.memory_space<vmem>>, vector<96x256xbf16>,
    return
  }
  func.func @transform_0(%arg0: i32, %arg1: i32) -> (i32, i32) {
    %c0_i32 = arith.constant 0 : i32
    %c0_i32_0 = arith.constant 0 : i32
    return %arg0, %c0_i32 : i32, i32
  }
  func.func @transform_1(%arg0: i32, %arg1: i32) -> (i32, i32) {
    %c0_i32 = arith.constant 0 : i32
    %c0_i32_0 = arith.constant 0 : i32
    %c0_i32_1 = arith.constant 0 : i32
    return %c0_i32, %c0_i32_0 : i32, i32
  }
  func.func @transform_2(%arg0: i32, %arg1: i32) -> (i32, i32) {
    %c0_i32 = arith.constant 0 : i32
    %c0_i32_0 = arith.constant 0 : i32
    %c0_i32_1 = arith.constant 0 : i32
    return %c0_i32, %c0_i32_0 : i32, i32
  }
  func.func @transform_3(%arg0: i32, %arg1: i32) -> (i32, i32) {
    %c0_i32 = arith.constant 0 : i32
    %c0_i32_0 = arith.constant 0 : i32
    return %c0_i32, %arg1 : i32, i32
  }
  func.func @transform_4(%arg0: i32, %arg1: i32) -> (i32, i32) {
    %c0_i32 = arith.constant 0 : i32
    %c0_i32_0 = arith.constant 0 : i32
    return %c0_i32, %arg1 : i32, i32
  }
  func.func @transform_5(%arg0: i32, %arg1: i32) -> (i32, i32) {
    %c0_i32 = arith.constant 0 : i32
    return %arg0, %arg1 : i32, i32
  }
}

module attributes {stable_mosaic.version = 11 : i64} {
  func.func @_fused_linear_kernel(%arg0: i32, %arg1: i32, %arg2: memref<4x64xbf16, #tpu.memory_space<vmem>>, %arg3: memref<1x64xf32, #tpu.memory_space<vmem>>, %arg4: memref<1x64xf32, #tpu.memory_space<vmem>>, %arg5: memref<64x64xbf16, #tpu.memory_space<vmem>>, %arg6: memref<4x64xf32, #tpu.memory_space<vmem>>, %arg7: memref<4x64xbf16, #tpu.memory_space<vmem>>) attributes {dimension_semantics = [#tpu.dimension_semantics<parallel>, #tpu.dimension_semantics<arbitrary>], iteration_bounds = array<i64: 1, 1>, scalar_prefetch = 0 : i64, scratch_operands = 1 : i64, tpu.core_type = #tpu.core_type<tc>, window_params = [{transform_indices = @transform_0, window_bounds = array<i64: 4, 64>}, {pipeline_mode = #tpu.pipeline_mode<synchronous>, transform_indices = @transform_1, window_bounds = array<i64: 1, 64>}, {pipeline_mode = #tpu.pipeline_mode<synchronous>, transform_indices = @transform_2, window_bounds = array<i64: 1, 64>}, {transform_indices = @transform_3, window_bounds = array<i64: 64, 64>}, {transform_indices = @transform_4, window_bounds = array<i64: 4, 64>}]} {
    %c0_i32 = arith.constant 0 : i32
    %0 = arith.cmpi eq, %arg1, %c0_i32 : i32
    %1 = arith.extui %0 : i1 to i32
    %c0_i32_0 = arith.constant 0 : i32
    %2 = arith.cmpi ne, %1, %c0_i32_0 : i32
    scf.if %2 {
      %c0_8 = arith.constant 0 : index
      %c0_9 = arith.constant 0 : index
      %15 = vector.load %arg2[%c0_8, %c0_9] : memref<4x64xbf16, #tpu.memory_space<vmem>>, vector<4x64xbf16>
      %16 = arith.extf %15 : vector<4x64xbf16> to vector<4x64xf32>
      %cst_10 = arith.constant dense<0.000000e+00> : vector<4xf32>
      %17 = vector.multi_reduction <add>, %16, %cst_10 [1] : vector<4x64xf32> to vector<4xf32>
      %18 = vector.shape_cast %17 : vector<4xf32> to vector<4x1xf32>
      %cst_11 = arith.constant 6.400000e+01 : f32
      %19 = vector.broadcast %cst_11 : f32 to vector<4x1xf32>
      %20 = arith.divf %18, %19 : vector<4x1xf32>
      %21 = vector.broadcast %20 : vector<4x1xf32> to vector<4x64xf32>
      %22 = arith.subf %16, %21 : vector<4x64xf32>
      %23 = arith.mulf %22, %22 : vector<4x64xf32>
      %cst_12 = arith.constant dense<0.000000e+00> : vector<4xf32>
      %24 = vector.multi_reduction <add>, %23, %cst_12 [1] : vector<4x64xf32> to vector<4xf32>
      %25 = vector.shape_cast %24 : vector<4xf32> to vector<4x1xf32>
      %cst_13 = arith.constant 6.400000e+01 : f32
      %26 = vector.broadcast %cst_13 : f32 to vector<4x1xf32>
      %27 = arith.divf %25, %26 : vector<4x1xf32>
      %28 = vector.broadcast %20 : vector<4x1xf32> to vector<4x64xf32>
      %29 = arith.subf %16, %28 : vector<4x64xf32>
      %cst_14 = arith.constant 9.99999974E-6 : f32
      %30 = vector.broadcast %cst_14 : f32 to vector<4x1xf32>
      %31 = arith.addf %27, %30 : vector<4x1xf32>
      %32 = math.rsqrt %31 : vector<4x1xf32>
      %33 = vector.broadcast %32 : vector<4x1xf32> to vector<4x64xf32>
      %34 = arith.mulf %29, %33 : vector<4x64xf32>
      %c0_15 = arith.constant 0 : index
      %c0_16 = arith.constant 0 : index
      %35 = vector.load %arg3[%c0_15, %c0_16] : memref<1x64xf32, #tpu.memory_space<vmem>>, vector<1x64xf32>
      %36 = vector.broadcast %35 : vector<1x64xf32> to vector<4x64xf32>
      %37 = arith.mulf %34, %36 : vector<4x64xf32>
      %c0_17 = arith.constant 0 : index
      %c0_18 = arith.constant 0 : index
      %38 = vector.load %arg4[%c0_17, %c0_18] : memref<1x64xf32, #tpu.memory_space<vmem>>, vector<1x64xf32>
      %39 = vector.broadcast %38 : vector<1x64xf32> to vector<4x64xf32>
      %40 = arith.addf %37, %39 : vector<4x64xf32>
      %41 = arith.truncf %40 : vector<4x64xf32> to vector<4x64xbf16>
      %c0_19 = arith.constant 0 : index
      %c0_20 = arith.constant 0 : index
      %42 = vector.load %arg7[%c0_19, %c0_20] : memref<4x64xbf16, #tpu.memory_space<vmem>>, vector<4x64xbf16>
      tpu.vector_store %arg7[%c0_19, %c0_20], %41 {strides = array<i32>} : memref<4x64xbf16, #tpu.memory_space<vmem>>, vector<4x64xbf16>,
    } else {
    }
    %c0 = arith.constant 0 : index
    %c0_1 = arith.constant 0 : index
    %3 = vector.load %arg7[%c0, %c0_1] : memref<4x64xbf16, #tpu.memory_space<vmem>>, vector<4x64xbf16>
    %c0_2 = arith.constant 0 : index
    %c0_3 = arith.constant 0 : index
    %4 = vector.load %arg5[%c0_2, %c0_3] : memref<64x64xbf16, #tpu.memory_space<vmem>>, vector<64x64xbf16>
    %cst = arith.constant dense<0.000000e+00> : vector<4x64xf32>
    %5 = tpu.matmul %3, %4, %cst {dimension_numbers = #tpu.dot_dimension_numbers<[1], [0], [0], [1], [0, 0, 1, 1], [], []>} : vector<4x64xbf16>, vector<64x64xbf16>, vector<4x64xf32> -> vector<4x64xf32>
    %6 = arith.mulf %5, %5 : vector<4x64xf32>
    %cst_4 = arith.constant dense<0.000000e+00> : vector<4xf32>
    %7 = vector.multi_reduction <add>, %6, %cst_4 [1] : vector<4x64xf32> to vector<4xf32>
    %8 = vector.shape_cast %7 : vector<4xf32> to vector<4x1xf32>
    %cst_5 = arith.constant 9.99999996E-13 : f32
    %9 = vector.broadcast %cst_5 : f32 to vector<4x1xf32>
    %10 = arith.maximumf %8, %9 : vector<4x1xf32>
    %11 = math.rsqrt %10 : vector<4x1xf32>
    %12 = vector.broadcast %11 : vector<4x1xf32> to vector<4x64xf32>
    %13 = arith.mulf %5, %12 : vector<4x64xf32>
    %c0_6 = arith.constant 0 : index
    %c0_7 = arith.constant 0 : index
    %14 = vector.load %arg6[%c0_6, %c0_7] : memref<4x64xf32, #tpu.memory_space<vmem>>, vector<4x64xf32>
    tpu.vector_store %arg6[%c0_6, %c0_7], %13 {strides = array<i32>} : memref<4x64xf32, #tpu.memory_space<vmem>>, vector<4x64xf32>,
    return
  }
  func.func @transform_0(%arg0: i32, %arg1: i32) -> (i32, i32) {
    %c0_i32 = arith.constant 0 : i32
    %c0_i32_0 = arith.constant 0 : i32
    return %arg0, %c0_i32 : i32, i32
  }
  func.func @transform_1(%arg0: i32, %arg1: i32) -> (i32, i32) {
    %c0_i32 = arith.constant 0 : i32
    %c0_i32_0 = arith.constant 0 : i32
    %c0_i32_1 = arith.constant 0 : i32
    return %c0_i32, %c0_i32_0 : i32, i32
  }
  func.func @transform_2(%arg0: i32, %arg1: i32) -> (i32, i32) {
    %c0_i32 = arith.constant 0 : i32
    %c0_i32_0 = arith.constant 0 : i32
    %c0_i32_1 = arith.constant 0 : i32
    return %c0_i32, %c0_i32_0 : i32, i32
  }
  func.func @transform_3(%arg0: i32, %arg1: i32) -> (i32, i32) {
    %c0_i32 = arith.constant 0 : i32
    %c0_i32_0 = arith.constant 0 : i32
    return %c0_i32, %arg1 : i32, i32
  }
  func.func @transform_4(%arg0: i32, %arg1: i32) -> (i32, i32) {
    %c0_i32 = arith.constant 0 : i32
    return %arg0, %arg1 : i32, i32
  }
}

module attributes {stable_mosaic.version = 11 : i64} {
  func.func @_logits_kernel(%arg0: i32, %arg1: memref<2x64xf32, #tpu.memory_space<vmem>>, %arg2: memref<4x64xf32, #tpu.memory_space<vmem>>, %arg3: memref<1x1xf32, #tpu.memory_space<vmem>>, %arg4: memref<2x4xf32, #tpu.memory_space<vmem>>) attributes {dimension_semantics = [#tpu.dimension_semantics<parallel>], iteration_bounds = array<i64: 1>, scalar_prefetch = 0 : i64, scratch_operands = 0 : i64, tpu.core_type = #tpu.core_type<tc>, window_params = [{transform_indices = @transform_0, window_bounds = array<i64: 2, 64>}, {pipeline_mode = #tpu.pipeline_mode<synchronous>, transform_indices = @transform_1, window_bounds = array<i64: 4, 64>}, {pipeline_mode = #tpu.pipeline_mode<synchronous>, transform_indices = @transform_2, window_bounds = array<i64: 1, 1>}, {transform_indices = @transform_3, window_bounds = array<i64: 2, 4>}]} {
    %c0 = arith.constant 0 : index
    %c0_0 = arith.constant 0 : index
    %0 = vector.load %arg1[%c0, %c0_0] : memref<2x64xf32, #tpu.memory_space<vmem>>, vector<2x64xf32>
    %c0_1 = arith.constant 0 : index
    %c0_2 = arith.constant 0 : index
    %1 = vector.load %arg2[%c0_1, %c0_2] : memref<4x64xf32, #tpu.memory_space<vmem>>, vector<4x64xf32>
    %cst = arith.constant dense<0.000000e+00> : vector<2x4xf32>
    %2 = tpu.matmul %0, %1, %cst {dimension_numbers = #tpu.dot_dimension_numbers<[1], [1], [0], [0], [0, 0, 1, 0], [], []>} : vector<2x64xf32>, vector<4x64xf32>, vector<2x4xf32> -> vector<2x4xf32>
    %c0_3 = arith.constant 0 : index
    %c0_4 = arith.constant 0 : index
    %3 = vector.load %arg3[%c0_3, %c0_4] : memref<1x1xf32, #tpu.memory_space<vmem>>, vector<1x1xf32>
    %4 = vector.extract %3[0, 0] : f32 from vector<1x1xf32>
    %5 = math.exp %4 : f32
    %6 = vector.broadcast %5 : f32 to vector<2x4xf32>
    %7 = arith.mulf %6, %2 : vector<2x4xf32>
    %c0_5 = arith.constant 0 : index
    %c0_6 = arith.constant 0 : index
    %8 = vector.load %arg4[%c0_5, %c0_6] : memref<2x4xf32, #tpu.memory_space<vmem>>, vector<2x4xf32>
    tpu.vector_store %arg4[%c0_5, %c0_6], %7 {strides = array<i32>} : memref<2x4xf32, #tpu.memory_space<vmem>>, vector<2x4xf32>,
    return
  }
  func.func @transform_0(%arg0: i32) -> (i32, i32) {
    %c0_i32 = arith.constant 0 : i32
    %c0_i32_0 = arith.constant 0 : i32
    return %arg0, %c0_i32 : i32, i32
  }
  func.func @transform_1(%arg0: i32) -> (i32, i32) {
    %c0_i32 = arith.constant 0 : i32
    %c0_i32_0 = arith.constant 0 : i32
    %c0_i32_1 = arith.constant 0 : i32
    return %c0_i32, %c0_i32_0 : i32, i32
  }
  func.func @transform_2(%arg0: i32) -> (i32, i32) {
    %c0_i32 = arith.constant 0 : i32
    %c0_i32_0 = arith.constant 0 : i32
    %c0_i32_1 = arith.constant 0 : i32
    return %c0_i32, %c0_i32_0 : i32, i32
  }
  func.func @transform_3(%arg0: i32) -> (i32, i32) {
    %c0_i32 = arith.constant 0 : i32
    %c0_i32_0 = arith.constant 0 : i32
    return %arg0, %c0_i32 : i32, i32
  }
}

</mosaic_0001>

<bundles_post_ra>
// kernel: _lambda_.22
= control target key start
LH: loop header
LB: loop body
LE: loop exit
PB: predicated region body
PF: predicated region fallthrough
CT: control target
= control target key end

     0   :  { %s342_s15 = smov 0   ;;  %s368_s0 = inlined_call_operand.vmem [shape: bf16[2,5,64], index: 0, kind: input, shape index: {}]   ;;  %s369_s1 = inlined_call_operand.vmem [shape: f32[5,64], index: 1, kind: input, shape index: {}]   ;;  %s370_s2 = inlined_call_operand.vmem [shape: f32[1,64], index: 2, kind: input, shape index: {}]   ;;  %s371_s3 = inlined_call_operand.vmem [shape: f32[1,64], index: 3, kind: input, shape index: {}]   ;;  %s372_s4 = inlined_call_operand.vmem [shape: bf16[2,5,64], index: 4, kind: output, shape index: {}]  }
   0x1 LB: > { %s288_s16 = sadd.s32 4294967295, %s315_s15   ;;  %p292_p0 = scmp.ge.s32.totalorder %s315_s15, 1  ;;  %s315_s15 = sphi %s342_s15, %s14_s15  }
   0x2   : > { %p161_p1 = scmp.lt.s32.totalorder %s315_s15, 3 }
   0x4   : > { %p162_p2 = pnand %p292_p0, %p161_p1 }
   0x5   : > { %p185_p3 = scmp.lt.s32.totalorder (!%p162_p2), %s288_s16, 1  ;;  %v195_v1 = vld [vmem:[%s369_s1] sm:$0x1f] (!%p162_p2)  ;;  %vm197_vm0 = vcmask (!%p162_p2), 520192   ;;  %vm229_vm1 = vcmask (!%p162_p2), 518144  }
   0x6   : > { %165 = sbr.rel (%p162_p2) target bundleno = 338 (0x152), region = 36  ;;  %v295_v14 = vld [vmem:[%s370_s2] ss:$0 sm:$0xff] (!%p162_p2)  ;;  %vm230_vm2 = vsmask.f32 (!%p162_p2), 2304 }
   0x7   : > { %v296_v16 = vld [vmem:[%s371_s3] ss:$0 sm:$0xff] (!%p162_p2)  ;;  %vm231_vm3 = vmand (!%p162_p2), %vm229_vm1, %vm230_vm2 }
   0xd   : > { %s374_s16 = smov (!%p185_p3, %s288_s16), 1 }
   0xe   : > { %s293_s17 = sshll.u32 %s374_s16, 2 }
   0xf   : > { %s188_s20 = scalar_lea.vmem %s368_s0, %s293_s17  ;;  %s192_s29 = scalar_lea.vmem %s372_s4, %s293_s17 }
  0x10   : > { %v193_v0 = vld [vmem:[%s188_s20] sm:$0x7] }
  0x11   : > { %v194_v2 = vunpack.c.l.bf16 %v193_v0  ;;  %v232_v19 = vld [vmem:[%s192_s29] sm:$0x7] }
  0x13   : > { %v196_v3 = vadd.f32 %v195_v1, %v194_v2 }
  0x15   : > { %v198_v4 = vsel %vm197_vm0, %v196_v3, 0.0 }
  0x16   : > { %199 = vadd.xlane.f32.xlu0 %v198_v4 }
  0xa3   : > { %v200_v5 = vpop.xlane.xlu0 %199 }
  0xa4   : > { %v202_v6 = vmul.f32 0.015625, %v200_v5 }
  0xa6   : > { %v203_v7 = vsub.f32 %v196_v3, %v202_v6 }
  0xa8   : > { %v204_v8 = vmul.f32 %v203_v7, %v203_v7 }
  0xaa   : > { %v205_v9 = vsel %vm197_vm0, %v204_v8, 0.0 }
  0xab   : > { %206 = vadd.xlane.f32.xlu0 %v205_v9 }
 0x138   : > { %v207_v10 = vpop.xlane.xlu0 %206 }
 0x139   : > { %v208_v11 = vmul.f32 0.015625, %v207_v10 }
 0x13b   : > { %v209_v12 = vadd.f32 1e-05, %v208_v11 }
 0x13d   : > { %307 = vrsqrt.f32 %v209_v12 }
 0x147   : > { %v308_v13 = vpop.eup %307 }
 0x148   : > { %v211_v15 = vmul.f32 %v308_v13, %v203_v7 }
 0x14a   : > { %v219_v17 = vmul.f32 %v295_v14, %v211_v15 }
 0x14c   : > { %v227_v18 = vadd.f32 %v296_v16, %v219_v17 }
 0x14e   : > { %v228_v20 = vpack.c.bf16 %v227_v18, %v227_v18 }
 0x150   : > { %v233_v21 = vsel %vm231_vm3, %v228_v20, %v232_v19 }
 0x151   : > { %234 = vst [vmem:[%s192_s29] sm:$0x7] %v233_v21 }
 0x152 PF: > { %s14_s15 = sadd.s32 1, %s315_s15  }
 0x153   : > { %p11_p4 = scmp.ge.s32.totalorder %s14_s15, 4  }
 0x155   :  { %13 = sbr.rel (!%p11_p4) target bundleno = 1 (0x1), region = 66 }

// kernel: _lambda_.21
= control target key start
LH: loop header
LB: loop body
LE: loop exit
PB: predicated region body
PF: predicated region fallthrough
CT: control target
= control target key end

     0   :  { %v189_v0 = vmov 0   ;;  %vm112_vm0 = vcmask 523264   ;;  %vm157_vm1 = vcmask 519168   ;;  %s250_s1 = inlined_call_operand.vmem [shape: bf16[192,64], index: 1, kind: input, shape index: {}]   ;;  %s251_s0 = inlined_call_operand.vmem [shape: f32[8,192], index: 0, kind: input, shape index: {}]   ;;  %s252_s2 = inlined_call_operand.vmem [shape: bf16[8,64], index: 2, kind: output, shape index: {}]  }
   0x1   :  { %116 = vmatprep.subr.bf16.mxu0 %v189_v0  ;;  %v177_v1 = vld [vmem:[%s250_s1] sm:$0xff]   ;;  %v178_v2 = vld [vmem:[%s250_s1 + $0x8] sm:$0xff]   ;;  %v179_v3 = vld [vmem:[%s250_s1 + $0x10] sm:$0xff]  }
   0x2   :  { %117 = vmatpush1.bf16.msra.mxu0 %v177_v1  ;;  %v180_v4 = vld [vmem:[%s250_s1 + $0x18] sm:$0xff]   ;;  %v13_v5 = vld [vmem:[%s251_s0 + $0x8] sm:$0xff]  ;;  %v181_v7 = vld [vmem:[%s250_s1 + $0x20] sm:$0xff]  }
   0x3   :  { %118 = vmatprep.subr.bf16.mxu0 %v189_v0  ;;  %v15_v6 = vpack.c.bf16 %v13_v5, %v13_v5  ;;  %v182_v8 = vld [vmem:[%s250_s1 + $0x28] sm:$0xff]   ;;  %v183_v9 = vld [vmem:[%s250_s1 + $0x30] sm:$0xff]   ;;  %v184_v10 = vld [vmem:[%s250_s1 + $0x38] sm:$0xff]  }
   0x4   :  { %v185_v11 = vld [vmem:[%s250_s1 + $0x40] sm:$0xff]   ;;  %v186_v12 = vld [vmem:[%s250_s1 + $0x48] sm:$0xff]   ;;  %v187_v13 = vld [vmem:[%s250_s1 + $0x50] sm:$0xff]  }
   0x5   :  { %175 = vmatprep.mubr.msk.bf16.mxu0 %vm112_vm0, %v15_v6  ;;  %v188_v14 = vld [vmem:[%s250_s1 + $0x58] sm:$0xff]   ;;  %v12_v15 = vld [vmem:[%s251_s0] sm:$0xff] }
   0x6   :  { %119 = vmatpush1.bf16.msra.mxu0 %v178_v2  ;;  %v14_v16 = vpack.c.bf16 %v12_v15, %v12_v15 }
   0x7   :  { %120 = vmatprep.subr.bf16.mxu0 %v189_v0 }
   0xa   :  { %121 = vmatpush1.bf16.msra.mxu0 %v179_v3 }
   0xb   :  { %122 = vmatprep.subr.bf16.mxu0 %v189_v0 }
   0xe   :  { %123 = vmatpush1.bf16.msra.mxu0 %v180_v4 }
   0xf   :  { %124 = vmatprep.subr.bf16.mxu0 %v189_v0 }
  0x12   :  { %125 = vmatpush1.bf16.msra.mxu0 %v181_v7 }
  0x13   :  { %126 = vmatprep.subr.bf16.mxu0 %v189_v0 }
  0x16   :  { %127 = vmatpush1.bf16.msra.mxu0 %v182_v8 }
  0x17   :  { %128 = vmatprep.subr.bf16.mxu0 %v189_v0 }
  0x1a   :  { %129 = vmatpush1.bf16.msra.mxu0 %v183_v9 }
  0x1b   :  { %130 = vmatprep.subr.bf16.mxu0 %v189_v0 }
  0x1e   :  { %131 = vmatpush1.bf16.msra.mxu0 %v184_v10 }
  0x1f   :  { %132 = vmatprep.subr.bf16.mxu0 %v189_v0 }
  0x22   :  { %133 = vmatpush1.bf16.msra.mxu0 %v185_v11 }
  0x23   :  { %134 = vmatprep.subr.bf16.mxu0 %v189_v0 }
  0x26   :  { %135 = vmatpush1.bf16.msra.mxu0 %v186_v12 }
  0x27   :  { %136 = vmatprep.subr.bf16.mxu0 %v189_v0 }
  0x2a   :  { %137 = vmatpush1.bf16.msra.mxu0 %v187_v13 }
  0x2b   :  { %138 = vmatprep.subr.bf16.mxu0 %v189_v0 }
  0x2e   :  { %139 = vmatpush1.bf16.msra.mxu0 %v188_v14 }
  0x31   :  { %149 = vmatmul.mubr.bf16.vlgmr.msra.gmra.mrb[0].mxu0 %v14_v16 }
 0x104   :  { %v150_v17 = vpop.f32.mrb[0].mxu0 }
 0x105   :  { %v156_v18 = vpack.c.bf16 %v150_v17, %v150_v17  ;;  %v152_v19 = vpop.f32.mrb[1].mxu0 }
 0x106   :  { %v153_v20 = vpop.f32.mrb[2].mxu0 }
 0x107   :  { %158 = vst.msk [vmem:[%s252_s2] sm:$0xf] %vm157_vm1, %v156_v18  ;;  %v154_v21 = vpop.f32.mrb[3].mxu0 }

// kernel: _lambda_.23
= control target key start
LH: loop header
LB: loop body
LE: loop exit
PB: predicated region body
PF: predicated region fallthrough
CT: control target
= control target key end

     0   :  { %vm29_vm0 = vcmask 523264   ;;  %vm33_vm1 = vcmask 517120   ;;  %v264_v24 = vmov 0   ;;  %vm84_vm2 = vcmask 519168   ;;  %s343_s0 = inlined_call_operand.vmem [shape: bf16[10,64], index: 0, kind: input, shape index: {}]   ;;  %s344_s3 = inlined_call_operand.vmem [shape: bf16[64,192], index: 3, kind: input, shape index: {}]   ;;  %s345_s1 = inlined_call_operand.vmem [shape: f32[1,64], index: 1, kind: input, shape index: {}]   ;;  %s346_s2 = inlined_call_operand.vmem [shape: f32[1,64], index: 2, kind: input, shape index: {}]   ;;  %s347_s4 = inlined_call_operand.vmem [shape: f32[1,192], index: 4, kind: input, shape index: {}]   ;;  %s348_s5 = inlined_call_operand.vmem [shape: bf16[10,192], index: 5, kind: output, shape index: {}]  }
   0x1   :  { %v25_v0 = vld [vmem:[%s343_s0] sm:$0xf]  ;;  %v26_v1 = vld [vmem:[%s343_s0 + $0x4] sm:$0x1]  ;;  %v250_v18 = vld [vmem:[%s344_s3 + $0x14] ss:$8 sps:$4 sm:$0xff]   ;;  %191 = vmatprep.mubr.bf16.mxu0 %v264_v24  ;;  %v100_v44 = vlaneseq }
   0x2   :  { %v27_v2 = vunpack.c.l.bf16 %v25_v0  ;;  %v28_v3 = vunpack.c.l.bf16 %v26_v1  ;;  %v247_v16 = vld [vmem:[%s344_s3 + $0x4] ss:$8 sps:$4 sm:$0xff]   ;;  %v249_v17 = vld [vmem:[%s344_s3] ss:$8 sps:$4 sm:$0xff]   ;;  %v252_v19 = vld [vmem:[%s344_s3 + $0x10] ss:$8 sps:$4 sm:$0xff]  }
   0x3   :  { %159 = vmatprep.subr.bf16.mxu0 %v247_v16  ;;  %v253_v20 = vld [vmem:[%s344_s3 + $0x24] ss:$8 sps:$4 sm:$0xff]   ;;  %v255_v21 = vld [vmem:[%s344_s3 + $0x20] ss:$8 sps:$4 sm:$0xff]   ;;  %v256_v22 = vld [vmem:[%s344_s3 + $0x34] ss:$8 sps:$4 sm:$0xff]  }
   0x4   :  { %v30_v4 = vsel %vm29_vm0, %v27_v2, 0.0  ;;  %v34_v5 = vsel %vm33_vm1, %v28_v3, 0.0  ;;  %160 = vmatpush1.bf16.msra.mxu0 %v249_v17  ;;  %v258_v23 = vld [vmem:[%s344_s3 + $0x30] ss:$8 sps:$4 sm:$0xff]   ;;  %v226_v32 = vld [vmem:[%s345_s1] ss:$0 sm:$0xff] }
   0x5   :  { %31 = vadd.xlane.f32.xlu0 %v30_v4  ;;  %161 = vmatprep.subr.bf16.mxu0 %v250_v18  ;;  %v227_v34 = vld [vmem:[%s346_s2] ss:$0 sm:$0xff]  ;;  %vm86_vm3 = vcmask 516096   ;;  %v101_v45 = vshrl.u32 %v100_v44, 7  ;;  %vm214_vm4 = vcmask 1043456   ;;  %vm215_vm5 = vcmask 523268  }
   0x6   :  { %v98_v47 = vld [vmem:[%s347_s4] sm:$0x3]  ;;  %vm218_vm6 = vcmask 1040384   ;;  %vm219_vm7 = vcmask 520196   ;;  %vm216_vm8 = vmor %vm215_vm5, %vm214_vm4 }
   0x7   :  { %v102_v46 = vsub.s32 0, %v101_v45  ;;  %v106_v48 = vsub.s32 1, %v101_v45  ;;  %vm220_vm9 = vmor %vm219_vm7, %vm218_vm6 }
   0x8   :  { %162 = vmatpush1.bf16.msra.mxu0 %v252_v19 }
   0x9   :  { %35 = vadd.xlane.f32.xlu0 %v34_v5  ;;  %163 = vmatprep.subr.bf16.mxu0 %v253_v20  ;;  %v103_v49 = vrot.slane %v98_v47, %v102_v46  ;;  %v107_v50 = vrot.slane %v98_v47, %v106_v48 }
   0xc   :  { %164 = vmatpush1.bf16.msra.mxu0 %v255_v21 }
   0xd   :  { %165 = vmatprep.subr.bf16.mxu0 %v256_v22 }
  0x10   :  { %166 = vmatpush1.bf16.msra.mxu0 %v258_v23 }
  0x92   :  { %v32_v6 = vpop.xlane.xlu0 %31 }
  0x93   :  { %v38_v7 = vmul.f32 0.015625, %v32_v6 }
  0x95   :  { %v40_v8 = vsub.f32 %v27_v2, %v38_v7 }
  0x96   :  { %v36_v9 = vpop.xlane.xlu0 %35 }
  0x97   :  { %v39_v10 = vmul.f32 0.015625, %v36_v9  ;;  %v42_v11 = vmul.f32 %v40_v8, %v40_v8 }
  0x99   :  { %v41_v12 = vsub.f32 %v28_v3, %v39_v10  ;;  %v44_v13 = vsel %vm29_vm0, %v42_v11, 0.0 }
  0x9a   :  { %45 = vadd.xlane.f32.xlu1 %v44_v13 }
  0x9b   :  { %v43_v14 = vmul.f32 %v41_v12, %v41_v12 }
  0x9d   :  { %v47_v15 = vsel %vm33_vm1, %v43_v14, 0.0 }
  0x9e   :  { %48 = vadd.xlane.f32.xlu1 %v47_v15 }
 0x127   :  { %v46_v25 = vpop.xlane.xlu1 %45 }
 0x128   :  { %v50_v26 = vmul.f32 0.015625, %v46_v25 }
 0x12a   :  { %v52_v27 = vadd.f32 1e-05, %v50_v26 }
 0x12b   :  { %v49_v28 = vpop.xlane.xlu1 %48 }
 0x12c   :  { %260 = vrsqrt.f32 %v52_v27  ;;  %v51_v29 = vmul.f32 0.015625, %v49_v28 }
 0x12e   :  { %v53_v30 = vadd.f32 1e-05, %v51_v29 }
 0x130   :  { %262 = vrsqrt.f32 %v53_v30 }
 0x136   :  { %v261_v31 = vpop.eup %260 }
 0x137   :  { %v56_v33 = vmul.f32 %v261_v31, %v40_v8 }
 0x139   :  { %v65_v35 = vmul.f32 %v226_v32, %v56_v33 }
 0x13a   :  { %v263_v36 = vpop.eup %262 }
 0x13b   :  { %v74_v37 = vadd.f32 %v227_v34, %v65_v35  ;;  %v57_v38 = vmul.f32 %v263_v36, %v41_v12 }
 0x13d   :  { %v242_v39 = vpack.c.bf16 %v74_v37, %v74_v37  ;;  %v66_v40 = vmul.f32 %v226_v32, %v57_v38 }
 0x13f   :  { %85 = vst.msk [vmem:[#allocation2] sm:$0xf] %vm84_vm2, %v242_v39  ;;  %v75_v41 = vadd.f32 %v227_v34, %v66_v40 }
 0x141   :  { %v243_v42 = vpack.c.bf16 %v75_v41, %v75_v41 }
 0x143   :  { %87 = vst.msk [vmem:[#allocation2 + $0x4] sm:$0x1] %vm86_vm3, %v243_v42 }
 0x14a   :  { %v259_v43 = vld [vmem:[#allocation2] sm:$0x1f]  }
 0x14b   :  { %239 = vmatmul.mubr.msk.bf16.vlgmr.msra.gmra.mrb[0].mxu0 %vm29_vm0, %v259_v43 }
 0x21e   :  { %v193_v51 = vpop.f32.mrb[0].mxu0 }
 0x21f   :  { %v194_v52 = vadd.f32 %v193_v51, %v103_v49  ;;  %v195_v53 = vpop.f32.mrb[1].mxu0 }
 0x220   :  { %v196_v54 = vadd.f32 %v195_v53, %v107_v50  ;;  %v197_v55 = vpop.f32.mrb[2].mxu0 }
 0x221   :  { %v198_v56 = vadd.f32 %v197_v55, %v103_v49  ;;  %v199_v57 = vpop.f32.mrb[3].mxu0 }
 0x222   :  { %v244_v58 = vpack.c.bf16 %v196_v54, %v194_v52  ;;  %v200_v59 = vadd.f32 %v199_v57, %v107_v50 }
 0x224   :  { %217 = vst.msk [vmem:[%s348_s5] sm:$0xff] %vm216_vm8, %v244_v58  ;;  %v245_v60 = vpack.c.bf16 %v200_v59, %v198_v56 }
 0x226   :  { %221 = vst.msk [vmem:[%s348_s5 + $0x8] sm:$0x11] %vm220_vm9, %v245_v60 }

// kernel: _lambda_.24
= control target key start
LH: loop header
LB: loop body
LE: loop exit
PB: predicated region body
PF: predicated region fallthrough
CT: control target
= control target key end

     0   :  { %s1062_s15 = smov 0   ;;  %s1175_s0 = inlined_call_operand.vmem [shape: bf16[2,5,192], index: 0, kind: input, shape index: {}]   ;;  %s1176_s1 = inlined_call_operand.vmem [shape: bf16[64,64], index: 1, kind: input, shape index: {}]   ;;  %s1177_s2 = inlined_call_operand.vmem [shape: f32[1,64], index: 2, kind: input, shape index: {}]   ;;  %s1178_s3 = inlined_call_operand.vmem [shape: bf16[2,5,64], index: 3, kind: input, shape index: {}]   ;;  %s1179_s4 = inlined_call_operand.vmem [shape: bf16[2,5,64], index: 4, kind: output, shape index: {}]  }
   0x1 LB: > { %s864_s16 = sadd.s32 4294967295, %s1025_s15   ;;  %p868_p0 = scmp.ge.s32.totalorder %s1025_s15, 1  ;;  %s1025_s15 = sphi %s1062_s15, %s14_s15  }
   0x2   : > { %p171_p1 = scmp.lt.s32.totalorder %s1025_s15, 3 }
   0x4   : > { %p172_p2 = pnand %p868_p0, %p171_p1 }
   0x5   : > { %p200_p3 = scmp.lt.s32.totalorder (!%p172_p2), %s864_s16, 1  ;;  %v1027_v0 = vmov (!%p172_p2), 0.0   ;;  %vm1028_vm0 = vmmov (!%p172_p2), 0   ;;  %s1029_s21 = smov (!%p172_p2), 64   ;;  %vm220_vm1 = vcmask (!%p172_p2), 130048   ;;  %vm267_vm2 = vcmask (!%p172_p2), 36864  }
   0x6   : > { %175 = sbr.rel (%p172_p2) target bundleno = 1285 (0x505), region = 36  ;;  %919 = vmatprep.subr.bf16.mxu0 (!%p172_p2), %v1027_v0  ;;  %931 = vmatprep.subr.bf16.mxu1 (!%p172_p2), %v1027_v0  ;;  %s1030_s22 = smov (!%p172_p2), 112   ;;  %vm286_vm3 = vcmask (!%p172_p2), 1041408   ;;  %vm287_vm4 = vcmask (!%p172_p2), 1042432   ;;  %v1036_v50 = vmov (!%p172_p2), 65535   ;;  %vm282_vm5 = vcmask (!%p172_p2), 39936  }
   0x7   : > { %921 = vmatprep.mubr.msk.bf16.mxu0 (!%p172_p2), %vm1028_vm0, %v1027_v0  ;;  %933 = vmatprep.mubr.msk.bf16.mxu1 (!%p172_p2), %vm1028_vm0, %v1027_v0  ;;  %s1031_s23 = smov (!%p172_p2), 48   ;;  %s1032_s24 = smov (!%p172_p2), 32   ;;  %v288_v51 = vsel (!%p172_p2), %vm286_vm3, 4294967295, %v1036_v50  ;;  %vm334_vm6 = vcmask (!%p172_p2), 124928   ;;  %vm335_vm7 = vsmask.f32 (!%p172_p2), 2304 }
   0x8   : > { %s1033_s25 = smov (!%p172_p2), 16   ;;  %s1034_s26 = smov (!%p172_p2), 96   ;;  %v289_v52 = vsel (!%p172_p2), %vm287_vm4, %v288_v51, 0  ;;  %vm336_vm8 = vmand (!%p172_p2), %vm334_vm6, %vm335_vm7  ;;  %vm457_vm9 = vcmask (!%p172_p2), 256128   ;;  %vm579_vm11 = vcmask (!%p172_p2), 387328   ;;  %vm701_vm13 = vcmask (!%p172_p2), 518528  }
   0x9   : > { %s1035_s27 = smov (!%p172_p2), 80   ;;  %vm458_vm10 = vmand (!%p172_p2), %vm457_vm9, %vm335_vm7  ;;  %vm746_vm15 = vcmask (!%p172_p2), 523264  }
   0xa   : > { %vm580_vm12 = vmand (!%p172_p2), %vm579_vm11, %vm335_vm7 }
   0xb   : > { %vm702_vm14 = vmand (!%p172_p2), %vm701_vm13, %vm335_vm7 }
   0xd   : > { %s1181_s16 = smov (!%p200_p3, %s864_s16), 1 }
   0xe   : > { %s894_s17 = sshll.u32 %s1181_s16, 3  ;;  %s871_s10 = sshll.u32 %s1181_s16, 2 }
   0xf   : > { %s204_s20 = scalar_lea.vmem %s1175_s0, %s894_s17  ;;  %s208_s13 = scalar_lea.vmem %s1178_s3, %s871_s10 }
  0x10   : > { %v1082_v1 = vld [vmem:[%s204_s20] sm:$0x77]  ;;  %s212_s20 = scalar_lea.vmem %s1179_s4, %s871_s10 }
  0x11   : > { %v873_v2 = vcombine.low %v1082_v1, %v1082_v1  ;;  %v875_v49 = vcombine.high %v1082_v1, %v1082_v1 }
  0x13   : > { %218 = vrot.lane.b32.xlu0 %v873_v2, %s1029_s21  ;;  %340 = vrot.lane.b32.xlu1 %v873_v2, %s1030_s22  ;;  %v291_v53 = vand.u32 %v875_v49, %v289_v52 }
  0x17   : > { %342 = vrot.lane.b32.xlu0 %v873_v2, %s1031_s23  ;;  %464 = vrot.lane.b32.xlu1 %v873_v2, %s1032_s24 }
  0x1b   : > { %586 = vrot.lane.b32.xlu1 %v873_v2, %s1033_s25  ;;  %462 = vrot.lane.b32.xlu0 %v873_v2, %s1034_s26 }
  0x1f   : > { %584 = vrot.lane.b32.xlu0 %v873_v2, %s1035_s27 }
  0x85   : > { %v219_v3 = vpop.permute.xlu0 %218  ;;  %v341_v5 = vpop.permute.xlu1 %340 }
  0x86   : > { %v225_v4 = vsel %vm220_vm1, %v219_v3, 0 }
  0x87   : > { %920 = vmatpush3.bf16.xpose.msra.mxu0 %v225_v4 }
  0x88   : > { %925 = vmatprep.subr.bf16.mxu0 %v1027_v0 }
  0x89   : > { %v343_v6 = vpop.permute.xlu0 %342  ;;  %v465_v8 = vpop.permute.xlu1 %464 }
  0x8a   : > { %v348_v7 = vsel %vm220_vm1, %v343_v6, 0  ;;  %v470_v9 = vsel %vm220_vm1, %v465_v8, 0 }
  0x8b   : > { %932 = vmatpush3.bf16.xpose.msra.mxu1 %v348_v7 }
  0x8c   : > { %943 = vmatprep.subr.bf16.mxu1 %v1027_v0 }
  0x8d   : > { %v587_v10 = vpop.permute.xlu1 %586  ;;  %v463_v11 = vpop.permute.xlu0 %462 }
  0x8e   : > { %922 = vmatmul.mubr.msk.bf16.vlgmr.msra.gmra.mrb[0].mxu0 %vm220_vm1, %v1082_v1  ;;  %v592_v12 = vsel %vm220_vm1, %v587_v10, 0 }
  0x8f   : > { %927 = vmatprep.mubr.msk.bf16.mxu0 %vm1028_vm0, %v1027_v0  ;;  %926 = vmatpush3.bf16.msra.mxu0 %v291_v53  ;;  %v790_v53 = vld [vmem:[%s208_s13] sm:$0x7] }
  0x90   : > { %937 = vmatprep.subr.bf16.mxu0 %v1027_v0 }
  0x91   : > { %v585_v13 = vpop.permute.xlu0 %584 }
  0x92   : > { %934 = vmatmul.mubr.msk.bf16.vlgmr.msra.gmra.mrb[0].mxu1 %vm220_vm1, %v341_v5 }
  0x93   : > { %944 = vmatpush3.bf16.xpose.msra.mxu1 %v470_v9  ;;  %945 = vmatprep.mubr.msk.bf16.mxu1 %vm1028_vm0, %v1027_v0 }
  0x94   : > { %955 = vmatprep.subr.bf16.mxu1 %v1027_v0 }
  0x9a   : > { %946 = vmatmul.mubr.msk.bf16.vlgmr.msra.gmra.mrb[4].mxu1 %vm220_vm1, %v463_v11 }
  0x9b   : > { %956 = vmatpush3.bf16.xpose.msra.mxu1 %v592_v12  ;;  %957 = vmatprep.mubr.msk.bf16.mxu1 %vm1028_vm0, %v1027_v0 }
  0x9c   : > { %967 = vmatprep.subr.bf16.mxu1 %v1027_v0 }
  0xa2   : > { %958 = vmatmul.mubr.msk.bf16.vlgmr.msra.gmra.mrb[8].mxu1 %vm220_vm1, %v585_v13 }
  0xa3   : > { %975 = vmatprep.mubr.msk.bf16.mxu1 %vm1028_vm0, %v1027_v0 }
 0x161   : > { %v261_v14 = vpop.f32.mrb[0].mxu0 }
 0x162   : > { %v268_v15 = vsel %vm267_vm2, %v261_v14, -inf  ;;  %v923_v16 = vpop.f32.mrb[1].mxu0 }
 0x163   : > { %269 = vmax.xlane.f32.xlu1 %v268_v15  ;;  %v264_v17 = vpop.f32.mrb[2].mxu0 }
 0x164   : > { %v924_v18 = vpop.f32.mrb[3].mxu0 }
 0x165   : > { %v384_v19 = vpop.f32.mrb[0].mxu1 }
 0x166   : > { %v935_v20 = vpop.f32.mrb[1].mxu1  ;;  %v390_v21 = vsel %vm267_vm2, %v384_v19, -inf }
 0x167   : > { %391 = vmax.xlane.f32.xlu0 %v390_v21  ;;  %v387_v22 = vpop.f32.mrb[2].mxu1 }
 0x168   : > { %v936_v23 = vpop.f32.mrb[3].mxu1 }
 0x16d   : > { %v506_v24 = vpop.f32.mrb[4].mxu1 }
 0x16e   : > { %v512_v25 = vsel %vm267_vm2, %v506_v24, -inf  ;;  %v947_v26 = vpop.f32.mrb[5].mxu1 }
 0x16f   : > { %513 = vmax.xlane.f32.xlu0 %v512_v25  ;;  %v509_v27 = vpop.f32.mrb[6].mxu1  ;;  %v999_v26 = vld [vmem:[%s1176_s1] sm:$0xff]  }
 0x170   : > { %v948_v28 = vpop.f32.mrb[7].mxu1  ;;  %968 = vmatpush3.bf16.msra.mxu1 %v999_v26 }
 0x171   : > { %969 = vmatprep.subr.bf16.mxu1 %v1027_v0 }
 0x175   : > { %v628_v29 = vpop.f32.mrb[8].mxu1 }
 0x176   : > { %v634_v30 = vsel %vm267_vm2, %v628_v29, -inf  ;;  %v959_v31 = vpop.f32.mrb[9].mxu1 }
 0x177   : > { %635 = vmax.xlane.f32.xlu1 %v634_v30  ;;  %v631_v32 = vpop.f32.mrb[10].mxu1  ;;  %v1000_v30 = vld [vmem:[%s1176_s1 + $0x8] sm:$0xff]  }
 0x178   : > { %v960_v33 = vpop.f32.mrb[11].mxu1  ;;  %970 = vmatpush3.bf16.msra.mxu1 %v1000_v30 }
 0x179   : > { %971 = vmatprep.subr.bf16.mxu1 %v1027_v0 }
 0x1f0   : > { %v270_v34 = vpop.xlane.xlu1 %269 }
 0x1f1   : > { %v271_v35 = vsub.f32 %v261_v14, %v270_v34 }
 0x1f3   : > { %v272_v36 = vmul.f32 1.442695, %v271_v35 }
 0x1f4   : > { %v392_v37 = vpop.xlane.xlu0 %391 }
 0x1f5   : > { %1003 = vpow2.f32 %v272_v36  ;;  %v393_v38 = vsub.f32 %v384_v19, %v392_v37  ;;  %v337_v19 = vld [vmem:[#allocation2] sm:$0x7]  ;;  %v1001_v37 = vld [vmem:[%s1176_s1 + $0x10] sm:$0xff]  }
 0x1f6   : > { %972 = vmatpush3.bf16.msra.mxu1 %v1001_v37 }
 0x1f7   : > { %v394_v39 = vmul.f32 1.442695, %v393_v38  ;;  %v1002_v38 = vld [vmem:[%s1176_s1 + $0x18] sm:$0xff]   ;;  %973 = vmatprep.subr.bf16.mxu1 %v1027_v0 }
 0x1f9   : > { %1005 = vpow2.f32 %v394_v39 }
 0x1fa   : > { %974 = vmatpush3.bf16.msra.mxu1 %v1002_v38 }
 0x1fc   : > { %v514_v40 = vpop.xlane.xlu0 %513 }
 0x1fd   : > { %v515_v41 = vsub.f32 %v506_v24, %v514_v40 }
 0x1ff   : > { %v1004_v42 = vpop.eup %1003  ;;  %v516_v43 = vmul.f32 1.442695, %v515_v41 }
 0x200   : > { %v274_v44 = vsel %vm267_vm2, %v1004_v42, 0.0 }
 0x201   : > { %1007 = vpow2.f32 %v516_v43  ;;  %275 = vadd.xlane.f32.xlu0 %v274_v44 }
 0x203   : > { %v1006_v45 = vpop.eup %1005 }
 0x204   : > { %v396_v46 = vsel %vm267_vm2, %v1006_v45, 0.0  ;;  %v636_v54 = vpop.xlane.xlu1 %635 }
 0x205   : > { %397 = vadd.xlane.f32.xlu1 %v396_v46  ;;  %v637_v55 = vsub.f32 %v628_v29, %v636_v54  ;;  %v886_v54 = vld [vmem:[%s1177_s2] ss:$0 sm:$0xff] }
 0x207   : > { %v638_v56 = vmul.f32 1.442695, %v637_v55  ;;  %v791_v55 = vunpack.c.l.bf16 %v790_v53 }
 0x209   : > { %1009 = vpow2.f32 %v638_v56 }
 0x20b   : > { %v1008_v47 = vpop.eup %1007 }
 0x20c   : > { %v518_v48 = vsel %vm267_vm2, %v1008_v47, 0.0 }
 0x20d   : > { %519 = vadd.xlane.f32.xlu0 %v518_v48 }
 0x213   : > { %v1010_v57 = vpop.eup %1009 }
 0x214   : > { %v640_v58 = vsel %vm267_vm2, %v1010_v57, 0.0 }
 0x216   : > { %524 = vrot.lane.b32.xlu1 %v875_v49, %s1034_s26 }
 0x223   : > { %402 = vrot.lane.b32.xlu0 %v875_v49, %s1030_s22 }
 0x23a   : > { %641 = vadd.xlane.f32.xlu1 %v640_v58 }
 0x24b   : > { %646 = vrot.lane.b32.xlu1 %v875_v49, %s1035_s27 }
 0x28e   : > { %v276_v59 = vpop.xlane.xlu0 %275 }
 0x28f   : > { %1011 = vrcp.f32 %v276_v59 }
 0x292   : > { %v398_v60 = vpop.xlane.xlu1 %397 }
 0x293   : > { %1013 = vrcp.f32 %v398_v60 }
 0x296   : > { %v525_v6 = vpop.permute.xlu1 %524 }
 0x297   : > { %v530_v9 = vand.u32 %v525_v6, %v289_v52 }
 0x299   : > { %v1012_v61 = vpop.eup %1011 }
 0x29a   : > { %v278_v62 = vmul.f32 %v1012_v61, %v1004_v42  ;;  %v520_v63 = vpop.xlane.xlu0 %519 }
 0x29b   : > { %1015 = vrcp.f32 %v520_v63 }
 0x29c   : > { %v279_v1 = vpack.c.bf16 %v278_v62, %v278_v62  ;;  %v796_v62 = vld [vmem:[%s212_s20] sm:$0x7] }
 0x29d   : > { %v1014_v2 = vpop.eup %1013 }
 0x29e   : > { %928 = vmatmul.mubr.msk.bf16.vlgmr.msra.gmra.mrb[4].mxu0 %vm282_vm5, %v279_v1  ;;  %v403_v3 = vpop.permute.xlu0 %402  ;;  %v400_v5 = vmul.f32 %v1014_v2, %v1006_v45 }
 0x29f   : > { %v408_v4 = vand.u32 %v403_v3, %v289_v52  ;;  %939 = vmatprep.mubr.msk.bf16.mxu0 %vm1028_vm0, %v1027_v0 }
 0x2a0   : > { %v401_v7 = vpack.c.bf16 %v400_v5, %v400_v5 }
 0x2a1   : > { %938 = vmatpush3.bf16.msra.mxu0 %v408_v4 }
 0x2a2   : > { %949 = vmatprep.subr.bf16.mxu0 %v1027_v0 }
 0x2a5   : > { %v1016_v8 = vpop.eup %1015 }
 0x2a6   : > { %940 = vmatmul.mubr.msk.bf16.vlgmr.msra.gmra.mrb[8].mxu0 %vm282_vm5, %v401_v7  ;;  %v522_v10 = vmul.f32 %v1016_v8, %v1008_v47 }
 0x2a7   : > { %950 = vmatpush3.bf16.msra.mxu0 %v530_v9  ;;  %951 = vmatprep.mubr.msk.bf16.mxu0 %vm1028_vm0, %v1027_v0 }
 0x2a8   : > { %961 = vmatprep.subr.bf16.mxu0 %v1027_v0  ;;  %v523_v11 = vpack.c.bf16 %v522_v10, %v522_v10 }
 0x2ae   : > { %952 = vmatmul.mubr.msk.bf16.vlgmr.msra.gmra.mrb[12].mxu0 %vm282_vm5, %v523_v11 }
 0x2af   : > { %963 = vmatprep.mubr.msk.bf16.mxu0 %vm1028_vm0, %v1027_v0  ;;  %vm794_vm0 = vcmask 518144  }
 0x2b0   : > { %vm795_vm1 = vmand %vm794_vm0, %vm335_vm7 }
 0x2c7   : > { %v642_v12 = vpop.xlane.xlu1 %641 }
 0x2c8   : > { %1017 = vrcp.f32 %v642_v12 }
 0x2cb   : > { %v647_v13 = vpop.permute.xlu1 %646 }
 0x2cc   : > { %v652_v14 = vand.u32 %v647_v13, %v289_v52 }
 0x2ce   : > { %962 = vmatpush3.bf16.msra.mxu0 %v652_v14 }
 0x2d2   : > { %v1018_v15 = vpop.eup %1017 }
 0x2d3   : > { %v644_v16 = vmul.f32 %v1018_v15, %v1010_v57 }
 0x2d5   : > { %v645_v17 = vpack.c.bf16 %v644_v16, %v644_v16 }
 0x2d7   : > { %964 = vmatmul.mubr.msk.bf16.vlgmr.msra.gmra.mrb[16].mxu0 %vm282_vm5, %v645_v17 }
 0x371   : > { %v327_v18 = vpop.f32.mrb[4].mxu0 }
 0x372   : > { %v333_v20 = vpack.c.bf16 %v327_v18, %v327_v18  ;;  %v929_v21 = vpop.f32.mrb[5].mxu0 }
 0x373   : > { %v330_v22 = vpop.f32.mrb[6].mxu0 }
 0x374   : > { %v338_v23 = vsel %vm336_vm8, %v333_v20, %v337_v19  ;;  %v930_v24 = vpop.f32.mrb[7].mxu0 }
 0x375   : > { %339 = vst [vmem:[#allocation2] sm:$0x7] %v338_v23 }
 0x379   : > { %v444_v25 = vpop.f32.mrb[8].mxu0 }
 0x37a   : > { %v895_v27 = vpack.c.bf16 %v444_v25, %v444_v25  ;;  %v941_v28 = vpop.f32.mrb[9].mxu0 }
 0x37b   : > { %v447_v29 = vpop.f32.mrb[10].mxu0 }
 0x37c   : > { %454 = vrot.lane.b32.xlu0 %v895_v27, %s1033_s25  ;;  %v942_v31 = vpop.f32.mrb[11].mxu0  ;;  %v459_v44 = vld [vmem:[#allocation2] sm:$0x7] }
 0x381   : > { %v566_v32 = vpop.f32.mrb[12].mxu0 }
 0x382   : > { %v896_v33 = vpack.c.bf16 %v566_v32, %v566_v32  ;;  %v953_v34 = vpop.f32.mrb[13].mxu0 }
 0x383   : > { %v569_v35 = vpop.f32.mrb[14].mxu0 }
 0x384   : > { %576 = vrot.lane.b32.xlu1 %v896_v33, %s1032_s24  ;;  %v954_v36 = vpop.f32.mrb[15].mxu0 }
 0x3aa   : > { %v688_v39 = vpop.f32.mrb[16].mxu0 }
 0x3ab   : > { %v897_v40 = vpack.c.bf16 %v688_v39, %v688_v39  ;;  %v965_v41 = vpop.f32.mrb[17].mxu0 }
 0x3ac   : > { %v691_v42 = vpop.f32.mrb[18].mxu0 }
 0x3ad   : > { %698 = vrot.lane.b32.xlu0 %v897_v40, %s1031_s23  ;;  %v966_v43 = vpop.f32.mrb[19].mxu0 }
 0x3ee   : > { %v455_v45 = vpop.permute.xlu0 %454 }
 0x3ef   : > { %v460_v46 = vsel %vm458_vm10, %v455_v45, %v459_v44 }
 0x3f0   : > { %461 = vst [vmem:[#allocation2] sm:$0x7] %v460_v46 }
 0x3f6   : > { %v577_v0 = vpop.permute.xlu1 %576 }
 0x3f7   : > { %v581_v47 = vld [vmem:[#allocation2] sm:$0x7] }
 0x3f8   : > { %v582_v48 = vsel %vm580_vm12, %v577_v0, %v581_v47 }
 0x3f9   : > { %583 = vst [vmem:[#allocation2] sm:$0x7] %v582_v48 }
 0x400   : > { %v703_v49 = vld [vmem:[#allocation2] sm:$0x7] }
 0x41f   : > { %v699_v50 = vpop.permute.xlu0 %698 }
 0x420   : > { %v704_v51 = vsel %vm702_vm14, %v699_v50, %v703_v49 }
 0x421   : > { %705 = vst [vmem:[#allocation2] sm:$0x7] %v704_v51 }
 0x428   : > { %v706_v52 = vld [vmem:[#allocation2] sm:$0x7] }
 0x429   : > { %976 = vmatmul.mubr.msk.bf16.vlgmr.msra.gmra.mrb[12].mxu1 %vm746_vm15, %v706_v52 }
 0x4fc   : > { %v784_v56 = vpop.f32.mrb[12].mxu1 }
 0x4fd   : > { %v785_v57 = vadd.f32 %v886_v54, %v784_v56  ;;  %v977_v58 = vpop.f32.mrb[13].mxu1 }
 0x4fe   : > { %v787_v59 = vpop.f32.mrb[14].mxu1 }
 0x4ff   : > { %v792_v60 = vadd.f32 %v791_v55, %v785_v57  ;;  %v978_v61 = vpop.f32.mrb[15].mxu1 }
 0x501   : > { %v793_v63 = vpack.c.bf16 %v792_v60, %v792_v60 }
 0x503   : > { %v797_v1 = vsel %vm795_vm1, %v793_v63, %v796_v62 }
 0x504   : > { %798 = vst [vmem:[%s212_s20] sm:$0x7] %v797_v1 }
 0x505 PF: > { %s14_s15 = sadd.s32 1, %s1025_s15  }
 0x506   : > { %p11_p4 = scmp.ge.s32.totalorder %s14_s15, 4  }
 0x508   :  { %13 = sbr.rel (!%p11_p4) target bundleno = 1 (0x1), region = 69 }

// kernel: _lambda_.25
= control target key start
LH: loop header
LB: loop body
LE: loop exit
PB: predicated region body
PF: predicated region fallthrough
CT: control target
= control target key end

     0   :  { %vm29_vm0 = vcmask 523264   ;;  %vm33_vm1 = vcmask 517120   ;;  %v310_v24 = vmov 0   ;;  %vm84_vm2 = vcmask 519168   ;;  %s389_s0 = inlined_call_operand.vmem [shape: bf16[10,64], index: 0, kind: input, shape index: {}]   ;;  %s390_s3 = inlined_call_operand.vmem [shape: bf16[64,256], index: 3, kind: input, shape index: {}]   ;;  %s391_s1 = inlined_call_operand.vmem [shape: f32[1,64], index: 1, kind: input, shape index: {}]   ;;  %s392_s2 = inlined_call_operand.vmem [shape: f32[1,64], index: 2, kind: input, shape index: {}]   ;;  %s393_s4 = inlined_call_operand.vmem [shape: f32[1,256], index: 4, kind: input, shape index: {}]   ;;  %s394_s5 = inlined_call_operand.vmem [shape: bf16[10,256], index: 5, kind: output, shape index: {}]  }
   0x1   :  { %v25_v0 = vld [vmem:[%s389_s0] sm:$0xf]  ;;  %v26_v1 = vld [vmem:[%s389_s0 + $0x4] sm:$0x1]  ;;  %v280_v18 = vld [vmem:[%s390_s3 + $0x14] ss:$8 sps:$4 sm:$0xff]   ;;  %191 = vmatprep.mubr.bf16.mxu0 %v310_v24  ;;  %v100_v44 = vlaneseq }
   0x2   :  { %v27_v2 = vunpack.c.l.bf16 %v25_v0  ;;  %v28_v3 = vunpack.c.l.bf16 %v26_v1  ;;  %v277_v16 = vld [vmem:[%s390_s3 + $0x4] ss:$8 sps:$4 sm:$0xff]   ;;  %v279_v17 = vld [vmem:[%s390_s3] ss:$8 sps:$4 sm:$0xff]   ;;  %v282_v19 = vld [vmem:[%s390_s3 + $0x10] ss:$8 sps:$4 sm:$0xff]  }
   0x3   :  { %159 = vmatprep.subr.bf16.mxu0 %v277_v16  ;;  %v283_v20 = vld [vmem:[%s390_s3 + $0x24] ss:$8 sps:$4 sm:$0xff]   ;;  %v285_v21 = vld [vmem:[%s390_s3 + $0x20] ss:$8 sps:$4 sm:$0xff]   ;;  %v286_v22 = vld [vmem:[%s390_s3 + $0x34] ss:$8 sps:$4 sm:$0xff]  }
   0x4   :  { %v30_v4 = vsel %vm29_vm0, %v27_v2, 0.0  ;;  %v34_v5 = vsel %vm33_vm1, %v28_v3, 0.0  ;;  %160 = vmatpush1.bf16.msra.mxu0 %v279_v17  ;;  %v288_v23 = vld [vmem:[%s390_s3 + $0x30] ss:$8 sps:$4 sm:$0xff]   ;;  %v252_v32 = vld [vmem:[%s391_s1] ss:$0 sm:$0xff] }
   0x5   :  { %31 = vadd.xlane.f32.xlu0 %v30_v4  ;;  %161 = vmatprep.subr.bf16.mxu0 %v280_v18  ;;  %v253_v34 = vld [vmem:[%s392_s2] ss:$0 sm:$0xff]  ;;  %vm86_vm3 = vcmask 516096   ;;  %v101_v45 = vshrl.u32 %v100_v44, 7 }
   0x6   :  { %v98_v47 = vld [vmem:[%s393_s4] sm:$0x3] }
   0x7   :  { %v102_v46 = vsub.s32 0, %v101_v45  ;;  %v106_v48 = vsub.s32 1, %v101_v45 }
   0x8   :  { %162 = vmatpush1.bf16.msra.mxu0 %v282_v19 }
   0x9   :  { %35 = vadd.xlane.f32.xlu0 %v34_v5  ;;  %163 = vmatprep.subr.bf16.mxu0 %v283_v20  ;;  %v103_v49 = vrot.slane %v98_v47, %v102_v46  ;;  %v107_v50 = vrot.slane %v98_v47, %v106_v48 }
   0xc   :  { %164 = vmatpush1.bf16.msra.mxu0 %v285_v21 }
   0xd   :  { %165 = vmatprep.subr.bf16.mxu0 %v286_v22 }
  0x10   :  { %166 = vmatpush1.bf16.msra.mxu0 %v288_v23 }
  0x92   :  { %v32_v6 = vpop.xlane.xlu0 %31 }
  0x93   :  { %v38_v7 = vmul.f32 0.015625, %v32_v6 }
  0x95   :  { %v40_v8 = vsub.f32 %v27_v2, %v38_v7 }
  0x96   :  { %v36_v9 = vpop.xlane.xlu0 %35 }
  0x97   :  { %v39_v10 = vmul.f32 0.015625, %v36_v9  ;;  %v42_v11 = vmul.f32 %v40_v8, %v40_v8 }
  0x99   :  { %v41_v12 = vsub.f32 %v28_v3, %v39_v10  ;;  %v44_v13 = vsel %vm29_vm0, %v42_v11, 0.0 }
  0x9a   :  { %45 = vadd.xlane.f32.xlu1 %v44_v13 }
  0x9b   :  { %v43_v14 = vmul.f32 %v41_v12, %v41_v12 }
  0x9d   :  { %v47_v15 = vsel %vm33_vm1, %v43_v14, 0.0 }
  0x9e   :  { %48 = vadd.xlane.f32.xlu1 %v47_v15 }
 0x127   :  { %v46_v25 = vpop.xlane.xlu1 %45 }
 0x128   :  { %v50_v26 = vmul.f32 0.015625, %v46_v25 }
 0x12a   :  { %v52_v27 = vadd.f32 1e-05, %v50_v26 }
 0x12b   :  { %v49_v28 = vpop.xlane.xlu1 %48 }
 0x12c   :  { %290 = vrsqrt.f32 %v52_v27  ;;  %v51_v29 = vmul.f32 0.015625, %v49_v28 }
 0x12e   :  { %v53_v30 = vadd.f32 1e-05, %v51_v29 }
 0x130   :  { %292 = vrsqrt.f32 %v53_v30 }
 0x136   :  { %v291_v31 = vpop.eup %290 }
 0x137   :  { %v56_v33 = vmul.f32 %v291_v31, %v40_v8 }
 0x139   :  { %v65_v35 = vmul.f32 %v252_v32, %v56_v33 }
 0x13a   :  { %v293_v36 = vpop.eup %292 }
 0x13b   :  { %v74_v37 = vadd.f32 %v253_v34, %v65_v35  ;;  %v57_v38 = vmul.f32 %v293_v36, %v41_v12 }
 0x13d   :  { %v272_v39 = vpack.c.bf16 %v74_v37, %v74_v37  ;;  %v66_v40 = vmul.f32 %v252_v32, %v57_v38 }
 0x13f   :  { %85 = vst.msk [vmem:[#allocation2] sm:$0xf] %vm84_vm2, %v272_v39  ;;  %v75_v41 = vadd.f32 %v253_v34, %v66_v40 }
 0x141   :  { %v273_v42 = vpack.c.bf16 %v75_v41, %v75_v41 }
 0x143   :  { %87 = vst.msk [vmem:[#allocation2 + $0x4] sm:$0x1] %vm86_vm3, %v273_v42 }
 0x14a   :  { %v289_v43 = vld [vmem:[#allocation2] sm:$0x1f]  }
 0x14b   :  { %265 = vmatmul.mubr.msk.bf16.vlgmr.msra.gmra.mrb[0].mxu0 %vm29_vm0, %v289_v43 }
 0x21e   :  { %v193_v51 = vpop.f32.mrb[0].mxu0 }
 0x21f   :  { %v194_v52 = vadd.f32 %v193_v51, %v103_v49  ;;  %v195_v53 = vpop.f32.mrb[1].mxu0 }
 0x220   :  { %v196_v54 = vadd.f32 %v195_v53, %v107_v50  ;;  %v197_v55 = vpop.f32.mrb[2].mxu0 }
 0x221   :  { %v266_v56 = vmul.f32 -1.702, %v194_v52  ;;  %v198_v57 = vadd.f32 %v197_v55, %v103_v49  ;;  %v199_v58 = vpop.f32.mrb[3].mxu0 }
 0x222   :  { %v267_v59 = vmul.f32 -1.702, %v196_v54  ;;  %v200_v60 = vadd.f32 %v199_v58, %v107_v50 }
 0x223   :  { %v210_v61 = vmul.f32 1.442695, %v266_v56  ;;  %v268_v62 = vmul.f32 -1.702, %v198_v57 }
 0x224   :  { %v212_v63 = vmul.f32 1.442695, %v267_v59  ;;  %v269_v0 = vmul.f32 -1.702, %v200_v60 }
 0x225   :  { %294 = vpow2.f32 %v210_v61  ;;  %v214_v1 = vmul.f32 1.442695, %v268_v62 }
 0x226   :  { %296 = vpow2.f32 %v212_v63  ;;  %v216_v2 = vmul.f32 1.442695, %v269_v0 }
 0x227   :  { %298 = vpow2.f32 %v214_v1 }
 0x228   :  { %300 = vpow2.f32 %v216_v2 }
 0x22f   :  { %v295_v3 = vpop.eup %294 }
 0x230   :  { %v297_v4 = vpop.eup %296  ;;  %v218_v5 = vadd.f32 1.0, %v295_v3 }
 0x231   :  { %v299_v6 = vpop.eup %298  ;;  %v219_v7 = vadd.f32 1.0, %v297_v4 }
 0x232   :  { %v301_v8 = vpop.eup %300  ;;  %302 = vrcp.f32 %v218_v5  ;;  %v220_v9 = vadd.f32 1.0, %v299_v6 }
 0x233   :  { %304 = vrcp.f32 %v219_v7  ;;  %v221_v10 = vadd.f32 1.0, %v301_v8 }
 0x234   :  { %306 = vrcp.f32 %v220_v9 }
 0x235   :  { %308 = vrcp.f32 %v221_v10 }
 0x23c   :  { %v303_v11 = vpop.eup %302 }
 0x23d   :  { %v305_v12 = vpop.eup %304  ;;  %v230_v13 = vmul.f32 %v303_v11, %v194_v52 }
 0x23e   :  { %v307_v14 = vpop.eup %306  ;;  %v231_v15 = vmul.f32 %v305_v12, %v196_v54 }
 0x23f   :  { %v309_v16 = vpop.eup %308  ;;  %v232_v17 = vmul.f32 %v307_v14, %v198_v57 }
 0x240   :  { %v274_v18 = vpack.c.bf16 %v231_v15, %v230_v13  ;;  %v233_v19 = vmul.f32 %v309_v16, %v200_v60 }
 0x242   :  { %246 = vst [vmem:[%s394_s5] sm:$0xff] %v274_v18  ;;  %v275_v20 = vpack.c.bf16 %v233_v19, %v232_v17 }
 0x244   :  { %247 = vst [vmem:[%s394_s5 + $0x8] sm:$0x11] %v275_v20 }

// kernel: _lambda_.26
= control target key start
LH: loop header
LB: loop body
LE: loop exit
PB: predicated region body
PF: predicated region fallthrough
CT: control target
= control target key end

     0   :  { %vm220_vm0 = vcmask 519168   ;;  %vm222_vm1 = vcmask 516096   ;;  %s386_s1 = inlined_call_operand.vmem [shape: bf16[256,64], index: 1, kind: input, shape index: {}]   ;;  %s387_s0 = inlined_call_operand.vmem [shape: bf16[10,256], index: 0, kind: input, shape index: {}]   ;;  %s388_s3 = inlined_call_operand.vmem [shape: bf16[10,64], index: 3, kind: input, shape index: {}]   ;;  %s389_s2 = inlined_call_operand.vmem [shape: f32[1,64], index: 2, kind: input, shape index: {}]   ;;  %s390_s4 = inlined_call_operand.vmem [shape: bf16[10,64], index: 4, kind: output, shape index: {}]  }
   0x1   :  { %v273_v0 = vld [vmem:[%s386_s1 + $0x40] sm:$0xff]   ;;  %v275_v2 = vld [vmem:[%s386_s1 + $0x48] sm:$0xff]   ;;  %v277_v4 = vld [vmem:[%s386_s1 + $0x50] sm:$0xff]  }
   0x2   :  { %v274_v1 = vld [vmem:[%s386_s1] sm:$0xff]   ;;  %251 = vmatprep.subr.bf16.mxu0 %v273_v0  ;;  %v276_v3 = vld [vmem:[%s386_s1 + $0x8] sm:$0xff]   ;;  %v278_v5 = vld [vmem:[%s386_s1 + $0x10] sm:$0xff]  }
   0x3   :  { %252 = vmatpush3.bf16.msra.mxu0 %v274_v1  ;;  %v279_v6 = vld [vmem:[%s386_s1 + $0x58] sm:$0xff]   ;;  %v281_v8 = vld [vmem:[%s386_s1 + $0x60] sm:$0xff]   ;;  %v283_v10 = vld [vmem:[%s386_s1 + $0x68] sm:$0xff]  }
   0x4   :  { %253 = vmatprep.subr.bf16.mxu0 %v275_v2  ;;  %v280_v7 = vld [vmem:[%s386_s1 + $0x18] sm:$0xff]   ;;  %v282_v9 = vld [vmem:[%s386_s1 + $0x20] sm:$0xff]   ;;  %v284_v12 = vld [vmem:[%s386_s1 + $0x28] sm:$0xff]  }
   0x5   :  { %v291_v11 = vld [vmem:[%s387_s0 + $0x4] ss:$8 sps:$4 sm:$0x1f]   ;;  %v285_v13 = vld [vmem:[%s386_s1 + $0x70] sm:$0xff]   ;;  %v287_v15 = vld [vmem:[%s386_s1 + $0x78] sm:$0xff]  }
   0x6   :  { %197 = vmatprep.mubr.bf16.mxu0 %v291_v11  ;;  %v286_v14 = vld [vmem:[%s386_s1 + $0x30] sm:$0xff]   ;;  %v288_v16 = vld [vmem:[%s386_s1 + $0x38] sm:$0xff]   ;;  %v289_v17 = vld [vmem:[%s387_s0] ss:$8 sps:$4 sm:$0x1f]  }
   0x7   :  { %254 = vmatpush3.bf16.msra.mxu0 %v276_v3  ;;  %v206_v18 = vld [vmem:[%s388_s3] sm:$0xf]  ;;  %v207_v22 = vld [vmem:[%s388_s3 + $0x4] sm:$0x1] }
   0x8   :  { %255 = vmatprep.subr.bf16.mxu0 %v277_v4  ;;  %v228_v20 = vld [vmem:[%s389_s2] ss:$0 sm:$0xff]  ;;  %v208_v24 = vunpack.c.l.bf16 %v206_v18  ;;  %v209_v29 = vunpack.c.l.bf16 %v207_v22 }
   0xb   :  { %256 = vmatpush3.bf16.msra.mxu0 %v278_v5 }
   0xc   :  { %257 = vmatprep.subr.bf16.mxu0 %v279_v6 }
   0xf   :  { %258 = vmatpush3.bf16.msra.mxu0 %v280_v7 }
  0x10   :  { %259 = vmatprep.subr.bf16.mxu0 %v281_v8 }
  0x13   :  { %260 = vmatpush3.bf16.msra.mxu0 %v282_v9 }
  0x14   :  { %261 = vmatprep.subr.bf16.mxu0 %v283_v10 }
  0x17   :  { %262 = vmatpush3.bf16.msra.mxu0 %v284_v12 }
  0x18   :  { %263 = vmatprep.subr.bf16.mxu0 %v285_v13 }
  0x1b   :  { %264 = vmatpush3.bf16.msra.mxu0 %v286_v14 }
  0x1c   :  { %265 = vmatprep.subr.bf16.mxu0 %v287_v15 }
  0x1f   :  { %266 = vmatpush3.bf16.msra.mxu0 %v288_v16 }
  0x22   :  { %198 = vmatmul.mubr.bf16.vlgmr.msra.gmra.mrb[0].mxu0 %v289_v17 }
  0xf5   :  { %v267_v19 = vpop.f32.mrb[0].mxu0 }
  0xf6   :  { %v268_v21 = vpop.f32.mrb[1].mxu0 }
  0xf7   :  { %v269_v23 = vadd.f32 %v268_v21, %v267_v19  ;;  %v270_v25 = vpop.f32.mrb[2].mxu0 }
  0xf8   :  { %v271_v26 = vpop.f32.mrb[3].mxu0 }
  0xf9   :  { %v200_v27 = vadd.f32 %v269_v23, %v228_v20  ;;  %v272_v28 = vadd.f32 %v271_v26, %v270_v25 }
  0xfb   :  { %v210_v30 = vadd.f32 %v208_v24, %v200_v27  ;;  %v203_v31 = vadd.f32 %v272_v28, %v228_v20 }
  0xfd   :  { %v249_v32 = vpack.c.bf16 %v210_v30, %v210_v30  ;;  %v211_v33 = vadd.f32 %v209_v29, %v203_v31 }
  0xff   :  { %221 = vst.msk [vmem:[%s390_s4] sm:$0xf] %vm220_vm0, %v249_v32  ;;  %v250_v34 = vpack.c.bf16 %v211_v33, %v211_v33 }
 0x101   :  { %223 = vst.msk [vmem:[%s390_s4 + $0x4] sm:$0x1] %vm222_vm1, %v250_v34 }

// kernel: _lambda_.31
= control target key start
LH: loop header
LB: loop body
LE: loop exit
PB: predicated region body
PF: predicated region fallthrough
CT: control target
= control target key end

     0   :  { %vm24_vm0 = vcmask 517120   ;;  %v182_v9 = vmov 0.0   ;;  %vm183_vm1 = vmmov 0   ;;  %vm56_vm2 = vcmask 516096   ;;  %s237_s0 = inlined_call_operand.vmem [shape: bf16[2,64], index: 0, kind: input, shape index: {}]   ;;  %s238_s3 = inlined_call_operand.vmem [shape: bf16[64,64], index: 3, kind: input, shape index: {}]   ;;  %s239_s1 = inlined_call_operand.vmem [shape: f32[1,64], index: 1, kind: input, shape index: {}]   ;;  %s240_s2 = inlined_call_operand.vmem [shape: f32[1,64], index: 2, kind: input, shape index: {}]   ;;  %s241_s4 = inlined_call_operand.vmem [shape: f32[2,64], index: 4, kind: output, shape index: {}]  }
   0x1   :  { %v22_v0 = vld [vmem:[%s237_s0] sm:$0x1]  ;;  %160 = vmatprep.subr.bf16.mxu0 %v182_v9  ;;  %v175_v10 = vld [vmem:[%s238_s3 + $0x8] sm:$0xff]   ;;  %v176_v11 = vld [vmem:[%s238_s3 + $0x10] sm:$0xff]   ;;  %168 = vmatprep.mubr.msk.bf16.mxu0 %vm183_vm1, %v182_v9  ;;  %vm91_vm3 = vcmask 523264  }
   0x2   :  { %v23_v1 = vunpack.c.l.bf16 %v22_v0  ;;  %v174_v8 = vld [vmem:[%s238_s3] sm:$0xff]   ;;  %v177_v12 = vld [vmem:[%s238_s3 + $0x18] sm:$0xff]  }
   0x3   :  { %161 = vmatpush3.bf16.msra.mxu0 %v174_v8  ;;  %v148_v17 = vld [vmem:[%s239_s1] ss:$0 sm:$0xff] }
   0x4   :  { %v25_v2 = vsel %vm24_vm0, %v23_v1, 0.0  ;;  %162 = vmatprep.subr.bf16.mxu0 %v182_v9  ;;  %v149_v19 = vld [vmem:[%s240_s2] ss:$0 sm:$0xff] }
   0x5   :  { %26 = vadd.xlane.f32.xlu0 %v25_v2 }
   0x7   :  { %163 = vmatpush3.bf16.msra.mxu0 %v175_v10 }
   0x8   :  { %164 = vmatprep.subr.bf16.mxu0 %v182_v9 }
   0xb   :  { %165 = vmatpush3.bf16.msra.mxu0 %v176_v11 }
   0xc   :  { %166 = vmatprep.subr.bf16.mxu0 %v182_v9 }
   0xf   :  { %167 = vmatpush3.bf16.msra.mxu0 %v177_v12 }
  0x92   :  { %v27_v3 = vpop.xlane.xlu0 %26 }
  0x93   :  { %v29_v4 = vmul.f32 0.015625, %v27_v3 }
  0x95   :  { %v30_v5 = vsub.f32 %v23_v1, %v29_v4 }
  0x97   :  { %v31_v6 = vmul.f32 %v30_v5, %v30_v5 }
  0x99   :  { %v32_v7 = vsel %vm24_vm0, %v31_v6, 0.0 }
  0x9a   :  { %33 = vadd.xlane.f32.xlu0 %v32_v7 }
 0x127   :  { %v34_v13 = vpop.xlane.xlu0 %33 }
 0x128   :  { %v35_v14 = vmul.f32 0.015625, %v34_v13 }
 0x12a   :  { %v36_v15 = vadd.f32 1e-05, %v35_v14 }
 0x12c   :  { %178 = vrsqrt.f32 %v36_v15 }
 0x136   :  { %v179_v16 = vpop.eup %178 }
 0x137   :  { %v38_v18 = vmul.f32 %v179_v16, %v30_v5 }
 0x139   :  { %v46_v20 = vmul.f32 %v148_v17, %v38_v18 }
 0x13b   :  { %v54_v21 = vadd.f32 %v149_v19, %v46_v20 }
 0x13d   :  { %v55_v22 = vpack.c.bf16 %v54_v21, %v54_v21 }
 0x13f   :  { %57 = vst.msk [vmem:[#allocation2] sm:$0x1] %vm56_vm2, %v55_v22 }
 0x146   :  { %v58_v23 = vld [vmem:[#allocation2] sm:$0x1] }
 0x147   :  { %169 = vmatmul.mubr.msk.bf16.vlgmr.msra.gmra.mrb[0].mxu0 %vm91_vm3, %v58_v23 }
 0x21a   :  { %v129_v24 = vpop.f32.mrb[0].mxu0 }
 0x21b   :  { %v170_v25 = vpop.f32.mrb[1].mxu0  ;;  %v135_v26 = vmul.f32 %v129_v24, %v129_v24 }
 0x21c   :  { %v132_v27 = vpop.f32.mrb[2].mxu0 }
 0x21d   :  { %v171_v28 = vpop.f32.mrb[3].mxu0  ;;  %v137_v29 = vsel %vm24_vm0, %v135_v26, 0.0 }
 0x21e   :  { %138 = vadd.xlane.f32.xlu1 %v137_v29 }
 0x2ab   :  { %v139_v30 = vpop.xlane.xlu1 %138 }
 0x2ac   :  { %v140_v31 = vmax.f32 %v139_v30, 1e-12 }
 0x2ae   :  { %180 = vrsqrt.f32 %v140_v31 }
 0x2b8   :  { %v181_v32 = vpop.eup %180 }
 0x2b9   :  { %v142_v33 = vmul.f32 %v181_v32, %v129_v24 }
 0x2bb   :  { %143 = vst.msk [vmem:[%s241_s4] sm:$0x3] %vm24_vm0, %v142_v33 }

// kernel: _lambda_.32
= control target key start
LH: loop header
LB: loop body
LE: loop exit
PB: predicated region body
PF: predicated region fallthrough
CT: control target
= control target key end

     0   :  { %vm49_vm0 = vcmask 523264   ;;  %vm507_vm1 = vcmask 1043456   ;;  %vm508_vm2 = vcmask 523268   ;;  %s968_s0 = inlined_call_operand.vmem [shape: bf16[96,64], index: 0, kind: input, shape index: {}]   ;;  %s969_s3 = inlined_call_operand.vmem [shape: bf16[64,192], index: 3, kind: input, shape index: {}]   ;;  %s970_s1 = inlined_call_operand.vmem [shape: f32[1,64], index: 1, kind: input, shape index: {}]   ;;  %s971_s2 = inlined_call_operand.vmem [shape: f32[1,64], index: 2, kind: input, shape index: {}]   ;;  %s972_s4 = inlined_call_operand.vmem [shape: f32[1,192], index: 4, kind: input, shape index: {}]   ;;  %s973_s5 = inlined_call_operand.vmem [shape: bf16[96,192], index: 5, kind: output, shape index: {}]  }
   0x1   :  { %v567_v0 = vld [vmem:[%s968_s0] sm:$0xff]   ;;  %v592_v1 = vld [vmem:[%s968_s0 + $0x18] sm:$0xff]   ;;  %v590_v6 = vld [vmem:[%s968_s0 + $0x8] sm:$0xff]  }
   0x2   :  { %v568_v2 = vunpack.c.l.bf16 %v567_v0  ;;  %v580_v3 = vunpack.c.l.bf16 %v592_v1  ;;  %v569_v4 = vunpack.c.h.bf16 %v567_v0  ;;  %v581_v5 = vunpack.c.h.bf16 %v592_v1  ;;  %v685_v13 = vld [vmem:[%s968_s0 + $0x20] sm:$0xff]   ;;  %v694_v18 = vld [vmem:[%s968_s0 + $0x10] sm:$0xff]   ;;  %v703_v23 = vld [vmem:[%s968_s0 + $0x28] sm:$0xff]  }
   0x3   :  { %v572_v11 = vunpack.c.l.bf16 %v590_v6  ;;  %v573_v12 = vunpack.c.h.bf16 %v590_v6  ;;  %v584_v16 = vunpack.c.l.bf16 %v685_v13  ;;  %v585_v17 = vunpack.c.h.bf16 %v685_v13  ;;  %vm882_vm3 = vmor %vm508_vm2, %vm507_vm1 }
   0x4   :  { %v50_v7 = vsel %vm49_vm0, %v568_v2, 0.0  ;;  %v68_v8 = vsel %vm49_vm0, %v580_v3, 0.0  ;;  %v53_v9 = vsel %vm49_vm0, %v569_v4, 0.0  ;;  %v71_v10 = vsel %vm49_vm0, %v581_v5, 0.0 }
   0x5   :  { %51 = vadd.xlane.f32.xlu0 %v50_v7  ;;  %69 = vadd.xlane.f32.xlu1 %v68_v8  ;;  %v56_v14 = vsel %vm49_vm0, %v572_v11, 0.0  ;;  %v59_v15 = vsel %vm49_vm0, %v573_v12, 0.0  ;;  %v74_v19 = vsel %vm49_vm0, %v584_v16, 0.0  ;;  %v77_v20 = vsel %vm49_vm0, %v585_v17, 0.0 }
   0x6   :  { %v576_v21 = vunpack.c.l.bf16 %v694_v18  ;;  %v577_v22 = vunpack.c.h.bf16 %v694_v18  ;;  %v588_v26 = vunpack.c.l.bf16 %v703_v23  ;;  %v589_v27 = vunpack.c.h.bf16 %v703_v23 }
   0x8   :  { %v62_v24 = vsel %vm49_vm0, %v576_v21, 0.0  ;;  %v65_v25 = vsel %vm49_vm0, %v577_v22, 0.0  ;;  %v80_v28 = vsel %vm49_vm0, %v588_v26, 0.0  ;;  %v83_v29 = vsel %vm49_vm0, %v589_v27, 0.0 }
   0x9   :  { %54 = vadd.xlane.f32.xlu0 %v53_v9  ;;  %72 = vadd.xlane.f32.xlu1 %v71_v10 }
   0xd   :  { %57 = vadd.xlane.f32.xlu0 %v56_v14  ;;  %60 = vadd.xlane.f32.xlu1 %v59_v15 }
  0x11   :  { %75 = vadd.xlane.f32.xlu0 %v74_v19  ;;  %78 = vadd.xlane.f32.xlu1 %v77_v20 }
  0x15   :  { %63 = vadd.xlane.f32.xlu0 %v62_v24  ;;  %66 = vadd.xlane.f32.xlu1 %v65_v25 }
  0x19   :  { %81 = vadd.xlane.f32.xlu0 %v80_v28  ;;  %84 = vadd.xlane.f32.xlu1 %v83_v29  ;;  %v604_v28 = vld [vmem:[%s969_s3 + $0x4] ss:$8 sps:$4 sm:$0xff]  }
  0x1a   :  { %342 = vmatprep.subr.bf16.mxu0 %v604_v28  ;;  %595 = vmatprep.subr.bf16.mxu1 %v604_v28 }
  0x92   :  { %v52_v30 = vpop.xlane.xlu0 %51  ;;  %v70_v31 = vpop.xlane.xlu1 %69 }
  0x93   :  { %v87_v32 = vmul.f32 0.015625, %v52_v30  ;;  %v93_v33 = vmul.f32 0.015625, %v70_v31  ;;  %v265_v30 = vld [vmem:[%s969_s3 + $0x10] sm:$0xff]  ;;  %v266_v31 = vld [vmem:[%s969_s3 + $0x18] sm:$0xff] }
  0x95   :  { %v715_v34 = vsub.f32 %v568_v2, %v87_v32  ;;  %v717_v35 = vsub.f32 %v580_v3, %v93_v33  ;;  %v606_v32 = vld [vmem:[%s969_s3 + $0x14] ss:$8 sps:$4 sm:$0xff]   ;;  %v530_v33 = vcombine.low %v265_v30, %v266_v31 }
  0x96   :  { %v55_v36 = vpop.xlane.xlu0 %54  ;;  %v73_v37 = vpop.xlane.xlu1 %72 }
  0x97   :  { %v88_v38 = vmul.f32 0.015625, %v55_v36  ;;  %v94_v39 = vmul.f32 0.015625, %v73_v37  ;;  %v111_v40 = vmul.f32 %v715_v34, %v715_v34  ;;  %v117_v41 = vmul.f32 %v717_v35, %v717_v35  ;;  %v608_v36 = vld [vmem:[%s969_s3 + $0x24] ss:$8 sps:$4 sm:$0xff]   ;;  %v610_v37 = vld [vmem:[%s969_s3 + $0x20] ss:$8 sps:$4 sm:$0xff]  }
  0x99   :  { %v723_v42 = vsub.f32 %v569_v4, %v88_v38  ;;  %v725_v43 = vsub.f32 %v581_v5, %v94_v39  ;;  %v123_v44 = vsel %vm49_vm0, %v111_v40, 0.0  ;;  %v141_v47 = vsel %vm49_vm0, %v117_v41, 0.0  ;;  %v611_v38 = vld [vmem:[%s969_s3 + $0x34] ss:$8 sps:$4 sm:$0xff]   ;;  %v613_v39 = vld [vmem:[%s969_s3 + $0x30] ss:$8 sps:$4 sm:$0xff]  }
  0x9a   :  { %124 = vadd.xlane.f32.xlu0 %v123_v44  ;;  %v58_v45 = vpop.xlane.xlu0 %57  ;;  %v61_v46 = vpop.xlane.xlu1 %60  ;;  %v638_v40 = vmov 0  }
  0x9b   :  { %v89_v48 = vmul.f32 0.015625, %v58_v45  ;;  %v90_v49 = vmul.f32 0.015625, %v61_v46  ;;  %v112_v50 = vmul.f32 %v723_v42, %v723_v42  ;;  %v118_v51 = vmul.f32 %v725_v43, %v725_v43  ;;  %374 = vmatprep.mubr.bf16.mxu0 %v638_v40  ;;  %404 = vmatprep.mubr.bf16.mxu1 %v638_v40 }
  0x9d   :  { %v733_v52 = vsub.f32 %v572_v11, %v89_v48  ;;  %v735_v53 = vsub.f32 %v573_v12, %v90_v49  ;;  %v126_v54 = vsel %vm49_vm0, %v112_v50, 0.0  ;;  %v144_v57 = vsel %vm49_vm0, %v118_v51, 0.0 }
  0x9e   :  { %142 = vadd.xlane.f32.xlu0 %v141_v47  ;;  %127 = vadd.xlane.f32.xlu1 %v126_v54  ;;  %v76_v55 = vpop.xlane.xlu0 %75  ;;  %v79_v56 = vpop.xlane.xlu1 %78 }
  0x9f   :  { %v95_v58 = vmul.f32 0.015625, %v76_v55  ;;  %v96_v59 = vmul.f32 0.015625, %v79_v56  ;;  %v113_v60 = vmul.f32 %v733_v52, %v733_v52  ;;  %v114_v61 = vmul.f32 %v735_v53, %v735_v53 }
  0xa1   :  { %v743_v62 = vsub.f32 %v584_v16, %v95_v58  ;;  %v745_v63 = vsub.f32 %v585_v17, %v96_v59  ;;  %v129_v0 = vsel %vm49_vm0, %v113_v60, 0.0  ;;  %v132_v3 = vsel %vm49_vm0, %v114_v61, 0.0 }
  0xa2   :  { %145 = vadd.xlane.f32.xlu1 %v144_v57  ;;  %130 = vadd.xlane.f32.xlu0 %v129_v0  ;;  %v64_v1 = vpop.xlane.xlu0 %63  ;;  %v67_v2 = vpop.xlane.xlu1 %66 }
  0xa3   :  { %v91_v4 = vmul.f32 0.015625, %v64_v1  ;;  %v92_v5 = vmul.f32 0.015625, %v67_v2  ;;  %v119_v6 = vmul.f32 %v743_v62, %v743_v62  ;;  %v120_v7 = vmul.f32 %v745_v63, %v745_v63 }
  0xa5   :  { %v753_v8 = vsub.f32 %v576_v21, %v91_v4  ;;  %v755_v9 = vsub.f32 %v577_v22, %v92_v5  ;;  %v147_v10 = vsel %vm49_vm0, %v119_v6, 0.0  ;;  %v150_v13 = vsel %vm49_vm0, %v120_v7, 0.0 }
  0xa6   :  { %133 = vadd.xlane.f32.xlu1 %v132_v3  ;;  %148 = vadd.xlane.f32.xlu0 %v147_v10  ;;  %v82_v11 = vpop.xlane.xlu0 %81  ;;  %v85_v12 = vpop.xlane.xlu1 %84  ;;  %v815_v10 = vld [vmem:[%s970_s1] ss:$0 sm:$0xff] }
  0xa7   :  { %v97_v14 = vmul.f32 0.015625, %v82_v11  ;;  %v98_v15 = vmul.f32 0.015625, %v85_v12  ;;  %v115_v16 = vmul.f32 %v753_v8, %v753_v8  ;;  %v116_v17 = vmul.f32 %v755_v9, %v755_v9 }
  0xa9   :  { %v765_v18 = vsub.f32 %v588_v26, %v97_v14  ;;  %v769_v19 = vsub.f32 %v589_v27, %v98_v15  ;;  %v135_v20 = vsel %vm49_vm0, %v115_v16, 0.0  ;;  %v138_v21 = vsel %vm49_vm0, %v116_v17, 0.0  ;;  %v263_v26 = vld [vmem:[%s969_s3] sm:$0xff]  ;;  %v264_v27 = vld [vmem:[%s969_s3 + $0x8] sm:$0xff] }
  0xaa   :  { %151 = vadd.xlane.f32.xlu1 %v150_v13  ;;  %136 = vadd.xlane.f32.xlu0 %v135_v20  ;;  %v528_v29 = vcombine.low %v263_v26, %v264_v27 }
  0xab   :  { %v121_v22 = vmul.f32 %v765_v18, %v765_v18  ;;  %v122_v24 = vmul.f32 %v769_v19, %v769_v19 }
  0xac   :  { %343 = vmatpush1.bf16.msra.mxu0 %v528_v29  ;;  %599 = vmatpush1.bf16.msra.mxu1 %v528_v29 }
  0xad   :  { %v153_v25 = vsel %vm49_vm0, %v121_v22, 0.0  ;;  %v156_v23 = vsel %vm49_vm0, %v122_v24, 0.0  ;;  %344 = vmatprep.subr.bf16.mxu0 %v606_v32  ;;  %596 = vmatprep.subr.bf16.mxu1 %v606_v32  ;;  %v822_v22 = vld [vmem:[%s971_s2] ss:$0 sm:$0xff] }
  0xae   :  { %139 = vadd.xlane.f32.xlu1 %v138_v21  ;;  %154 = vadd.xlane.f32.xlu0 %v153_v25 }
  0xb0   :  { %345 = vmatpush1.bf16.msra.mxu0 %v530_v33  ;;  %600 = vmatpush1.bf16.msra.mxu1 %v530_v33 }
  0xb1   :  { %346 = vmatprep.subr.bf16.mxu0 %v608_v36  ;;  %597 = vmatprep.subr.bf16.mxu1 %v608_v36 }
  0xb2   :  { %157 = vadd.xlane.f32.xlu1 %v156_v23 }
  0xb4   :  { %347 = vmatpush1.bf16.msra.mxu0 %v610_v37  ;;  %601 = vmatpush1.bf16.msra.mxu1 %v610_v37 }
  0xb5   :  { %348 = vmatprep.subr.bf16.mxu0 %v611_v38  ;;  %598 = vmatprep.subr.bf16.mxu1 %v611_v38 }
  0xb8   :  { %349 = vmatpush1.bf16.msra.mxu0 %v613_v39  ;;  %602 = vmatpush1.bf16.msra.mxu1 %v613_v39 }
 0x127   :  { %v125_v41 = vpop.xlane.xlu0 %124 }
 0x128   :  { %v159_v44 = vmul.f32 0.015625, %v125_v41 }
 0x12a   :  { %v171_v45 = vadd.f32 1e-05, %v159_v44 }
 0x12b   :  { %v128_v46 = vpop.xlane.xlu1 %127  ;;  %v143_v47 = vpop.xlane.xlu0 %142 }
 0x12c   :  { %614 = vrsqrt.f32 %v171_v45  ;;  %v160_v48 = vmul.f32 0.015625, %v128_v46  ;;  %v165_v49 = vmul.f32 0.015625, %v143_v47 }
 0x12e   :  { %v172_v50 = vadd.f32 1e-05, %v160_v48  ;;  %v177_v51 = vadd.f32 1e-05, %v165_v49 }
 0x12f   :  { %v146_v54 = vpop.xlane.xlu1 %145  ;;  %v131_v55 = vpop.xlane.xlu0 %130 }
 0x130   :  { %616 = vrsqrt.f32 %v172_v50  ;;  %v166_v56 = vmul.f32 0.015625, %v146_v54  ;;  %v161_v57 = vmul.f32 0.015625, %v131_v55 }
 0x131   :  { %618 = vrsqrt.f32 %v177_v51 }
 0x132   :  { %v178_v58 = vadd.f32 1e-05, %v166_v56  ;;  %v173_v59 = vadd.f32 1e-05, %v161_v57 }
 0x133   :  { %v134_v60 = vpop.xlane.xlu1 %133  ;;  %v149_v61 = vpop.xlane.xlu0 %148 }
 0x134   :  { %620 = vrsqrt.f32 %v178_v58  ;;  %v162_v0 = vmul.f32 0.015625, %v134_v60  ;;  %v167_v1 = vmul.f32 0.015625, %v149_v61 }
 0x135   :  { %622 = vrsqrt.f32 %v173_v59 }
 0x136   :  { %v615_v2 = vpop.eup %614  ;;  %v174_v3 = vadd.f32 1e-05, %v162_v0  ;;  %v179_v4 = vadd.f32 1e-05, %v167_v1 }
 0x137   :  { %v195_v5 = vmul.f32 %v615_v2, %v715_v34  ;;  %v152_v6 = vpop.xlane.xlu1 %151  ;;  %v137_v7 = vpop.xlane.xlu0 %136 }
 0x138   :  { %624 = vrsqrt.f32 %v174_v3  ;;  %v168_v11 = vmul.f32 0.015625, %v152_v6  ;;  %v163_v12 = vmul.f32 0.015625, %v137_v7 }
 0x139   :  { %626 = vrsqrt.f32 %v179_v4  ;;  %v214_v17 = vmul.f32 %v815_v10, %v195_v5 }
 0x13a   :  { %v617_v13 = vpop.eup %616  ;;  %v180_v14 = vadd.f32 1e-05, %v168_v11  ;;  %v175_v15 = vadd.f32 1e-05, %v163_v12 }
 0x13b   :  { %v619_v16 = vpop.eup %618  ;;  %v196_v20 = vmul.f32 %v617_v13, %v723_v42  ;;  %v140_v34 = vpop.xlane.xlu1 %139  ;;  %v233_v42 = vadd.f32 %v822_v22, %v214_v17 }
 0x13c   :  { %v155_v21 = vpop.xlane.xlu0 %154  ;;  %v201_v24 = vmul.f32 %v619_v16, %v717_v35  ;;  %628 = vrsqrt.f32 %v180_v14  ;;  %v164_v25 = vmul.f32 0.015625, %v140_v34 }
 0x13d   :  { %v169_v23 = vmul.f32 0.015625, %v155_v21  ;;  %v215_v26 = vmul.f32 %v815_v10, %v196_v20  ;;  %630 = vrsqrt.f32 %v175_v15  ;;  %v273_v21 = vlaneseq }
 0x13e   :  { %v621_v27 = vpop.eup %620  ;;  %v176_v28 = vadd.f32 1e-05, %v164_v25  ;;  %v220_v32 = vmul.f32 %v815_v10, %v201_v24  ;;  %v271_v25 = vld [vmem:[%s972_s4] sm:$0x3] }
 0x13f   :  { %v181_v29 = vadd.f32 1e-05, %v169_v23  ;;  %v623_v30 = vpop.eup %622  ;;  %v234_v31 = vadd.f32 %v822_v22, %v215_v26  ;;  %v202_v33 = vmul.f32 %v621_v27, %v725_v43  ;;  %v158_v36 = vpop.xlane.xlu1 %157 }
 0x140   :  { %v197_v35 = vmul.f32 %v623_v30, %v733_v52  ;;  %632 = vrsqrt.f32 %v176_v28  ;;  %v170_v37 = vmul.f32 0.015625, %v158_v36  ;;  %v239_v46 = vadd.f32 %v822_v22, %v220_v32 }
 0x141   :  { %v245_v38 = vpack.c.bf16 %v234_v31, %v233_v42  ;;  %v221_v39 = vmul.f32 %v815_v10, %v202_v33  ;;  %634 = vrsqrt.f32 %v181_v29 }
 0x142   :  { %v625_v41 = vpop.eup %624  ;;  %v182_v44 = vadd.f32 1e-05, %v170_v37  ;;  %v216_v43 = vmul.f32 %v815_v10, %v197_v35 }
 0x143   :  { %v627_v45 = vpop.eup %626  ;;  %251 = vst.msk [vmem:[#allocation2] sm:$0xff] %vm49_vm0, %v245_v38  ;;  %v240_v47 = vadd.f32 %v822_v22, %v221_v39  ;;  %v198_v48 = vmul.f32 %v625_v41, %v735_v53 }
 0x144   :  { %v203_v52 = vmul.f32 %v627_v45, %v743_v62  ;;  %636 = vrsqrt.f32 %v182_v44  ;;  %v235_v55 = vadd.f32 %v822_v22, %v216_v43 }
 0x145   :  { %v248_v49 = vpack.c.bf16 %v240_v47, %v239_v46  ;;  %v217_v50 = vmul.f32 %v815_v10, %v198_v48 }
 0x146   :  { %v629_v51 = vpop.eup %628  ;;  %v222_v57 = vmul.f32 %v815_v10, %v203_v52 }
 0x147   :  { %v631_v54 = vpop.eup %630  ;;  %254 = vst.msk [vmem:[#allocation2 + $0x18] sm:$0xff] %vm49_vm0, %v248_v49  ;;  %v236_v56 = vadd.f32 %v822_v22, %v217_v50  ;;  %v204_v58 = vmul.f32 %v629_v51, %v745_v63 }
 0x148   :  { %v199_v53 = vmul.f32 %v631_v54, %v753_v8  ;;  %v241_v1 = vadd.f32 %v822_v22, %v222_v57 }
 0x149   :  { %v246_v59 = vpack.c.bf16 %v236_v56, %v235_v55  ;;  %v223_v62 = vmul.f32 %v815_v10, %v204_v58 }
 0x14a   :  { %v633_v60 = vpop.eup %632  ;;  %v257_v61 = vld [vmem:[#allocation2] sm:$0xff]  ;;  %v218_v3 = vmul.f32 %v815_v10, %v199_v53 }
 0x14b   :  { %v635_v0 = vpop.eup %634  ;;  %252 = vst.msk [vmem:[#allocation2 + $0x8] sm:$0xff] %vm49_vm0, %v246_v59  ;;  %v242_v2 = vadd.f32 %v822_v22, %v223_v62  ;;  %v200_v4 = vmul.f32 %v633_v60, %v755_v9  ;;  %536 = vmatmul.mubr.msk.bf16.vlgmr.msra.gmra.mrb[0].mxu0 %vm49_vm0, %v257_v61 }
 0x14c   :  { %v205_v63 = vmul.f32 %v635_v0, %v765_v18  ;;  %384 = vmatprep.mubr.bf16.mxu0 %v638_v40  ;;  %v237_v11 = vadd.f32 %v822_v22, %v218_v3 }
 0x14d   :  { %v249_v8 = vpack.c.bf16 %v242_v2, %v241_v1  ;;  %v219_v5 = vmul.f32 %v815_v10, %v200_v4 }
 0x14e   :  { %v637_v6 = vpop.eup %636  ;;  %v260_v7 = vld [vmem:[#allocation2 + $0x18] sm:$0xff]  ;;  %v224_v13 = vmul.f32 %v815_v10, %v205_v63 }
 0x14f   :  { %255 = vst.msk [vmem:[#allocation2 + $0x20] sm:$0xff] %vm49_vm0, %v249_v8  ;;  %v238_v12 = vadd.f32 %v822_v22, %v219_v5  ;;  %v206_v9 = vmul.f32 %v637_v6, %v769_v19  ;;  %539 = vmatmul.mubr.msk.bf16.vlgmr.msra.gmra.mrb[0].mxu1 %vm49_vm0, %v260_v7 }
 0x150   :  { %414 = vmatprep.mubr.bf16.mxu1 %v638_v40  ;;  %v243_v16 = vadd.f32 %v822_v22, %v224_v13 }
 0x151   :  { %v247_v18 = vpack.c.bf16 %v238_v12, %v237_v11  ;;  %v225_v14 = vmul.f32 %v815_v10, %v206_v9 }
 0x152   :  { %v258_v15 = vld [vmem:[#allocation2 + $0x8] sm:$0xff] }
 0x153   :  { %253 = vst.msk [vmem:[#allocation2 + $0x10] sm:$0xff] %vm49_vm0, %v247_v18  ;;  %v244_v17 = vadd.f32 %v822_v22, %v225_v14  ;;  %537 = vmatmul.mubr.msk.bf16.gmra.mrb[4].mxu0 %vm49_vm0, %v258_v15  ;;  %v274_v22 = vshrl.u32 %v273_v21, 7 }
 0x154   :  { %394 = vmatprep.mubr.bf16.mxu0 %v638_v40 }
 0x155   :  { %v250_v20 = vpack.c.bf16 %v244_v17, %v243_v16  ;;  %v275_v24 = vsub.s32 0, %v274_v22  ;;  %v279_v23 = vsub.s32 1, %v274_v22 }
 0x156   :  { %v261_v19 = vld [vmem:[#allocation2 + $0x20] sm:$0xff] }
 0x157   :  { %256 = vst.msk [vmem:[#allocation2 + $0x28] sm:$0xff] %vm49_vm0, %v250_v20  ;;  %540 = vmatmul.mubr.msk.bf16.gmra.mrb[4].mxu1 %vm49_vm0, %v261_v19  ;;  %v876_v26 = vrot.slane %v271_v25, %v275_v24  ;;  %v878_v27 = vrot.slane %v271_v25, %v279_v23 }
 0x158   :  { %424 = vmatprep.mubr.bf16.mxu1 %v638_v40 }
 0x15a   :  { %v259_v10 = vld [vmem:[#allocation2 + $0x10] sm:$0xff] }
 0x15b   :  { %538 = vmatmul.mubr.msk.bf16.gmra.mrb[8].mxu0 %vm49_vm0, %v259_v10 }
 0x15e   :  { %v262_v34 = vld [vmem:[#allocation2 + $0x28] sm:$0xff] }
 0x15f   :  { %541 = vmatmul.mubr.msk.bf16.gmra.mrb[8].mxu1 %vm49_vm0, %v262_v34 }
 0x21e   :  { %v376_v28 = vpop.f32.mrb[0].mxu0 }
 0x21f   :  { %v377_v40 = vadd.f32 %v376_v28, %v876_v26  ;;  %v378_v29 = vpop.f32.mrb[1].mxu0 }
 0x220   :  { %v379_v30 = vadd.f32 %v378_v29, %v878_v27  ;;  %v380_v42 = vpop.f32.mrb[2].mxu0 }
 0x221   :  { %v381_v32 = vadd.f32 %v380_v42, %v876_v26  ;;  %v382_v33 = vpop.f32.mrb[3].mxu0 }
 0x222   :  { %v554_v36 = vpack.c.bf16 %v379_v30, %v377_v40  ;;  %v383_v35 = vadd.f32 %v382_v33, %v878_v27  ;;  %v406_v37 = vpop.f32.mrb[0].mxu1 }
 0x223   :  { %v407_v38 = vadd.f32 %v406_v37, %v876_v26  ;;  %v408_v39 = vpop.f32.mrb[1].mxu1 }
 0x224   :  { %510 = vst.msk [vmem:[%s973_s5] sm:$0xff] %vm882_vm3, %v554_v36  ;;  %v555_v41 = vpack.c.bf16 %v383_v35, %v381_v32  ;;  %v409_v44 = vadd.f32 %v408_v39, %v878_v27  ;;  %v410_v45 = vpop.f32.mrb[2].mxu1 }
 0x225   :  { %v411_v46 = vadd.f32 %v410_v45, %v876_v26  ;;  %v412_v47 = vpop.f32.mrb[3].mxu1 }
 0x226   :  { %511 = vst.msk [vmem:[%s973_s5 + $0x8] sm:$0xff] %vm882_vm3, %v555_v41  ;;  %v560_v43 = vpack.c.bf16 %v409_v44, %v407_v38  ;;  %v413_v48 = vadd.f32 %v412_v47, %v878_v27  ;;  %v386_v52 = vpop.f32.mrb[4].mxu0 }
 0x227   :  { %v387_v49 = vadd.f32 %v386_v52, %v876_v26  ;;  %v388_v50 = vpop.f32.mrb[5].mxu0 }
 0x228   :  { %516 = vst.msk [vmem:[%s973_s5 + $0x30] sm:$0xff] %vm882_vm3, %v560_v43  ;;  %v561_v51 = vpack.c.bf16 %v413_v48, %v411_v46  ;;  %v389_v54 = vadd.f32 %v388_v50, %v878_v27  ;;  %v390_v55 = vpop.f32.mrb[6].mxu0 }
 0x229   :  { %v391_v56 = vadd.f32 %v390_v55, %v876_v26  ;;  %v392_v57 = vpop.f32.mrb[7].mxu0 }
 0x22a   :  { %517 = vst.msk [vmem:[%s973_s5 + $0x38] sm:$0xff] %vm882_vm3, %v561_v51  ;;  %v556_v58 = vpack.c.bf16 %v389_v54, %v387_v49  ;;  %v393_v53 = vadd.f32 %v392_v57, %v878_v27  ;;  %v416_v59 = vpop.f32.mrb[4].mxu1 }
 0x22b   :  { %v417_v62 = vadd.f32 %v416_v59, %v876_v26  ;;  %v418_v60 = vpop.f32.mrb[5].mxu1 }
 0x22c   :  { %512 = vst.msk [vmem:[%s973_s5 + $0x10] sm:$0xff] %vm882_vm3, %v556_v58  ;;  %v557_v61 = vpack.c.bf16 %v393_v53, %v391_v56  ;;  %v419_v0 = vadd.f32 %v418_v60, %v878_v27  ;;  %v420_v1 = vpop.f32.mrb[6].mxu1 }
 0x22d   :  { %v421_v2 = vadd.f32 %v420_v1, %v876_v26  ;;  %v422_v3 = vpop.f32.mrb[7].mxu1 }
 0x22e   :  { %513 = vst.msk [vmem:[%s973_s5 + $0x18] sm:$0xff] %vm882_vm3, %v557_v61  ;;  %v562_v4 = vpack.c.bf16 %v419_v0, %v417_v62  ;;  %v423_v63 = vadd.f32 %v422_v3, %v878_v27  ;;  %v396_v8 = vpop.f32.mrb[8].mxu0 }
 0x22f   :  { %v397_v5 = vadd.f32 %v396_v8, %v876_v26  ;;  %v398_v6 = vpop.f32.mrb[9].mxu0 }
 0x230   :  { %518 = vst.msk [vmem:[%s973_s5 + $0x40] sm:$0xff] %vm882_vm3, %v562_v4  ;;  %v563_v7 = vpack.c.bf16 %v423_v63, %v421_v2  ;;  %v399_v11 = vadd.f32 %v398_v6, %v878_v27  ;;  %v400_v12 = vpop.f32.mrb[10].mxu0 }
 0x231   :  { %v401_v13 = vadd.f32 %v400_v12, %v876_v26  ;;  %v402_v9 = vpop.f32.mrb[11].mxu0 }
 0x232   :  { %519 = vst.msk [vmem:[%s973_s5 + $0x48] sm:$0xff] %vm882_vm3, %v563_v7  ;;  %v558_v18 = vpack.c.bf16 %v399_v11, %v397_v5  ;;  %v403_v14 = vadd.f32 %v402_v9, %v878_v27  ;;  %v426_v15 = vpop.f32.mrb[8].mxu1 }
 0x233   :  { %v427_v16 = vadd.f32 %v426_v15, %v876_v26  ;;  %v428_v17 = vpop.f32.mrb[9].mxu1 }
 0x234   :  { %514 = vst.msk [vmem:[%s973_s5 + $0x20] sm:$0xff] %vm882_vm3, %v558_v18  ;;  %v559_v20 = vpack.c.bf16 %v403_v14, %v401_v13  ;;  %v429_v19 = vadd.f32 %v428_v17, %v878_v27  ;;  %v430_v10 = vpop.f32.mrb[10].mxu1 }
 0x235   :  { %v431_v34 = vadd.f32 %v430_v10, %v876_v26  ;;  %v432_v21 = vpop.f32.mrb[11].mxu1 }
 0x236   :  { %515 = vst.msk [vmem:[%s973_s5 + $0x28] sm:$0xff] %vm882_vm3, %v559_v20  ;;  %v564_v22 = vpack.c.bf16 %v429_v19, %v427_v16  ;;  %v433_v24 = vadd.f32 %v432_v21, %v878_v27 }
 0x238   :  { %520 = vst.msk [vmem:[%s973_s5 + $0x50] sm:$0xff] %vm882_vm3, %v564_v22  ;;  %v565_v25 = vpack.c.bf16 %v433_v24, %v431_v34 }
 0x23a   :  { %521 = vst.msk [vmem:[%s973_s5 + $0x58] sm:$0xff] %vm882_vm3, %v565_v25 }

// kernel: _lambda_.35
= control target key start
LH: loop header
LB: loop body
LE: loop exit
PB: predicated region body
PF: predicated region fallthrough
CT: control target
= control target key end

     0   :  { %vm390_vm0 = vcmask 519168   ;;  %s783_s1 = inlined_call_operand.vmem [shape: bf16[256,64], index: 1, kind: input, shape index: {}]   ;;  %s784_s0 = inlined_call_operand.vmem [shape: bf16[96,256], index: 0, kind: input, shape index: {}]   ;;  %s785_s3 = inlined_call_operand.vmem [shape: bf16[96,64], index: 3, kind: input, shape index: {}]   ;;  %s786_s2 = inlined_call_operand.vmem [shape: f32[1,64], index: 2, kind: input, shape index: {}]   ;;  %s787_s4 = inlined_call_operand.vmem [shape: bf16[96,64], index: 4, kind: output, shape index: {}]  }
   0x1   :  { %v557_v0 = vld [vmem:[%s783_s1 + $0x40] sm:$0xff]   ;;  %v559_v2 = vld [vmem:[%s783_s1 + $0x48] sm:$0xff]   ;;  %v561_v4 = vld [vmem:[%s783_s1 + $0x50] sm:$0xff]  }
   0x2   :  { %v558_v1 = vld [vmem:[%s783_s1] sm:$0xff]   ;;  %489 = vmatprep.subr.bf16.mxu0 %v557_v0  ;;  %541 = vmatprep.subr.bf16.mxu1 %v557_v0  ;;  %v560_v3 = vld [vmem:[%s783_s1 + $0x8] sm:$0xff]   ;;  %v562_v5 = vld [vmem:[%s783_s1 + $0x10] sm:$0xff]  }
   0x3   :  { %490 = vmatpush3.bf16.msra.mxu0 %v558_v1  ;;  %549 = vmatpush3.bf16.msra.mxu1 %v558_v1  ;;  %v563_v6 = vld [vmem:[%s783_s1 + $0x58] sm:$0xff]   ;;  %v565_v8 = vld [vmem:[%s783_s1 + $0x60] sm:$0xff]   ;;  %v567_v10 = vld [vmem:[%s783_s1 + $0x68] sm:$0xff]  }
   0x4   :  { %491 = vmatprep.subr.bf16.mxu0 %v559_v2  ;;  %542 = vmatprep.subr.bf16.mxu1 %v559_v2  ;;  %v564_v7 = vld [vmem:[%s783_s1 + $0x18] sm:$0xff]   ;;  %v566_v9 = vld [vmem:[%s783_s1 + $0x20] sm:$0xff]   ;;  %v568_v13 = vld [vmem:[%s783_s1 + $0x28] sm:$0xff]  }
   0x5   :  { %v575_v11 = vld [vmem:[%s784_s0 + $0x4] ss:$8 sps:$4 sm:$0xff]   ;;  %v578_v12 = vld [vmem:[%s784_s0 + $0x34] ss:$8 sps:$4 sm:$0xff]   ;;  %v573_v18 = vld [vmem:[%s784_s0] ss:$8 sps:$4 sm:$0xff]  }
   0x6   :  { %v569_v14 = vld [vmem:[%s783_s1 + $0x70] sm:$0xff]   ;;  %257 = vmatprep.mubr.bf16.mxu0 %v575_v11  ;;  %281 = vmatprep.mubr.bf16.mxu1 %v578_v12  ;;  %v571_v16 = vld [vmem:[%s783_s1 + $0x78] sm:$0xff]   ;;  %v581_v21 = vld [vmem:[%s784_s0 + $0x44] ss:$8 sps:$4 sm:$0xff]  }
   0x7   :  { %492 = vmatpush3.bf16.msra.mxu0 %v560_v3  ;;  %550 = vmatpush3.bf16.msra.mxu1 %v560_v3  ;;  %v570_v15 = vld [vmem:[%s783_s1 + $0x30] sm:$0xff]   ;;  %v572_v17 = vld [vmem:[%s783_s1 + $0x38] sm:$0xff]   ;;  %v584_v23 = vld [vmem:[%s784_s0 + $0x40] ss:$8 sps:$4 sm:$0xff]  }
   0x8   :  { %493 = vmatprep.subr.bf16.mxu0 %v561_v4  ;;  %543 = vmatprep.subr.bf16.mxu1 %v561_v4  ;;  %v576_v19 = vld [vmem:[%s784_s0 + $0x30] ss:$8 sps:$4 sm:$0xff]   ;;  %v579_v20 = vld [vmem:[%s784_s0 + $0x14] ss:$8 sps:$4 sm:$0xff]   ;;  %v585_v24 = vld [vmem:[%s784_s0 + $0x24] ss:$8 sps:$4 sm:$0xff]  }
   0x9   :  { %v583_v22 = vld [vmem:[%s784_s0 + $0x10] ss:$8 sps:$4 sm:$0xff]   ;;  %v587_v25 = vld [vmem:[%s784_s0 + $0x54] ss:$8 sps:$4 sm:$0xff]   ;;  %v589_v26 = vld [vmem:[%s784_s0 + $0x20] ss:$8 sps:$4 sm:$0xff]  }
   0xa   :  { %v590_v27 = vld [vmem:[%s784_s0 + $0x50] ss:$8 sps:$4 sm:$0xff]   ;;  %v461_v28 = vld [vmem:[%s785_s3] sm:$0xff]   ;;  %v484_v53 = vld [vmem:[%s785_s3 + $0x8] sm:$0xff]  }
   0xb   :  { %494 = vmatpush3.bf16.msra.mxu0 %v562_v5  ;;  %551 = vmatpush3.bf16.msra.mxu1 %v562_v5  ;;  %v486_v29 = vld [vmem:[%s785_s3 + $0x18] sm:$0xff]   ;;  %v709_v32 = vld [vmem:[%s786_s2] ss:$0 sm:$0xff]  ;;  %v462_v36 = vunpack.c.l.bf16 %v461_v28  ;;  %v463_v42 = vunpack.c.h.bf16 %v461_v28  ;;  %v466_v62 = vunpack.c.l.bf16 %v484_v53 }
   0xc   :  { %495 = vmatprep.subr.bf16.mxu0 %v563_v6  ;;  %544 = vmatprep.subr.bf16.mxu1 %v563_v6  ;;  %v474_v38 = vunpack.c.l.bf16 %v486_v29  ;;  %v475_v44 = vunpack.c.h.bf16 %v486_v29  ;;  %v487_v54 = vld [vmem:[%s785_s3 + $0x20] sm:$0xff]  }
   0xd   :  { %v478_v0 = vunpack.c.l.bf16 %v487_v54 }
   0xf   :  { %496 = vmatpush3.bf16.msra.mxu0 %v564_v7  ;;  %552 = vmatpush3.bf16.msra.mxu1 %v564_v7 }
  0x10   :  { %497 = vmatprep.subr.bf16.mxu0 %v565_v8  ;;  %545 = vmatprep.subr.bf16.mxu1 %v565_v8  ;;  %v467_v8 = vunpack.c.h.bf16 %v484_v53 }
  0x13   :  { %498 = vmatpush3.bf16.msra.mxu0 %v566_v9  ;;  %553 = vmatpush3.bf16.msra.mxu1 %v566_v9 }
  0x14   :  { %499 = vmatprep.subr.bf16.mxu0 %v567_v10  ;;  %546 = vmatprep.subr.bf16.mxu1 %v567_v10  ;;  %v479_v10 = vunpack.c.h.bf16 %v487_v54 }
  0x17   :  { %500 = vmatpush3.bf16.msra.mxu0 %v568_v13  ;;  %554 = vmatpush3.bf16.msra.mxu1 %v568_v13 }
  0x18   :  { %501 = vmatprep.subr.bf16.mxu0 %v569_v14  ;;  %547 = vmatprep.subr.bf16.mxu1 %v569_v14 }
  0x1b   :  { %502 = vmatpush3.bf16.msra.mxu0 %v570_v15  ;;  %555 = vmatpush3.bf16.msra.mxu1 %v570_v15 }
  0x1c   :  { %503 = vmatprep.subr.bf16.mxu0 %v571_v16  ;;  %548 = vmatprep.subr.bf16.mxu1 %v571_v16 }
  0x1f   :  { %504 = vmatpush3.bf16.msra.mxu0 %v572_v17  ;;  %556 = vmatpush3.bf16.msra.mxu1 %v572_v17 }
  0x22   :  { %258 = vmatmul.mubr.bf16.vlgmr.msra.gmra.mrb[0].mxu0 %v573_v18  ;;  %282 = vmatmul.mubr.bf16.vlgmr.msra.gmra.mrb[0].mxu1 %v576_v19  ;;  %v485_v19 = vld [vmem:[%s785_s3 + $0x10] sm:$0xff]  }
  0x23   :  { %265 = vmatprep.mubr.bf16.mxu0 %v579_v20  ;;  %289 = vmatprep.mubr.bf16.mxu1 %v581_v21  ;;  %v488_v20 = vld [vmem:[%s785_s3 + $0x28] sm:$0xff]   ;;  %v470_v28 = vunpack.c.l.bf16 %v485_v19 }
  0x2a   :  { %266 = vmatmul.mubr.bf16.gmra.mrb[4].mxu0 %v583_v22  ;;  %290 = vmatmul.mubr.bf16.gmra.mrb[4].mxu1 %v584_v23 }
  0x2b   :  { %273 = vmatprep.mubr.bf16.mxu0 %v585_v24  ;;  %297 = vmatprep.mubr.bf16.mxu1 %v587_v25 }
  0x32   :  { %274 = vmatmul.mubr.bf16.gmra.mrb[8].mxu0 %v589_v26  ;;  %298 = vmatmul.mubr.bf16.gmra.mrb[8].mxu1 %v590_v27 }
  0xf5   :  { %v505_v30 = vpop.f32.mrb[0].mxu0  ;;  %v523_v31 = vpop.f32.mrb[0].mxu1 }
  0xf6   :  { %v506_v33 = vpop.f32.mrb[1].mxu0  ;;  %v524_v34 = vpop.f32.mrb[1].mxu1 }
  0xf7   :  { %v507_v35 = vadd.f32 %v506_v33, %v505_v30  ;;  %v525_v37 = vadd.f32 %v524_v34, %v523_v31  ;;  %v508_v39 = vpop.f32.mrb[2].mxu0  ;;  %v526_v40 = vpop.f32.mrb[2].mxu1  ;;  %v482_v30 = vunpack.c.l.bf16 %v488_v20 }
  0xf8   :  { %v509_v41 = vpop.f32.mrb[3].mxu0  ;;  %v527_v43 = vpop.f32.mrb[3].mxu1 }
  0xf9   :  { %v260_v45 = vadd.f32 %v507_v35, %v709_v32  ;;  %v284_v46 = vadd.f32 %v525_v37, %v709_v32  ;;  %v510_v47 = vadd.f32 %v509_v41, %v508_v39  ;;  %v528_v48 = vadd.f32 %v527_v43, %v526_v40 }
  0xfa   :  { %v471_v39 = vunpack.c.h.bf16 %v485_v19  ;;  %v483_v41 = vunpack.c.h.bf16 %v488_v20 }
  0xfb   :  { %v330_v49 = vadd.f32 %v462_v36, %v260_v45  ;;  %v336_v50 = vadd.f32 %v474_v38, %v284_v46  ;;  %v263_v51 = vadd.f32 %v510_v47, %v709_v32  ;;  %v287_v52 = vadd.f32 %v528_v48, %v709_v32 }
  0xfd   :  { %v448_v55 = vpack.c.bf16 %v330_v49, %v330_v49  ;;  %v454_v56 = vpack.c.bf16 %v336_v50, %v336_v50  ;;  %v331_v57 = vadd.f32 %v463_v42, %v263_v51  ;;  %v337_v58 = vadd.f32 %v475_v44, %v287_v52  ;;  %v511_v59 = vpop.f32.mrb[4].mxu0  ;;  %v529_v60 = vpop.f32.mrb[4].mxu1 }
  0xfe   :  { %v512_v61 = vpop.f32.mrb[5].mxu0  ;;  %v530_v63 = vpop.f32.mrb[5].mxu1 }
  0xff   :  { %391 = vst.msk [vmem:[%s787_s4] sm:$0xf] %vm390_vm0, %v448_v55  ;;  %397 = vst.msk [vmem:[%s787_s4 + $0x18] sm:$0xf] %vm390_vm0, %v454_v56  ;;  %v449_v1 = vpack.c.bf16 %v331_v57, %v331_v57  ;;  %v455_v2 = vpack.c.bf16 %v337_v58, %v337_v58  ;;  %v513_v3 = vadd.f32 %v512_v61, %v511_v59  ;;  %v514_v5 = vpop.f32.mrb[6].mxu0  ;;  %v532_v6 = vpop.f32.mrb[6].mxu1 }
 0x100   :  { %v531_v4 = vadd.f32 %v530_v63, %v529_v60  ;;  %v515_v7 = vpop.f32.mrb[7].mxu0  ;;  %v533_v9 = vpop.f32.mrb[7].mxu1 }
 0x101   :  { %392 = vst.msk [vmem:[%s787_s4 + $0x4] sm:$0xf] %vm390_vm0, %v449_v1  ;;  %398 = vst.msk [vmem:[%s787_s4 + $0x1c] sm:$0xf] %vm390_vm0, %v455_v2  ;;  %v268_v11 = vadd.f32 %v513_v3, %v709_v32  ;;  %v516_v13 = vadd.f32 %v515_v7, %v514_v5  ;;  %v534_v14 = vadd.f32 %v533_v9, %v532_v6 }
 0x102   :  { %v292_v12 = vadd.f32 %v531_v4, %v709_v32 }
 0x103   :  { %v332_v15 = vadd.f32 %v466_v62, %v268_v11  ;;  %v271_v17 = vadd.f32 %v516_v13, %v709_v32  ;;  %v295_v18 = vadd.f32 %v534_v14, %v709_v32 }
 0x104   :  { %v338_v16 = vadd.f32 %v478_v0, %v292_v12 }
 0x105   :  { %v450_v21 = vpack.c.bf16 %v332_v15, %v332_v15  ;;  %v333_v23 = vadd.f32 %v467_v8, %v271_v17  ;;  %v339_v24 = vadd.f32 %v479_v10, %v295_v18  ;;  %v517_v25 = vpop.f32.mrb[8].mxu0  ;;  %v535_v26 = vpop.f32.mrb[8].mxu1 }
 0x106   :  { %v456_v22 = vpack.c.bf16 %v338_v16, %v338_v16  ;;  %v518_v27 = vpop.f32.mrb[9].mxu0  ;;  %v536_v29 = vpop.f32.mrb[9].mxu1 }
 0x107   :  { %393 = vst.msk [vmem:[%s787_s4 + $0x8] sm:$0xf] %vm390_vm0, %v450_v21  ;;  %v451_v31 = vpack.c.bf16 %v333_v23, %v333_v23  ;;  %v457_v33 = vpack.c.bf16 %v339_v24, %v339_v24  ;;  %v519_v34 = vadd.f32 %v518_v27, %v517_v25  ;;  %v537_v35 = vadd.f32 %v536_v29, %v535_v26  ;;  %v520_v36 = vpop.f32.mrb[10].mxu0  ;;  %v538_v37 = vpop.f32.mrb[10].mxu1 }
 0x108   :  { %399 = vst.msk [vmem:[%s787_s4 + $0x20] sm:$0xf] %vm390_vm0, %v456_v22  ;;  %v521_v38 = vpop.f32.mrb[11].mxu0  ;;  %v539_v40 = vpop.f32.mrb[11].mxu1 }
 0x109   :  { %394 = vst.msk [vmem:[%s787_s4 + $0xc] sm:$0xf] %vm390_vm0, %v451_v31  ;;  %400 = vst.msk [vmem:[%s787_s4 + $0x24] sm:$0xf] %vm390_vm0, %v457_v33  ;;  %v276_v42 = vadd.f32 %v519_v34, %v709_v32  ;;  %v300_v43 = vadd.f32 %v537_v35, %v709_v32  ;;  %v522_v44 = vadd.f32 %v521_v38, %v520_v36 }
 0x10a   :  { %v540_v45 = vadd.f32 %v539_v40, %v538_v37 }
 0x10b   :  { %v334_v46 = vadd.f32 %v470_v28, %v276_v42  ;;  %v340_v47 = vadd.f32 %v482_v30, %v300_v43  ;;  %v279_v48 = vadd.f32 %v522_v44, %v709_v32 }
 0x10c   :  { %v303_v49 = vadd.f32 %v540_v45, %v709_v32 }
 0x10d   :  { %v452_v50 = vpack.c.bf16 %v334_v46, %v334_v46  ;;  %v458_v51 = vpack.c.bf16 %v340_v47, %v340_v47  ;;  %v335_v52 = vadd.f32 %v471_v39, %v279_v48 }
 0x10e   :  { %v341_v53 = vadd.f32 %v483_v41, %v303_v49 }
 0x10f   :  { %395 = vst.msk [vmem:[%s787_s4 + $0x10] sm:$0xf] %vm390_vm0, %v452_v50  ;;  %401 = vst.msk [vmem:[%s787_s4 + $0x28] sm:$0xf] %vm390_vm0, %v458_v51  ;;  %v453_v54 = vpack.c.bf16 %v335_v52, %v335_v52 }
 0x110   :  { %v459_v55 = vpack.c.bf16 %v341_v53, %v341_v53 }
 0x111   :  { %396 = vst.msk [vmem:[%s787_s4 + $0x14] sm:$0xf] %vm390_vm0, %v453_v54 }
 0x112   :  { %402 = vst.msk [vmem:[%s787_s4 + $0x2c] sm:$0xf] %vm390_vm0, %v459_v55 }

// kernel: _lambda_.34
= control target key start
LH: loop header
LB: loop body
LE: loop exit
PB: predicated region body
PF: predicated region fallthrough
CT: control target
= control target key end

     0   :  { %vm49_vm0 = vcmask 523264   ;;  %s1345_s0 = inlined_call_operand.vmem [shape: bf16[96,64], index: 0, kind: input, shape index: {}]   ;;  %s1346_s3 = inlined_call_operand.vmem [shape: bf16[64,256], index: 3, kind: input, shape index: {}]   ;;  %s1347_s1 = inlined_call_operand.vmem [shape: f32[1,64], index: 1, kind: input, shape index: {}]   ;;  %s1348_s2 = inlined_call_operand.vmem [shape: f32[1,64], index: 2, kind: input, shape index: {}]   ;;  %s1349_s4 = inlined_call_operand.vmem [shape: f32[1,256], index: 4, kind: input, shape index: {}]   ;;  %s1350_s5 = inlined_call_operand.vmem [shape: bf16[96,256], index: 5, kind: output, shape index: {}]  }
   0x1   :  { %v780_v0 = vld [vmem:[%s1345_s0] sm:$0xff]   ;;  %v805_v1 = vld [vmem:[%s1345_s0 + $0x18] sm:$0xff]   ;;  %v803_v6 = vld [vmem:[%s1345_s0 + $0x8] sm:$0xff]  }
   0x2   :  { %v781_v2 = vunpack.c.l.bf16 %v780_v0  ;;  %v793_v3 = vunpack.c.l.bf16 %v805_v1  ;;  %v782_v4 = vunpack.c.h.bf16 %v780_v0  ;;  %v794_v5 = vunpack.c.h.bf16 %v805_v1  ;;  %v994_v13 = vld [vmem:[%s1345_s0 + $0x20] sm:$0xff]   ;;  %v1003_v18 = vld [vmem:[%s1345_s0 + $0x10] sm:$0xff]   ;;  %v1012_v23 = vld [vmem:[%s1345_s0 + $0x28] sm:$0xff]  }
   0x3   :  { %v785_v11 = vunpack.c.l.bf16 %v803_v6  ;;  %v786_v12 = vunpack.c.h.bf16 %v803_v6  ;;  %v797_v16 = vunpack.c.l.bf16 %v994_v13  ;;  %v798_v17 = vunpack.c.h.bf16 %v994_v13 }
   0x4   :  { %v50_v7 = vsel %vm49_vm0, %v781_v2, 0.0  ;;  %v68_v8 = vsel %vm49_vm0, %v793_v3, 0.0  ;;  %v53_v9 = vsel %vm49_vm0, %v782_v4, 0.0  ;;  %v71_v10 = vsel %vm49_vm0, %v794_v5, 0.0 }
   0x5   :  { %51 = vadd.xlane.f32.xlu0 %v50_v7  ;;  %69 = vadd.xlane.f32.xlu1 %v68_v8  ;;  %v56_v14 = vsel %vm49_vm0, %v785_v11, 0.0  ;;  %v59_v15 = vsel %vm49_vm0, %v786_v12, 0.0  ;;  %v74_v19 = vsel %vm49_vm0, %v797_v16, 0.0  ;;  %v77_v20 = vsel %vm49_vm0, %v798_v17, 0.0 }
   0x6   :  { %v789_v21 = vunpack.c.l.bf16 %v1003_v18  ;;  %v790_v22 = vunpack.c.h.bf16 %v1003_v18  ;;  %v801_v26 = vunpack.c.l.bf16 %v1012_v23  ;;  %v802_v27 = vunpack.c.h.bf16 %v1012_v23 }
   0x8   :  { %v62_v24 = vsel %vm49_vm0, %v789_v21, 0.0  ;;  %v65_v25 = vsel %vm49_vm0, %v790_v22, 0.0  ;;  %v80_v28 = vsel %vm49_vm0, %v801_v26, 0.0  ;;  %v83_v29 = vsel %vm49_vm0, %v802_v27, 0.0 }
   0x9   :  { %54 = vadd.xlane.f32.xlu0 %v53_v9  ;;  %72 = vadd.xlane.f32.xlu1 %v71_v10 }
   0xd   :  { %57 = vadd.xlane.f32.xlu0 %v56_v14  ;;  %60 = vadd.xlane.f32.xlu1 %v59_v15 }
  0x11   :  { %75 = vadd.xlane.f32.xlu0 %v74_v19  ;;  %78 = vadd.xlane.f32.xlu1 %v77_v20 }
  0x15   :  { %63 = vadd.xlane.f32.xlu0 %v62_v24  ;;  %66 = vadd.xlane.f32.xlu1 %v65_v25 }
  0x19   :  { %81 = vadd.xlane.f32.xlu0 %v80_v28  ;;  %84 = vadd.xlane.f32.xlu1 %v83_v29  ;;  %v817_v28 = vld [vmem:[%s1346_s3 + $0x4] ss:$8 sps:$4 sm:$0xff]  }
  0x1a   :  { %342 = vmatprep.subr.bf16.mxu0 %v817_v28  ;;  %808 = vmatprep.subr.bf16.mxu1 %v817_v28 }
  0x92   :  { %v52_v30 = vpop.xlane.xlu0 %51  ;;  %v70_v31 = vpop.xlane.xlu1 %69 }
  0x93   :  { %v87_v32 = vmul.f32 0.015625, %v52_v30  ;;  %v93_v33 = vmul.f32 0.015625, %v70_v31  ;;  %v265_v30 = vld [vmem:[%s1346_s3 + $0x10] sm:$0xff]  ;;  %v266_v31 = vld [vmem:[%s1346_s3 + $0x18] sm:$0xff] }
  0x95   :  { %v1024_v34 = vsub.f32 %v781_v2, %v87_v32  ;;  %v1026_v35 = vsub.f32 %v793_v3, %v93_v33  ;;  %v819_v32 = vld [vmem:[%s1346_s3 + $0x14] ss:$8 sps:$4 sm:$0xff]   ;;  %v719_v33 = vcombine.low %v265_v30, %v266_v31 }
  0x96   :  { %v55_v36 = vpop.xlane.xlu0 %54  ;;  %v73_v37 = vpop.xlane.xlu1 %72 }
  0x97   :  { %v88_v38 = vmul.f32 0.015625, %v55_v36  ;;  %v94_v39 = vmul.f32 0.015625, %v73_v37  ;;  %v111_v40 = vmul.f32 %v1024_v34, %v1024_v34  ;;  %v117_v41 = vmul.f32 %v1026_v35, %v1026_v35  ;;  %v821_v36 = vld [vmem:[%s1346_s3 + $0x24] ss:$8 sps:$4 sm:$0xff]   ;;  %v823_v37 = vld [vmem:[%s1346_s3 + $0x20] ss:$8 sps:$4 sm:$0xff]  }
  0x99   :  { %v1032_v42 = vsub.f32 %v782_v4, %v88_v38  ;;  %v1034_v43 = vsub.f32 %v794_v5, %v94_v39  ;;  %v123_v44 = vsel %vm49_vm0, %v111_v40, 0.0  ;;  %v141_v47 = vsel %vm49_vm0, %v117_v41, 0.0  ;;  %v824_v38 = vld [vmem:[%s1346_s3 + $0x34] ss:$8 sps:$4 sm:$0xff]   ;;  %v826_v39 = vld [vmem:[%s1346_s3 + $0x30] ss:$8 sps:$4 sm:$0xff]  }
  0x9a   :  { %124 = vadd.xlane.f32.xlu0 %v123_v44  ;;  %v58_v45 = vpop.xlane.xlu0 %57  ;;  %v61_v46 = vpop.xlane.xlu1 %60  ;;  %v947_v40 = vmov 0  }
  0x9b   :  { %v89_v48 = vmul.f32 0.015625, %v58_v45  ;;  %v90_v49 = vmul.f32 0.015625, %v61_v46  ;;  %v112_v50 = vmul.f32 %v1032_v42, %v1032_v42  ;;  %v118_v51 = vmul.f32 %v1034_v43, %v1034_v43  ;;  %374 = vmatprep.mubr.bf16.mxu0 %v947_v40  ;;  %404 = vmatprep.mubr.bf16.mxu1 %v947_v40 }
  0x9d   :  { %v1042_v52 = vsub.f32 %v785_v11, %v89_v48  ;;  %v1044_v53 = vsub.f32 %v786_v12, %v90_v49  ;;  %v126_v54 = vsel %vm49_vm0, %v112_v50, 0.0  ;;  %v144_v57 = vsel %vm49_vm0, %v118_v51, 0.0 }
  0x9e   :  { %142 = vadd.xlane.f32.xlu0 %v141_v47  ;;  %127 = vadd.xlane.f32.xlu1 %v126_v54  ;;  %v76_v55 = vpop.xlane.xlu0 %75  ;;  %v79_v56 = vpop.xlane.xlu1 %78 }
  0x9f   :  { %v95_v58 = vmul.f32 0.015625, %v76_v55  ;;  %v96_v59 = vmul.f32 0.015625, %v79_v56  ;;  %v113_v60 = vmul.f32 %v1042_v52, %v1042_v52  ;;  %v114_v61 = vmul.f32 %v1044_v53, %v1044_v53 }
  0xa1   :  { %v1052_v62 = vsub.f32 %v797_v16, %v95_v58  ;;  %v1054_v63 = vsub.f32 %v798_v17, %v96_v59  ;;  %v129_v0 = vsel %vm49_vm0, %v113_v60, 0.0  ;;  %v132_v3 = vsel %vm49_vm0, %v114_v61, 0.0 }
  0xa2   :  { %145 = vadd.xlane.f32.xlu1 %v144_v57  ;;  %130 = vadd.xlane.f32.xlu0 %v129_v0  ;;  %v64_v1 = vpop.xlane.xlu0 %63  ;;  %v67_v2 = vpop.xlane.xlu1 %66 }
  0xa3   :  { %v91_v4 = vmul.f32 0.015625, %v64_v1  ;;  %v92_v5 = vmul.f32 0.015625, %v67_v2  ;;  %v119_v6 = vmul.f32 %v1052_v62, %v1052_v62  ;;  %v120_v7 = vmul.f32 %v1054_v63, %v1054_v63 }
  0xa5   :  { %v1062_v8 = vsub.f32 %v789_v21, %v91_v4  ;;  %v1064_v9 = vsub.f32 %v790_v22, %v92_v5  ;;  %v147_v10 = vsel %vm49_vm0, %v119_v6, 0.0  ;;  %v150_v13 = vsel %vm49_vm0, %v120_v7, 0.0 }
  0xa6   :  { %133 = vadd.xlane.f32.xlu1 %v132_v3  ;;  %148 = vadd.xlane.f32.xlu0 %v147_v10  ;;  %v82_v11 = vpop.xlane.xlu0 %81  ;;  %v85_v12 = vpop.xlane.xlu1 %84  ;;  %v1124_v10 = vld [vmem:[%s1347_s1] ss:$0 sm:$0xff] }
  0xa7   :  { %v97_v14 = vmul.f32 0.015625, %v82_v11  ;;  %v98_v15 = vmul.f32 0.015625, %v85_v12  ;;  %v115_v16 = vmul.f32 %v1062_v8, %v1062_v8  ;;  %v116_v17 = vmul.f32 %v1064_v9, %v1064_v9 }
  0xa9   :  { %v1074_v18 = vsub.f32 %v801_v26, %v97_v14  ;;  %v1078_v19 = vsub.f32 %v802_v27, %v98_v15  ;;  %v135_v20 = vsel %vm49_vm0, %v115_v16, 0.0  ;;  %v138_v21 = vsel %vm49_vm0, %v116_v17, 0.0  ;;  %v263_v26 = vld [vmem:[%s1346_s3] sm:$0xff]  ;;  %v264_v27 = vld [vmem:[%s1346_s3 + $0x8] sm:$0xff] }
  0xaa   :  { %151 = vadd.xlane.f32.xlu1 %v150_v13  ;;  %136 = vadd.xlane.f32.xlu0 %v135_v20  ;;  %v717_v29 = vcombine.low %v263_v26, %v264_v27 }
  0xab   :  { %v121_v22 = vmul.f32 %v1074_v18, %v1074_v18  ;;  %v122_v24 = vmul.f32 %v1078_v19, %v1078_v19 }
  0xac   :  { %343 = vmatpush1.bf16.msra.mxu0 %v717_v29  ;;  %812 = vmatpush1.bf16.msra.mxu1 %v717_v29 }
  0xad   :  { %v153_v25 = vsel %vm49_vm0, %v121_v22, 0.0  ;;  %v156_v23 = vsel %vm49_vm0, %v122_v24, 0.0  ;;  %344 = vmatprep.subr.bf16.mxu0 %v819_v32  ;;  %809 = vmatprep.subr.bf16.mxu1 %v819_v32  ;;  %v1131_v22 = vld [vmem:[%s1348_s2] ss:$0 sm:$0xff] }
  0xae   :  { %139 = vadd.xlane.f32.xlu1 %v138_v21  ;;  %154 = vadd.xlane.f32.xlu0 %v153_v25 }
  0xb0   :  { %345 = vmatpush1.bf16.msra.mxu0 %v719_v33  ;;  %813 = vmatpush1.bf16.msra.mxu1 %v719_v33 }
  0xb1   :  { %346 = vmatprep.subr.bf16.mxu0 %v821_v36  ;;  %810 = vmatprep.subr.bf16.mxu1 %v821_v36 }
  0xb2   :  { %157 = vadd.xlane.f32.xlu1 %v156_v23 }
  0xb4   :  { %347 = vmatpush1.bf16.msra.mxu0 %v823_v37  ;;  %814 = vmatpush1.bf16.msra.mxu1 %v823_v37 }
  0xb5   :  { %348 = vmatprep.subr.bf16.mxu0 %v824_v38  ;;  %811 = vmatprep.subr.bf16.mxu1 %v824_v38 }
  0xb8   :  { %349 = vmatpush1.bf16.msra.mxu0 %v826_v39  ;;  %815 = vmatpush1.bf16.msra.mxu1 %v826_v39 }
 0x127   :  { %v125_v41 = vpop.xlane.xlu0 %124 }
 0x128   :  { %v159_v44 = vmul.f32 0.015625, %v125_v41 }
 0x12a   :  { %v171_v45 = vadd.f32 1e-05, %v159_v44 }
 0x12b   :  { %v128_v46 = vpop.xlane.xlu1 %127  ;;  %v143_v47 = vpop.xlane.xlu0 %142 }
 0x12c   :  { %827 = vrsqrt.f32 %v171_v45  ;;  %v160_v48 = vmul.f32 0.015625, %v128_v46  ;;  %v165_v49 = vmul.f32 0.015625, %v143_v47 }
 0x12e   :  { %v172_v50 = vadd.f32 1e-05, %v160_v48  ;;  %v177_v51 = vadd.f32 1e-05, %v165_v49 }
 0x12f   :  { %v146_v54 = vpop.xlane.xlu1 %145  ;;  %v131_v55 = vpop.xlane.xlu0 %130 }
 0x130   :  { %829 = vrsqrt.f32 %v172_v50  ;;  %v166_v56 = vmul.f32 0.015625, %v146_v54  ;;  %v161_v57 = vmul.f32 0.015625, %v131_v55 }
 0x131   :  { %831 = vrsqrt.f32 %v177_v51 }
 0x132   :  { %v178_v58 = vadd.f32 1e-05, %v166_v56  ;;  %v173_v59 = vadd.f32 1e-05, %v161_v57 }
 0x133   :  { %v134_v60 = vpop.xlane.xlu1 %133  ;;  %v149_v61 = vpop.xlane.xlu0 %148 }
 0x134   :  { %833 = vrsqrt.f32 %v178_v58  ;;  %v162_v0 = vmul.f32 0.015625, %v134_v60  ;;  %v167_v1 = vmul.f32 0.015625, %v149_v61 }
 0x135   :  { %835 = vrsqrt.f32 %v173_v59 }
 0x136   :  { %v828_v2 = vpop.eup %827  ;;  %v174_v3 = vadd.f32 1e-05, %v162_v0  ;;  %v179_v4 = vadd.f32 1e-05, %v167_v1 }
 0x137   :  { %v195_v5 = vmul.f32 %v828_v2, %v1024_v34  ;;  %v152_v6 = vpop.xlane.xlu1 %151  ;;  %v137_v7 = vpop.xlane.xlu0 %136 }
 0x138   :  { %837 = vrsqrt.f32 %v174_v3  ;;  %v168_v11 = vmul.f32 0.015625, %v152_v6  ;;  %v163_v12 = vmul.f32 0.015625, %v137_v7 }
 0x139   :  { %839 = vrsqrt.f32 %v179_v4  ;;  %v214_v17 = vmul.f32 %v1124_v10, %v195_v5 }
 0x13a   :  { %v830_v13 = vpop.eup %829  ;;  %v180_v14 = vadd.f32 1e-05, %v168_v11  ;;  %v175_v15 = vadd.f32 1e-05, %v163_v12 }
 0x13b   :  { %v832_v16 = vpop.eup %831  ;;  %v196_v20 = vmul.f32 %v830_v13, %v1032_v42  ;;  %v140_v34 = vpop.xlane.xlu1 %139  ;;  %v233_v42 = vadd.f32 %v1131_v22, %v214_v17 }
 0x13c   :  { %v155_v21 = vpop.xlane.xlu0 %154  ;;  %v201_v24 = vmul.f32 %v832_v16, %v1026_v35  ;;  %841 = vrsqrt.f32 %v180_v14  ;;  %v164_v25 = vmul.f32 0.015625, %v140_v34 }
 0x13d   :  { %v169_v23 = vmul.f32 0.015625, %v155_v21  ;;  %v215_v26 = vmul.f32 %v1124_v10, %v196_v20  ;;  %843 = vrsqrt.f32 %v175_v15  ;;  %v273_v21 = vlaneseq }
 0x13e   :  { %v834_v27 = vpop.eup %833  ;;  %v176_v28 = vadd.f32 1e-05, %v164_v25  ;;  %v220_v32 = vmul.f32 %v1124_v10, %v201_v24  ;;  %v271_v25 = vld [vmem:[%s1349_s4] sm:$0x3] }
 0x13f   :  { %v181_v29 = vadd.f32 1e-05, %v169_v23  ;;  %v836_v30 = vpop.eup %835  ;;  %v234_v31 = vadd.f32 %v1131_v22, %v215_v26  ;;  %v202_v33 = vmul.f32 %v834_v27, %v1034_v43  ;;  %v158_v36 = vpop.xlane.xlu1 %157 }
 0x140   :  { %v197_v35 = vmul.f32 %v836_v30, %v1042_v52  ;;  %845 = vrsqrt.f32 %v176_v28  ;;  %v170_v37 = vmul.f32 0.015625, %v158_v36  ;;  %v239_v46 = vadd.f32 %v1131_v22, %v220_v32 }
 0x141   :  { %v245_v38 = vpack.c.bf16 %v234_v31, %v233_v42  ;;  %v221_v39 = vmul.f32 %v1124_v10, %v202_v33  ;;  %847 = vrsqrt.f32 %v181_v29 }
 0x142   :  { %v838_v41 = vpop.eup %837  ;;  %v182_v44 = vadd.f32 1e-05, %v170_v37  ;;  %v216_v43 = vmul.f32 %v1124_v10, %v197_v35 }
 0x143   :  { %v840_v45 = vpop.eup %839  ;;  %251 = vst.msk [vmem:[#allocation2] sm:$0xff] %vm49_vm0, %v245_v38  ;;  %v240_v47 = vadd.f32 %v1131_v22, %v221_v39  ;;  %v198_v48 = vmul.f32 %v838_v41, %v1044_v53 }
 0x144   :  { %v203_v52 = vmul.f32 %v840_v45, %v1052_v62  ;;  %849 = vrsqrt.f32 %v182_v44  ;;  %v235_v55 = vadd.f32 %v1131_v22, %v216_v43 }
 0x145   :  { %v248_v49 = vpack.c.bf16 %v240_v47, %v239_v46  ;;  %v217_v50 = vmul.f32 %v1124_v10, %v198_v48 }
 0x146   :  { %v842_v51 = vpop.eup %841  ;;  %v222_v57 = vmul.f32 %v1124_v10, %v203_v52 }
 0x147   :  { %v844_v54 = vpop.eup %843  ;;  %254 = vst.msk [vmem:[#allocation2 + $0x18] sm:$0xff] %vm49_vm0, %v248_v49  ;;  %v236_v56 = vadd.f32 %v1131_v22, %v217_v50  ;;  %v204_v58 = vmul.f32 %v842_v51, %v1054_v63 }
 0x148   :  { %v199_v53 = vmul.f32 %v844_v54, %v1062_v8  ;;  %v241_v1 = vadd.f32 %v1131_v22, %v222_v57 }
 0x149   :  { %v246_v59 = vpack.c.bf16 %v236_v56, %v235_v55  ;;  %v223_v62 = vmul.f32 %v1124_v10, %v204_v58 }
 0x14a   :  { %v846_v60 = vpop.eup %845  ;;  %v257_v61 = vld [vmem:[#allocation2] sm:$0xff]  ;;  %v218_v3 = vmul.f32 %v1124_v10, %v199_v53 }
 0x14b   :  { %v848_v0 = vpop.eup %847  ;;  %252 = vst.msk [vmem:[#allocation2 + $0x8] sm:$0xff] %vm49_vm0, %v246_v59  ;;  %v242_v2 = vadd.f32 %v1131_v22, %v223_v62  ;;  %v200_v4 = vmul.f32 %v846_v60, %v1064_v9  ;;  %725 = vmatmul.mubr.msk.bf16.vlgmr.msra.gmra.mrb[0].mxu0 %vm49_vm0, %v257_v61 }
 0x14c   :  { %v205_v63 = vmul.f32 %v848_v0, %v1074_v18  ;;  %384 = vmatprep.mubr.bf16.mxu0 %v947_v40  ;;  %v237_v11 = vadd.f32 %v1131_v22, %v218_v3 }
 0x14d   :  { %v249_v8 = vpack.c.bf16 %v242_v2, %v241_v1  ;;  %v219_v5 = vmul.f32 %v1124_v10, %v200_v4 }
 0x14e   :  { %v850_v6 = vpop.eup %849  ;;  %v260_v7 = vld [vmem:[#allocation2 + $0x18] sm:$0xff]  ;;  %v224_v13 = vmul.f32 %v1124_v10, %v205_v63 }
 0x14f   :  { %255 = vst.msk [vmem:[#allocation2 + $0x20] sm:$0xff] %vm49_vm0, %v249_v8  ;;  %v238_v12 = vadd.f32 %v1131_v22, %v219_v5  ;;  %v206_v9 = vmul.f32 %v850_v6, %v1078_v19  ;;  %728 = vmatmul.mubr.msk.bf16.vlgmr.msra.gmra.mrb[0].mxu1 %vm49_vm0, %v260_v7 }
 0x150   :  { %414 = vmatprep.mubr.bf16.mxu1 %v947_v40  ;;  %v243_v16 = vadd.f32 %v1131_v22, %v224_v13 }
 0x151   :  { %v247_v18 = vpack.c.bf16 %v238_v12, %v237_v11  ;;  %v225_v14 = vmul.f32 %v1124_v10, %v206_v9 }
 0x152   :  { %v258_v15 = vld [vmem:[#allocation2 + $0x8] sm:$0xff] }
 0x153   :  { %253 = vst.msk [vmem:[#allocation2 + $0x10] sm:$0xff] %vm49_vm0, %v247_v18  ;;  %v244_v17 = vadd.f32 %v1131_v22, %v225_v14  ;;  %726 = vmatmul.mubr.msk.bf16.gmra.mrb[4].mxu0 %vm49_vm0, %v258_v15  ;;  %v274_v22 = vshrl.u32 %v273_v21, 7 }
 0x154   :  { %394 = vmatprep.mubr.bf16.mxu0 %v947_v40 }
 0x155   :  { %v250_v20 = vpack.c.bf16 %v244_v17, %v243_v16  ;;  %v275_v24 = vsub.s32 0, %v274_v22  ;;  %v279_v23 = vsub.s32 1, %v274_v22 }
 0x156   :  { %v261_v19 = vld [vmem:[#allocation2 + $0x20] sm:$0xff] }
 0x157   :  { %256 = vst.msk [vmem:[#allocation2 + $0x28] sm:$0xff] %vm49_vm0, %v250_v20  ;;  %729 = vmatmul.mubr.msk.bf16.gmra.mrb[4].mxu1 %vm49_vm0, %v261_v19  ;;  %v1185_v26 = vrot.slane %v271_v25, %v275_v24  ;;  %v1187_v27 = vrot.slane %v271_v25, %v279_v23 }
 0x158   :  { %424 = vmatprep.mubr.bf16.mxu1 %v947_v40 }
 0x15a   :  { %v259_v10 = vld [vmem:[#allocation2 + $0x10] sm:$0xff] }
 0x15b   :  { %727 = vmatmul.mubr.msk.bf16.gmra.mrb[8].mxu0 %vm49_vm0, %v259_v10 }
 0x15e   :  { %v262_v34 = vld [vmem:[#allocation2 + $0x28] sm:$0xff] }
 0x15f   :  { %730 = vmatmul.mubr.msk.bf16.gmra.mrb[8].mxu1 %vm49_vm0, %v262_v34 }
 0x21e   :  { %v376_v28 = vpop.f32.mrb[0].mxu0 }
 0x21f   :  { %v1190_v40 = vadd.f32 %v376_v28, %v1185_v26  ;;  %v378_v29 = vpop.f32.mrb[1].mxu0 }
 0x220   :  { %v1193_v30 = vadd.f32 %v378_v29, %v1187_v27  ;;  %v380_v42 = vpop.f32.mrb[2].mxu0 }
 0x221   :  { %v731_v31 = vmul.f32 -1.702, %v1190_v40  ;;  %v1197_v32 = vadd.f32 %v380_v42, %v1185_v26  ;;  %v382_v33 = vpop.f32.mrb[3].mxu0 }
 0x222   :  { %v732_v36 = vmul.f32 -1.702, %v1193_v30  ;;  %v1201_v35 = vadd.f32 %v382_v33, %v1187_v27  ;;  %v406_v37 = vpop.f32.mrb[0].mxu1 }
 0x223   :  { %v483_v38 = vmul.f32 1.442695, %v731_v31  ;;  %v733_v39 = vmul.f32 -1.702, %v1197_v32  ;;  %v1205_v41 = vadd.f32 %v406_v37, %v1185_v26  ;;  %v408_v44 = vpop.f32.mrb[1].mxu1 }
 0x224   :  { %v485_v45 = vmul.f32 1.442695, %v732_v36  ;;  %v734_v46 = vmul.f32 -1.702, %v1201_v35  ;;  %v1209_v47 = vadd.f32 %v408_v44, %v1187_v27  ;;  %v410_v43 = vpop.f32.mrb[2].mxu1 }
 0x225   :  { %851 = vpow2.f32 %v483_v38  ;;  %v487_v48 = vmul.f32 1.442695, %v733_v39  ;;  %v743_v52 = vmul.f32 -1.702, %v1205_v41  ;;  %v1213_v49 = vadd.f32 %v410_v43, %v1185_v26  ;;  %v412_v50 = vpop.f32.mrb[3].mxu1 }
 0x226   :  { %853 = vpow2.f32 %v485_v45  ;;  %v489_v51 = vmul.f32 1.442695, %v734_v46  ;;  %v744_v54 = vmul.f32 -1.702, %v1209_v47  ;;  %v1217_v55 = vadd.f32 %v412_v50, %v1187_v27  ;;  %v386_v56 = vpop.f32.mrb[4].mxu0 }
 0x227   :  { %855 = vpow2.f32 %v487_v48  ;;  %v507_v57 = vmul.f32 1.442695, %v743_v52  ;;  %v745_v58 = vmul.f32 -1.702, %v1213_v49  ;;  %v1221_v53 = vadd.f32 %v386_v56, %v1185_v26  ;;  %v388_v59 = vpop.f32.mrb[5].mxu0 }
 0x228   :  { %857 = vpow2.f32 %v489_v51  ;;  %v509_v62 = vmul.f32 1.442695, %v744_v54  ;;  %v746_v60 = vmul.f32 -1.702, %v1217_v55  ;;  %v1225_v61 = vadd.f32 %v388_v59, %v1187_v27  ;;  %v390_v0 = vpop.f32.mrb[6].mxu0 }
 0x229   :  { %859 = vpow2.f32 %v507_v57  ;;  %v511_v1 = vmul.f32 1.442695, %v745_v58  ;;  %v735_v2 = vmul.f32 -1.702, %v1221_v53  ;;  %v1229_v3 = vadd.f32 %v390_v0, %v1185_v26  ;;  %v392_v4 = vpop.f32.mrb[7].mxu0 }
 0x22a   :  { %861 = vpow2.f32 %v509_v62  ;;  %v513_v63 = vmul.f32 1.442695, %v746_v60  ;;  %v736_v8 = vmul.f32 -1.702, %v1225_v61  ;;  %v1233_v5 = vadd.f32 %v392_v4, %v1187_v27  ;;  %v416_v6 = vpop.f32.mrb[4].mxu1 }
 0x22b   :  { %863 = vpow2.f32 %v511_v1  ;;  %v491_v7 = vmul.f32 1.442695, %v735_v2  ;;  %v737_v11 = vmul.f32 -1.702, %v1229_v3  ;;  %v1237_v12 = vadd.f32 %v416_v6, %v1185_v26  ;;  %v418_v13 = vpop.f32.mrb[5].mxu1 }
 0x22c   :  { %865 = vpow2.f32 %v513_v63  ;;  %v493_v9 = vmul.f32 1.442695, %v736_v8  ;;  %v738_v18 = vmul.f32 -1.702, %v1233_v5  ;;  %v420_v14 = vpop.f32.mrb[6].mxu1  ;;  %v1242_v21 = vadd.f32 %v418_v13, %v1187_v27 }
 0x22d   :  { %867 = vpow2.f32 %v491_v7  ;;  %v495_v15 = vmul.f32 1.442695, %v737_v11  ;;  %v747_v16 = vmul.f32 -1.702, %v1237_v12  ;;  %v422_v17 = vpop.f32.mrb[7].mxu1  ;;  %v1245_v23 = vadd.f32 %v420_v14, %v1185_v26 }
 0x22e   :  { %869 = vpow2.f32 %v493_v9  ;;  %v497_v20 = vmul.f32 1.442695, %v738_v18  ;;  %v396_v19 = vpop.f32.mrb[8].mxu0  ;;  %v1248_v31 = vadd.f32 %v422_v17, %v1187_v27  ;;  %v748_v45 = vmul.f32 -1.702, %v1242_v21 }
 0x22f   :  { %v852_v10 = vpop.eup %851  ;;  %871 = vpow2.f32 %v495_v15  ;;  %v515_v34 = vmul.f32 1.442695, %v747_v16  ;;  %v398_v22 = vpop.f32.mrb[9].mxu0  ;;  %v749_v52 = vmul.f32 -1.702, %v1245_v23  ;;  %v1253_v50 = vadd.f32 %v396_v19, %v1185_v26 }
 0x230   :  { %v854_v24 = vpop.eup %853  ;;  %v531_v25 = vadd.f32 1.0, %v852_v10  ;;  %873 = vpow2.f32 %v497_v20  ;;  %v400_v28 = vpop.f32.mrb[10].mxu0  ;;  %v750_v57 = vmul.f32 -1.702, %v1248_v31  ;;  %v1257_v60 = vadd.f32 %v398_v22, %v1187_v27 }
 0x231   :  { %v856_v29 = vpop.eup %855  ;;  %v532_v42 = vadd.f32 1.0, %v854_v24  ;;  %875 = vpow2.f32 %v515_v34  ;;  %v402_v33 = vpop.f32.mrb[11].mxu0  ;;  %v517_v2 = vmul.f32 1.442695, %v748_v45  ;;  %v1260_v4 = vadd.f32 %v400_v28, %v1185_v26 }
 0x232   :  { %v858_v36 = vpop.eup %857  ;;  %877 = vrcp.f32 %v531_v25  ;;  %v533_v37 = vadd.f32 1.0, %v856_v29  ;;  %v426_v38 = vpop.f32.mrb[8].mxu1  ;;  %v519_v6 = vmul.f32 1.442695, %v749_v52  ;;  %v739_v7 = vmul.f32 -1.702, %v1253_v50 }
 0x233   :  { %v860_v39 = vpop.eup %859  ;;  %879 = vrcp.f32 %v532_v42  ;;  %v534_v44 = vadd.f32 1.0, %v858_v36  ;;  %v428_v46 = vpop.f32.mrb[9].mxu1  ;;  %v521_v9 = vmul.f32 1.442695, %v750_v57  ;;  %v1264_v18 = vadd.f32 %v402_v33, %v1187_v27 }
 0x234   :  { %v862_v43 = vpop.eup %861  ;;  %881 = vrcp.f32 %v533_v37  ;;  %v543_v48 = vadd.f32 1.0, %v860_v39  ;;  %v430_v51 = vpop.f32.mrb[10].mxu1  ;;  %v740_v16 = vmul.f32 -1.702, %v1257_v60  ;;  %v1268_v17 = vadd.f32 %v426_v38, %v1185_v26 }
 0x235   :  { %v864_v54 = vpop.eup %863  ;;  %883 = vrcp.f32 %v534_v44  ;;  %v544_v56 = vadd.f32 1.0, %v862_v43  ;;  %v432_v58 = vpop.f32.mrb[11].mxu1  ;;  %v741_v10 = vmul.f32 -1.702, %v1260_v4  ;;  %v1272_v34 = vadd.f32 %v428_v46, %v1187_v27 }
 0x236   :  { %v866_v59 = vpop.eup %865  ;;  %885 = vrcp.f32 %v543_v48  ;;  %v545_v62 = vadd.f32 1.0, %v864_v54  ;;  %v499_v25 = vmul.f32 1.442695, %v739_v7  ;;  %v1275_v28 = vadd.f32 %v430_v51, %v1185_v26 }
 0x237   :  { %v868_v0 = vpop.eup %867  ;;  %887 = vrcp.f32 %v544_v56  ;;  %v546_v1 = vadd.f32 1.0, %v866_v59  ;;  %v742_v33 = vmul.f32 -1.702, %v1264_v18  ;;  %v1280_v36 = vadd.f32 %v432_v58, %v1187_v27 }
 0x238   :  { %v870_v63 = vpop.eup %869  ;;  %889 = vrcp.f32 %v545_v62  ;;  %v535_v8 = vadd.f32 1.0, %v868_v0  ;;  %v501_v39 = vmul.f32 1.442695, %v740_v16  ;;  %v751_v44 = vmul.f32 -1.702, %v1268_v17 }
 0x239   :  { %v872_v11 = vpop.eup %871  ;;  %891 = vrcp.f32 %v546_v1  ;;  %v536_v13 = vadd.f32 1.0, %v870_v63  ;;  %v503_v46 = vmul.f32 1.442695, %v741_v10  ;;  %v753_v27 = vmul.f32 -1.702, %v1275_v28 }
 0x23a   :  { %v874_v14 = vpop.eup %873  ;;  %893 = vrcp.f32 %v535_v8  ;;  %v537_v15 = vadd.f32 1.0, %v872_v11  ;;  %v505_v54 = vmul.f32 1.442695, %v742_v33  ;;  %v754_v56 = vmul.f32 -1.702, %v1280_v36 }
 0x23b   :  { %v876_v20 = vpop.eup %875  ;;  %895 = vrcp.f32 %v536_v13  ;;  %v538_v19 = vadd.f32 1.0, %v874_v14  ;;  %v527_v63 = vmul.f32 1.442695, %v753_v27 }
 0x23c   :  { %v878_v22 = vpop.eup %877  ;;  %897 = vrcp.f32 %v537_v15  ;;  %v547_v24 = vadd.f32 1.0, %v876_v20 }
 0x23d   :  { %v880_v29 = vpop.eup %879  ;;  %v603_v42 = vmul.f32 %v878_v22, %v1190_v40  ;;  %899 = vrcp.f32 %v538_v19  ;;  %v752_v40 = vmul.f32 -1.702, %v1272_v34 }
 0x23e   :  { %v882_v37 = vpop.eup %881  ;;  %v604_v38 = vmul.f32 %v880_v29, %v1193_v30  ;;  %901 = vrcp.f32 %v547_v24 }
 0x23f   :  { %v884_v45 = vpop.eup %883  ;;  %v605_v26 = vmul.f32 %v882_v37, %v1197_v32  ;;  %903 = vpow2.f32 %v517_v2  ;;  %v525_v0 = vmul.f32 1.442695, %v752_v40 }
 0x240   :  { %v886_v43 = vpop.eup %885  ;;  %v767_v48 = vpack.c.bf16 %v604_v38, %v603_v42  ;;  %v606_v52 = vmul.f32 %v884_v45, %v1201_v35  ;;  %905 = vpow2.f32 %v519_v6  ;;  %v523_v35 = vmul.f32 1.442695, %v751_v44 }
 0x241   :  { %v888_v51 = vpop.eup %887  ;;  %v615_v30 = vmul.f32 %v886_v43, %v1205_v41  ;;  %907 = vpow2.f32 %v521_v9  ;;  %v529_v6 = vmul.f32 1.442695, %v754_v56 }
 0x242   :  { %v890_v57 = vpop.eup %889  ;;  %699 = vst [vmem:[%s1350_s5] sm:$0xff] %v767_v48  ;;  %v768_v32 = vpack.c.bf16 %v606_v52, %v605_v26  ;;  %v616_v58 = vmul.f32 %v888_v51, %v1209_v47  ;;  %909 = vpow2.f32 %v499_v25 }
 0x243   :  { %v892_v59 = vpop.eup %891  ;;  %v617_v62 = vmul.f32 %v890_v57, %v1213_v49  ;;  %911 = vpow2.f32 %v501_v39 }
 0x244   :  { %v894_v41 = vpop.eup %893  ;;  %700 = vst [vmem:[%s1350_s5 + $0x8] sm:$0xff] %v768_v32  ;;  %v773_v1 = vpack.c.bf16 %v616_v58, %v615_v30  ;;  %v618_v2 = vmul.f32 %v892_v59, %v1217_v55  ;;  %913 = vpow2.f32 %v503_v46 }
 0x245   :  { %v896_v8 = vpop.eup %895  ;;  %v607_v47 = vmul.f32 %v894_v41, %v1221_v53  ;;  %915 = vpow2.f32 %v505_v54 }
 0x246   :  { %v898_v7 = vpop.eup %897  ;;  %705 = vst [vmem:[%s1350_s5 + $0x30] sm:$0xff] %v773_v1  ;;  %v774_v49 = vpack.c.bf16 %v618_v2, %v617_v62  ;;  %v608_v11 = vmul.f32 %v896_v8, %v1225_v61  ;;  %917 = vpow2.f32 %v523_v35 }
 0x247   :  { %v900_v13 = vpop.eup %899  ;;  %v609_v9 = vmul.f32 %v898_v7, %v1229_v3  ;;  %919 = vpow2.f32 %v525_v0 }
 0x248   :  { %v902_v55 = vpop.eup %901  ;;  %706 = vst [vmem:[%s1350_s5 + $0x38] sm:$0xff] %v774_v49  ;;  %v769_v53 = vpack.c.bf16 %v608_v11, %v607_v47  ;;  %v610_v14 = vmul.f32 %v900_v13, %v1233_v5  ;;  %921 = vpow2.f32 %v527_v63 }
 0x249   :  { %v904_v15 = vpop.eup %903  ;;  %923 = vpow2.f32 %v529_v6  ;;  %v619_v48 = vmul.f32 %v902_v55, %v1237_v12 }
 0x24a   :  { %v906_v16 = vpop.eup %905  ;;  %701 = vst [vmem:[%s1350_s5 + $0x10] sm:$0xff] %v769_v53  ;;  %v770_v61 = vpack.c.bf16 %v610_v14, %v609_v9  ;;  %v548_v20 = vadd.f32 1.0, %v904_v15 }
 0x24b   :  { %v908_v3 = vpop.eup %907  ;;  %v549_v19 = vadd.f32 1.0, %v906_v16 }
 0x24c   :  { %v910_v10 = vpop.eup %909  ;;  %702 = vst [vmem:[%s1350_s5 + $0x18] sm:$0xff] %v770_v61  ;;  %925 = vrcp.f32 %v548_v20  ;;  %v550_v22 = vadd.f32 1.0, %v908_v3 }
 0x24d   :  { %v912_v5 = vpop.eup %911  ;;  %927 = vrcp.f32 %v549_v19  ;;  %v539_v24 = vadd.f32 1.0, %v910_v10 }
 0x24e   :  { %v914_v25 = vpop.eup %913  ;;  %929 = vrcp.f32 %v550_v22  ;;  %v540_v29 = vadd.f32 1.0, %v912_v5 }
 0x24f   :  { %v916_v42 = vpop.eup %915  ;;  %931 = vrcp.f32 %v539_v24  ;;  %v541_v33 = vadd.f32 1.0, %v914_v25 }
 0x250   :  { %v918_v37 = vpop.eup %917  ;;  %933 = vrcp.f32 %v540_v29  ;;  %v542_v38 = vadd.f32 1.0, %v916_v42 }
 0x251   :  { %v920_v39 = vpop.eup %919  ;;  %935 = vrcp.f32 %v541_v33  ;;  %v551_v44 = vadd.f32 1.0, %v918_v37 }
 0x252   :  { %v922_v45 = vpop.eup %921  ;;  %937 = vrcp.f32 %v542_v38  ;;  %v552_v26 = vadd.f32 1.0, %v920_v39 }
 0x253   :  { %v924_v46 = vpop.eup %923  ;;  %939 = vrcp.f32 %v551_v44  ;;  %v553_v40 = vadd.f32 1.0, %v922_v45 }
 0x254   :  { %941 = vrcp.f32 %v552_v26  ;;  %v554_v43 = vadd.f32 1.0, %v924_v46 }
 0x255   :  { %943 = vrcp.f32 %v553_v40 }
 0x256   :  { %v926_v52 = vpop.eup %925  ;;  %945 = vrcp.f32 %v554_v43 }
 0x257   :  { %v928_v27 = vpop.eup %927  ;;  %v620_v51 = vmul.f32 %v926_v52, %v1242_v21 }
 0x258   :  { %v930_v30 = vpop.eup %929  ;;  %v621_v54 = vmul.f32 %v928_v27, %v1245_v23 }
 0x259   :  { %v932_v56 = vpop.eup %931  ;;  %v775_v57 = vpack.c.bf16 %v620_v51, %v619_v48  ;;  %v622_v32 = vmul.f32 %v930_v30, %v1248_v31 }
 0x25a   :  { %v934_v58 = vpop.eup %933  ;;  %v611_v35 = vmul.f32 %v932_v56, %v1253_v50 }
 0x25b   :  { %v936_v59 = vpop.eup %935  ;;  %707 = vst [vmem:[%s1350_s5 + $0x40] sm:$0xff] %v775_v57  ;;  %v776_v12 = vpack.c.bf16 %v622_v32, %v621_v54  ;;  %v612_v62 = vmul.f32 %v934_v58, %v1257_v60 }
 0x25c   :  { %v938_v0 = vpop.eup %937  ;;  %v613_v21 = vmul.f32 %v936_v59, %v1260_v4 }
 0x25d   :  { %v940_v41 = vpop.eup %939  ;;  %708 = vst [vmem:[%s1350_s5 + $0x48] sm:$0xff] %v776_v12  ;;  %v771_v23 = vpack.c.bf16 %v612_v62, %v611_v35  ;;  %v614_v31 = vmul.f32 %v938_v0, %v1264_v18 }
 0x25e   :  { %v942_v50 = vpop.eup %941  ;;  %v623_v1 = vmul.f32 %v940_v41, %v1268_v17 }
 0x25f   :  { %v944_v2 = vpop.eup %943  ;;  %703 = vst [vmem:[%s1350_s5 + $0x20] sm:$0xff] %v771_v23  ;;  %v772_v60 = vpack.c.bf16 %v614_v31, %v613_v21  ;;  %v624_v63 = vmul.f32 %v942_v50, %v1272_v34 }
 0x260   :  { %v946_v4 = vpop.eup %945  ;;  %v625_v8 = vmul.f32 %v944_v2, %v1275_v28 }
 0x261   :  { %704 = vst [vmem:[%s1350_s5 + $0x28] sm:$0xff] %v772_v60  ;;  %v777_v47 = vpack.c.bf16 %v624_v63, %v623_v1  ;;  %v626_v18 = vmul.f32 %v946_v4, %v1280_v36 }
 0x263   :  { %709 = vst [vmem:[%s1350_s5 + $0x50] sm:$0xff] %v777_v47  ;;  %v778_v17 = vpack.c.bf16 %v626_v18, %v625_v8 }
 0x265   :  { %710 = vst [vmem:[%s1350_s5 + $0x58] sm:$0xff] %v778_v17 }

// kernel: _lambda_.33
= control target key start
LH: loop header
LB: loop body
LE: loop exit
PB: predicated region body
PF: predicated region fallthrough
CT: control target
= control target key end

     0   :  { %s1510_s15 = smov 0   ;;  %s1739_s0 = inlined_call_operand.vmem [shape: bf16[4,24,192], index: 0, kind: input, shape index: {}]   ;;  %s1740_s1 = inlined_call_operand.vmem [shape: bf16[64,64], index: 1, kind: input, shape index: {}]   ;;  %s1741_s2 = inlined_call_operand.vmem [shape: f32[1,64], index: 2, kind: input, shape index: {}]   ;;  %s1742_s3 = inlined_call_operand.vmem [shape: bf16[4,24,64], index: 3, kind: input, shape index: {}]   ;;  %s1743_s4 = inlined_call_operand.vmem [shape: bf16[4,24,64], index: 4, kind: output, shape index: {}]  }
   0x1 LB: > { %s1195_s16 = sadd.s32 4294967295, %s1476_s15   ;;  %p1199_p0 = scmp.ge.s32.totalorder %s1476_s15, 1  ;;  %s1476_s15 = sphi %s1510_s15, %s14_s15  }
   0x2   : > { %p172_p1 = scmp.lt.s32.totalorder %s1476_s15, 5 }
   0x4   : > { %p173_p2 = pnand %p1199_p0, %p172_p1 }
   0x5   : > { %p203_p3 = scmp.lt.s32.totalorder (!%p173_p2), %s1195_s16, 3  ;;  %vm243_vm0 = vcmask (!%p173_p2), 130048   ;;  %s1478_s21 = smov (!%p173_p2), 64   ;;  %v222_v7 = vlaneseq (!%p173_p2)  ;;  %vm307_vm3 = vcmask (!%p173_p2), 195584   ;;  %vm355_vm5 = vcmask (!%p173_p2), 1043456  }
   0x6   : > { %176 = sbr.rel (%p173_p2) target bundleno = 2429 (0x97d), region = 36  ;;  %s1479_s22 = smov (!%p173_p2), 32   ;;  %vm420_vm6 = vcmask (!%p173_p2), 125952   ;;  %vm611_vm7 = vcmask (!%p173_p2), 257152   ;;  %vm802_vm8 = vcmask (!%p173_p2), 388352   ;;  %vm993_vm9 = vcmask (!%p173_p2), 519552  }
   0x7   : > { %v1542_v8 = vshrl.u32 (!%p173_p2), %v222_v7, 7  ;;  %v1547_v10 = vand.u32 (!%p173_p2), 127, %v222_v7  ;;  %s1480_s23 = smov (!%p173_p2), 48   ;;  %s1481_s24 = smov (!%p173_p2), 112   ;;  %vm1047_vm10 = vcmask (!%p173_p2), 523264   ;;  %vm1124_vm11 = vcmask (!%p173_p2), 519168  }
   0x8   : > { %s1482_s25 = smov (!%p173_p2), 96   ;;  %s1483_s26 = smov (!%p173_p2), 16  }
   0x9   : > { %v1545_v9 = vadd.s32 (!%p173_p2), 16, %v1542_v8  ;;  %v1550_v11 = vadd.s32 (!%p173_p2), 8, %v1542_v8  ;;  %vm228_vm2 = vcmp.le.s32.totalorder (!%p173_p2), %v1547_v10, %v1542_v8  ;;  %s1484_s27 = smov (!%p173_p2), 80  }
   0xb   : > { %vm230_vm1 = vcmp.le.s32.totalorder (!%p173_p2), %v1547_v10, %v1545_v9  ;;  %vm229_vm4 = vcmp.le.s32.totalorder (!%p173_p2), %v1547_v10, %v1550_v11 }
   0xd   : > { %s1745_s16 = smov (!%p203_p3, %s1195_s16), 3 }
   0xe   : > { %s1394_s17 = smul.u32 24, %s1745_s16 }
   0xf   : > { %s1395_s10 = smul.u32 12, %s1745_s16 }
  0x10   : > { %s1524_s20 = scalar_lea.vmem %s1739_s0, %s1394_s17 }
  0x11   : > { %v1527_v0 = vld [vmem:[%s1524_s20] ss:$8 sps:$4 sm:$0xff]   ;;  %v221_v1 = vld [vmem:[%s1524_s20 + $0x10] sm:$0xff]  ;;  %v1576_v37 = vld [vmem:[%s1524_s20 + $0x4] ss:$8 sps:$4 sm:$0xff]   ;;  %s212_s13 = scalar_lea.vmem %s1742_s3, %s1395_s10  ;;  %s217_s19 = scalar_lea.vmem %s1743_s4, %s1395_s10 }
  0x12   : > { %239 = vrot.lane.b32.xlu0 %v1527_v0, %s1478_s21  ;;  %v1531_v2 = vcombine.low %v221_v1, %v221_v1  ;;  %1310 = vmatprep.mubr.msk.bf16.mxu0 %vm243_vm0, %v1527_v0  ;;  %v1578_v38 = vcombine.high %v221_v1, %v221_v1 }
  0x13   : > { %1314 = vmatprep.subr.bf16.mxu1 %v1576_v37 }
  0x14   : > { %1315 = vmatpush3.bf16.msra.mxu1 %v1576_v37  ;;  %v357_v39 = vsel %vm355_vm5, %v1578_v38, 0 }
  0x15   : > { %1384 = vmatprep.subr.msk.bf16.mxu1 %vm355_vm5, %v1578_v38 }
  0x16   : > { %241 = vrot.lane.b32.xlu0 %v1531_v2, %s1478_s21 }
  0x18   : > { %1317 = vmatpush3.bf16.msra.mxu1 %v357_v39 }
  0x84   : > { %v240_v3 = vpop.permute.xlu0 %239 }
  0x85   : > { %1382 = vmatprep.subr.msk.bf16.mxu0 %vm243_vm0, %v240_v3  ;;  %v251_v4 = vsel %vm243_vm0, %v240_v3, 0 }
  0x86   : > { %1307 = vmatpush3.bf16.xpose.msra.mxu0 %v251_v4 }
  0x88   : > { %v242_v5 = vpop.permute.xlu0 %241 }
  0x89   : > { %1383 = vmatprep.subr.msk.bf16.mxu0 %vm243_vm0, %v242_v5  ;;  %v254_v6 = vsel %vm243_vm0, %v242_v5, 0 }
  0x8e   : > { %1309 = vmatpush3.bf16.xpose.msra.mxu0 %v254_v6 }
  0x95   : > { %1311 = vmatmul.mubr.msk.bf16.vlgmr.msra.gmra.mrb[0].mxu0 %vm243_vm0, %v1531_v2 }
 0x168   : > { %v1312_v12 = vpop.f32.mrb[0].mxu0 }
 0x169   : > { %v306_v13 = vsel %vm230_vm1, %v1312_v12, -1e+09  ;;  %v290_v14 = vpop.f32.mrb[1].mxu0 }
 0x16a   : > { %v304_v15 = vsel %vm228_vm2, %v290_v14, -1e+09  ;;  %v1313_v16 = vpop.f32.mrb[2].mxu0  ;;  %v314_v17 = vsel %vm307_vm3, %v306_v13, -inf }
 0x16b   : > { %315 = vmax.xlane.f32.xlu0 %v314_v17  ;;  %v293_v18 = vpop.f32.mrb[3].mxu0  ;;  %v308_v19 = vsel %vm307_vm3, %v304_v15, -inf }
 0x16c   : > { %v305_v20 = vsel %vm229_vm4, %v293_v18, -1e+09  ;;  %309 = vmax.xlane.f32.xlu1 %v308_v19 }
 0x16d   : > { %v311_v21 = vsel %vm307_vm3, %v305_v20, -inf }
 0x170   : > { %312 = vmax.xlane.f32.xlu1 %v311_v21 }
 0x181   : > { %619 = vrot.lane.b32.xlu0 %v1527_v0, %s1479_s22 }
 0x1f8   : > { %v316_v22 = vpop.xlane.xlu0 %315 }
 0x1f9   : > { %v319_v23 = vsub.f32 %v306_v13, %v316_v22  ;;  %v310_v24 = vpop.xlane.xlu1 %309 }
 0x1fa   : > { %v317_v25 = vsub.f32 %v304_v15, %v310_v24 }
 0x1fb   : > { %v324_v26 = vmul.f32 1.442695, %v319_v23 }
 0x1fc   : > { %v320_v27 = vmul.f32 1.442695, %v317_v25  ;;  %v620_v40 = vpop.permute.xlu0 %619 }
 0x1fd   : > { %1422 = vpow2.f32 %v324_v26  ;;  %v313_v28 = vpop.xlane.xlu1 %312  ;;  %v630_v41 = vsel %vm243_vm0, %v620_v40, 0  ;;  %1388 = vmatprep.subr.msk.bf16.mxu0 %vm243_vm0, %v620_v40 }
 0x1fe   : > { %v318_v29 = vsub.f32 %v305_v20, %v313_v28  ;;  %1424 = vpow2.f32 %v320_v27  ;;  %1339 = vmatpush3.bf16.xpose.msra.mxu0 %v630_v41 }
 0x200   : > { %v322_v30 = vmul.f32 1.442695, %v318_v29 }
 0x202   : > { %1426 = vpow2.f32 %v322_v30 }
 0x207   : > { %v1423_v31 = vpop.eup %1422 }
 0x208   : > { %v332_v32 = vsel %vm307_vm3, %v1423_v31, 0.0  ;;  %v1425_v33 = vpop.eup %1424 }
 0x209   : > { %333 = vadd.xlane.f32.xlu1 %v332_v32  ;;  %v326_v34 = vsel %vm307_vm3, %v1425_v33, 0.0 }
 0x20c   : > { %v1427_v35 = vpop.eup %1426 }
 0x20d   : > { %327 = vadd.xlane.f32.xlu1 %v326_v34  ;;  %v329_v36 = vsel %vm307_vm3, %v1427_v35, 0.0 }
 0x211   : > { %330 = vadd.xlane.f32.xlu1 %v329_v36 }
 0x222   : > { %428 = vrot.lane.b32.xlu1 %v1527_v0, %s1480_s23 }
 0x226   : > { %430 = vrot.lane.b32.xlu1 %v1531_v2, %s1480_s23 }
 0x22a   : > { %424 = vrot.lane.b32.xlu1 %v1527_v0, %s1481_s24 }
 0x22e   : > { %426 = vrot.lane.b32.xlu1 %v1531_v2, %s1481_s24 }
 0x232   : > { %621 = vrot.lane.b32.xlu1 %v1531_v2, %s1479_s22 }
 0x236   : > { %615 = vrot.lane.b32.xlu1 %v1527_v0, %s1482_s25 }
 0x23a   : > { %617 = vrot.lane.b32.xlu1 %v1531_v2, %s1482_s25 }
 0x296   : > { %v334_v42 = vpop.xlane.xlu1 %333 }
 0x297   : > { %1428 = vrcp.f32 %v334_v42 }
 0x29a   : > { %v328_v43 = vpop.xlane.xlu1 %327 }
 0x29b   : > { %1430 = vrcp.f32 %v328_v43 }
 0x29e   : > { %v331_v44 = vpop.xlane.xlu1 %330 }
 0x29f   : > { %1432 = vrcp.f32 %v331_v44 }
 0x2a1   : > { %v1429_v46 = vpop.eup %1428 }
 0x2a2   : > { %v429_v45 = vpop.permute.xlu1 %428  ;;  %v340_v50 = vmul.f32 %v1429_v46, %v1423_v31 }
 0x2a3   : > { %1385 = vmatprep.subr.msk.bf16.mxu1 %vm243_vm0, %v429_v45  ;;  %v439_v57 = vsel %vm243_vm0, %v429_v45, 0 }
 0x2a4   : > { %v342_v55 = vpack.c.bf16 %v340_v50, %v340_v50 }
 0x2a5   : > { %v1431_v48 = vpop.eup %1430 }
 0x2a6   : > { %v431_v47 = vpop.permute.xlu1 %430  ;;  %v338_v51 = vmul.f32 %v1431_v48, %v1425_v33 }
 0x2a7   : > { %v442_v61 = vsel %vm243_vm0, %v431_v47, 0 }
 0x2a9   : > { %v1433_v49 = vpop.eup %1432 }
 0x2aa   : > { %v339_v52 = vmul.f32 %v1433_v49, %v1427_v35  ;;  %v425_v53 = vpop.permute.xlu1 %424 }
 0x2ac   : > { %v341_v54 = vpack.c.bf16 %v339_v52, %v338_v51 }
 0x2ae   : > { %1318 = vmatprep.mubr.msk.bf16.mxu1 %vm307_vm3, %v341_v54  ;;  %v427_v56 = vpop.permute.xlu1 %426 }
 0x2af   : > { %1319 = vmatmul.mubr.msk.bf16.vlgmr.msra.gmra.mrb[0].mxu1 %vm307_vm3, %v342_v55 }
 0x2b0   : > { %1323 = vmatpush3.bf16.xpose.msra.mxu1 %v439_v57  ;;  %1326 = vmatprep.mubr.msk.bf16.mxu1 %vm243_vm0, %v425_v53 }
 0x2b1   : > { %1386 = vmatprep.subr.msk.bf16.mxu1 %vm243_vm0, %v431_v47 }
 0x2b2   : > { %v622_v58 = vpop.permute.xlu1 %621 }
 0x2b3   : > { %v633_v59 = vsel %vm243_vm0, %v622_v58, 0  ;;  %1389 = vmatprep.subr.msk.bf16.mxu0 %vm243_vm0, %v622_v58 }
 0x2b4   : > { %1341 = vmatpush3.bf16.xpose.msra.mxu0 %v633_v59 }
 0x2b6   : > { %v616_v60 = vpop.permute.xlu1 %615 }
 0x2b7   : > { %1342 = vmatprep.mubr.msk.bf16.mxu0 %vm243_vm0, %v616_v60 }
 0x2b8   : > { %1325 = vmatpush3.bf16.xpose.msra.mxu1 %v442_v61 }
 0x2ba   : > { %v618_v62 = vpop.permute.xlu1 %617 }
 0x2bb   : > { %1343 = vmatmul.mubr.msk.bf16.vlgmr.msra.gmra.mrb[4].mxu0 %vm243_vm0, %v618_v62 }
 0x2bf   : > { %1327 = vmatmul.mubr.msk.bf16.vlgmr.msra.gmra.mrb[4].mxu1 %vm243_vm0, %v427_v56 }
 0x382   : > { %v1320_v63 = vpop.f32.mrb[0].mxu1 }
 0x383   : > { %v1251_v1 = vpack.c.bf16 %v1320_v63, %v1320_v63  ;;  %v393_v3 = vpop.f32.mrb[1].mxu1 }
 0x384   : > { %v1249_v4 = vpack.c.bf16 %v393_v3, %v393_v3  ;;  %v1321_v5 = vpop.f32.mrb[2].mxu1 }
 0x385   : > { %423 = vst.msk [vmem:[#allocation2 + $0x8] sm:$0xf] %vm420_vm6, %v1251_v1  ;;  %v396_v6 = vpop.f32.mrb[3].mxu1 }
 0x386   : > { %421 = vst.msk [vmem:[#allocation2] sm:$0xf] %vm420_vm6, %v1249_v4  ;;  %v1250_v7 = vpack.c.bf16 %v396_v6, %v396_v6 }
 0x388   : > { %422 = vst.msk [vmem:[#allocation2 + $0x4] sm:$0xf] %vm420_vm6, %v1250_v7 }
 0x38e   : > { %v1344_v12 = vpop.f32.mrb[4].mxu0 }
 0x38f   : > { %v669_v13 = vpop.f32.mrb[5].mxu0  ;;  %v685_v30 = vsel %vm230_vm1, %v1344_v12, -1e+09 }
 0x390   : > { %v1345_v14 = vpop.f32.mrb[6].mxu0  ;;  %v683_v27 = vsel %vm228_vm2, %v669_v13, -1e+09  ;;  %v692_v31 = vsel %vm307_vm3, %v685_v30, -inf }
 0x391   : > { %v672_v15 = vpop.f32.mrb[7].mxu0  ;;  %v686_v29 = vsel %vm307_vm3, %v683_v27, -inf }
 0x392   : > { %v1328_v16 = vpop.f32.mrb[4].mxu1  ;;  %v684_v25 = vsel %vm229_vm4, %v672_v15, -1e+09 }
 0x393   : > { %v478_v17 = vpop.f32.mrb[5].mxu1  ;;  %v494_v22 = vsel %vm230_vm1, %v1328_v16, -1e+09  ;;  %v689_v28 = vsel %vm307_vm3, %v684_v25, -inf }
 0x394   : > { %v492_v18 = vsel %vm228_vm2, %v478_v17, -1e+09  ;;  %v1329_v19 = vpop.f32.mrb[6].mxu1  ;;  %v501_v26 = vsel %vm307_vm3, %v494_v22, -inf }
 0x395   : > { %v481_v20 = vpop.f32.mrb[7].mxu1  ;;  %v495_v21 = vsel %vm307_vm3, %v492_v18, -inf }
 0x396   : > { %v493_v23 = vsel %vm229_vm4, %v481_v20, -1e+09  ;;  %496 = vmax.xlane.f32.xlu0 %v495_v21 }
 0x397   : > { %v498_v24 = vsel %vm307_vm3, %v493_v23, -inf }
 0x398   : > { %499 = vmax.xlane.f32.xlu1 %v498_v24 }
 0x39a   : > { %502 = vmax.xlane.f32.xlu0 %v501_v26 }
 0x39c   : > { %690 = vmax.xlane.f32.xlu1 %v689_v28 }
 0x39e   : > { %687 = vmax.xlane.f32.xlu0 %v686_v29 }
 0x3a2   : > { %693 = vmax.xlane.f32.xlu0 %v692_v31 }
 0x423   : > { %v497_v32 = vpop.xlane.xlu0 %496 }
 0x424   : > { %v504_v57 = vsub.f32 %v492_v18, %v497_v32 }
 0x425   : > { %v500_v33 = vpop.xlane.xlu1 %499 }
 0x426   : > { %v505_v42 = vsub.f32 %v493_v23, %v500_v33  ;;  %v507_v59 = vmul.f32 1.442695, %v504_v57 }
 0x427   : > { %v503_v34 = vpop.xlane.xlu0 %502 }
 0x428   : > { %v509_v46 = vmul.f32 1.442695, %v505_v42  ;;  %v506_v56 = vsub.f32 %v494_v22, %v503_v34 }
 0x429   : > { %v691_v35 = vpop.xlane.xlu1 %690 }
 0x42a   : > { %v696_v36 = vsub.f32 %v684_v25, %v691_v35  ;;  %v511_v58 = vmul.f32 1.442695, %v506_v56 }
 0x42b   : > { %v688_v39 = vpop.xlane.xlu0 %687 }
 0x42c   : > { %v700_v40 = vmul.f32 1.442695, %v696_v36  ;;  %v695_v41 = vsub.f32 %v683_v27, %v688_v39 }
 0x42e   : > { %1434 = vpow2.f32 %v700_v40  ;;  %v698_v43 = vmul.f32 1.442695, %v695_v41 }
 0x42f   : > { %v694_v44 = vpop.xlane.xlu0 %693 }
 0x430   : > { %1436 = vpow2.f32 %v698_v43  ;;  %v697_v45 = vsub.f32 %v685_v30, %v694_v44 }
 0x432   : > { %v702_v47 = vmul.f32 1.442695, %v697_v45 }
 0x434   : > { %1438 = vpow2.f32 %v702_v47 }
 0x435   : > { %1440 = vpow2.f32 %v509_v46 }
 0x436   : > { %1442 = vpow2.f32 %v511_v58 }
 0x437   : > { %1444 = vpow2.f32 %v507_v59 }
 0x438   : > { %v1638_v48 = vpop.eup %1434 }
 0x439   : > { %v707_v49 = vsel %vm307_vm3, %v1638_v48, 0.0 }
 0x43a   : > { %v1437_v50 = vpop.eup %1436  ;;  %708 = vadd.xlane.f32.xlu1 %v707_v49 }
 0x43b   : > { %v704_v51 = vsel %vm307_vm3, %v1437_v50, 0.0 }
 0x43c   : > { %705 = vadd.xlane.f32.xlu0 %v704_v51 }
 0x43e   : > { %v1643_v52 = vpop.eup %1438 }
 0x43f   : > { %v710_v53 = vsel %vm307_vm3, %v1643_v52, 0.0  ;;  %v1441_v54 = vpop.eup %1440 }
 0x440   : > { %711 = vadd.xlane.f32.xlu0 %v710_v53  ;;  %v516_v55 = vsel %vm307_vm3, %v1441_v54, 0.0  ;;  %v1443_v60 = vpop.eup %1442 }
 0x441   : > { %v519_v61 = vsel %vm307_vm3, %v1443_v60, 0.0  ;;  %v1445_v62 = vpop.eup %1444 }
 0x442   : > { %v513_v63 = vsel %vm307_vm3, %v1445_v62, 0.0 }
 0x444   : > { %517 = vadd.xlane.f32.xlu0 %v516_v55 }
 0x44b   : > { %530 = vrot.lane.b32.xlu1 %v1576_v37, %s1481_s24 }
 0x45a   : > { %532 = vrot.lane.b32.xlu0 %v1578_v38, %s1481_s24 }
 0x45e   : > { %810 = vrot.lane.b32.xlu0 %v1527_v0, %s1483_s26 }
 0x462   : > { %806 = vrot.lane.b32.xlu0 %v1527_v0, %s1484_s27 }
 0x46f   : > { %520 = vadd.xlane.f32.xlu1 %v519_v61 }
 0x473   : > { %514 = vadd.xlane.f32.xlu1 %v513_v63 }
 0x484   : > { %721 = vrot.lane.b32.xlu1 %v1576_v37, %s1482_s25 }
 0x488   : > { %723 = vrot.lane.b32.xlu1 %v1578_v38, %s1482_s25 }
 0x48c   : > { %812 = vrot.lane.b32.xlu1 %v1531_v2, %s1483_s26 }
 0x490   : > { %808 = vrot.lane.b32.xlu1 %v1531_v2, %s1484_s27 }
 0x4c7   : > { %v709_v0 = vpop.xlane.xlu1 %708 }
 0x4c9   : > { %v706_v1 = vpop.xlane.xlu0 %705 }
 0x4ca   : > { %1446 = vrcp.f32 %v706_v1 }
 0x4cb   : > { %v531_v3 = vpop.permute.xlu1 %530 }
 0x4cc   : > { %1330 = vmatprep.subr.bf16.mxu1 %v531_v3 }
 0x4cd   : > { %v712_v4 = vpop.xlane.xlu0 %711  ;;  %1331 = vmatpush3.bf16.msra.mxu1 %v531_v3 }
 0x4d1   : > { %v518_v5 = vpop.xlane.xlu0 %517 }
 0x4d4   : > { %v1447_v14 = vpop.eup %1446 }
 0x4d5   : > { %v533_v6 = vpop.permute.xlu0 %532  ;;  %v716_v22 = vmul.f32 %v1447_v14, %v1437_v50 }
 0x4d6   : > { %v542_v7 = vsel %vm355_vm5, %v533_v6, 0  ;;  %1387 = vmatprep.subr.msk.bf16.mxu1 %vm355_vm5, %v533_v6 }
 0x4d7   : > { %1333 = vmatpush3.bf16.msra.mxu1 %v542_v7 }
 0x4d9   : > { %v811_v31 = vpop.permute.xlu0 %810 }
 0x4da   : > { %v821_v34 = vsel %vm243_vm0, %v811_v31, 0 }
 0x4dd   : > { %v807_v33 = vpop.permute.xlu0 %806 }
 0x4fc   : > { %v521_v12 = vpop.xlane.xlu1 %520 }
 0x4fd   : > { %1448 = vrcp.f32 %v521_v12 }
 0x4fe   : > { %1450 = vrcp.f32 %v518_v5 }
 0x4ff   : > { %1452 = vrcp.f32 %v709_v0 }
 0x500   : > { %v515_v13 = vpop.xlane.xlu1 %514 }
 0x501   : > { %1454 = vrcp.f32 %v515_v13 }
 0x502   : > { %1456 = vrcp.f32 %v712_v4 }
 0x504   : > { %v722_v2 = vpop.permute.xlu1 %721 }
 0x505   : > { %1346 = vmatprep.subr.bf16.mxu1 %v722_v2 }
 0x507   : > { %v1449_v15 = vpop.eup %1448 }
 0x508   : > { %v1451_v16 = vpop.eup %1450  ;;  %v527_v19 = vmul.f32 %v1449_v15, %v1443_v60  ;;  %v724_v28 = vpop.permute.xlu1 %723 }
 0x509   : > { %v1453_v17 = vpop.eup %1452  ;;  %v526_v21 = vmul.f32 %v1451_v16, %v1441_v54  ;;  %v733_v30 = vsel %vm355_vm5, %v724_v28, 0 }
 0x50a   : > { %v717_v24 = vmul.f32 %v1453_v17, %v1638_v48  ;;  %v529_v25 = vpack.c.bf16 %v527_v19, %v527_v19 }
 0x50b   : > { %v1455_v18 = vpop.eup %1454 }
 0x50c   : > { %v525_v20 = vmul.f32 %v1455_v18, %v1445_v62  ;;  %v1457_v26 = vpop.eup %1456  ;;  %v719_v27 = vpack.c.bf16 %v717_v24, %v716_v22  ;;  %v813_v35 = vpop.permute.xlu1 %812 }
 0x50d   : > { %v718_v29 = vmul.f32 %v1457_v26, %v1643_v52  ;;  %v824_v36 = vsel %vm243_vm0, %v813_v35, 0 }
 0x50e   : > { %v528_v23 = vpack.c.bf16 %v526_v21, %v525_v20 }
 0x50f   : > { %v720_v32 = vpack.c.bf16 %v718_v29, %v718_v29 }
 0x510   : > { %1334 = vmatprep.mubr.msk.bf16.mxu1 %vm307_vm3, %v528_v23  ;;  %v809_v39 = vpop.permute.xlu1 %808 }
 0x511   : > { %1335 = vmatmul.mubr.msk.bf16.vlgmr.msra.gmra.mrb[8].mxu1 %vm307_vm3, %v529_v25 }
 0x512   : > { %1347 = vmatpush3.bf16.msra.mxu1 %v722_v2  ;;  %1350 = vmatprep.mubr.msk.bf16.mxu1 %vm307_vm3, %v719_v27 }
 0x513   : > { %1390 = vmatprep.subr.msk.bf16.mxu1 %vm355_vm5, %v724_v28 }
 0x516   : > { %1349 = vmatpush3.bf16.msra.mxu1 %v733_v30 }
 0x517   : > { %1391 = vmatprep.subr.msk.bf16.mxu1 %vm243_vm0, %v811_v31 }
 0x519   : > { %1351 = vmatmul.mubr.msk.bf16.vlgmr.msra.gmra.mrb[12].mxu1 %vm307_vm3, %v720_v32 }
 0x51a   : > { %1358 = vmatprep.mubr.msk.bf16.mxu1 %vm243_vm0, %v807_v33  ;;  %v1416_v33 = vld [vmem:[%s1740_s1] sm:$0xff]  }
 0x51f   : > { %1355 = vmatpush3.bf16.xpose.msra.mxu1 %v821_v34  ;;  %v1417_v34 = vld [vmem:[%s1740_s1 + $0x8] sm:$0xff]  }
 0x520   : > { %1392 = vmatprep.subr.msk.bf16.mxu1 %vm243_vm0, %v813_v35  ;;  %v1418_v35 = vld [vmem:[%s1740_s1 + $0x10] sm:$0xff]  }
 0x527   : > { %1357 = vmatpush3.bf16.xpose.msra.mxu1 %v824_v36  ;;  %v1419_v36 = vld [vmem:[%s1740_s1 + $0x18] sm:$0xff]  }
 0x52e   : > { %1359 = vmatmul.mubr.msk.bf16.vlgmr.msra.gmra.mrb[16].mxu1 %vm243_vm0, %v809_v39 }
 0x5e4   : > { %v1336_v40 = vpop.f32.mrb[8].mxu1 }
 0x5e5   : > { %v578_v41 = vpop.f32.mrb[9].mxu1  ;;  %v1254_v13 = vpack.c.bf16 %v1336_v40, %v1336_v40 }
 0x5e6   : > { %v1337_v42 = vpop.f32.mrb[10].mxu1  ;;  %v1252_v6 = vpack.c.bf16 %v578_v41, %v578_v41 }
 0x5e7   : > { %v581_v43 = vpop.f32.mrb[11].mxu1 }
 0x5e8   : > { %v1253_v7 = vpack.c.bf16 %v581_v43, %v581_v43 }
 0x5ec   : > { %v1352_v44 = vpop.f32.mrb[12].mxu1 }
 0x5ed   : > { %v769_v45 = vpop.f32.mrb[13].mxu1  ;;  %v1257_v2 = vpack.c.bf16 %v1352_v44, %v1352_v44 }
 0x5ee   : > { %v1353_v46 = vpop.f32.mrb[14].mxu1  ;;  %v1255_v12 = vpack.c.bf16 %v769_v45, %v769_v45 }
 0x5ef   : > { %v772_v47 = vpop.f32.mrb[15].mxu1 }
 0x5f0   : > { %v1256_v14 = vpack.c.bf16 %v772_v47, %v772_v47 }
 0x601   : > { %v1360_v48 = vpop.f32.mrb[16].mxu1 }
 0x602   : > { %v860_v49 = vpop.f32.mrb[17].mxu1  ;;  %v876_v54 = vsel %vm230_vm1, %v1360_v48, -1e+09 }
 0x603   : > { %v874_v50 = vsel %vm228_vm2, %v860_v49, -1e+09  ;;  %v1361_v51 = vpop.f32.mrb[18].mxu1  ;;  %v883_v57 = vsel %vm307_vm3, %v876_v54, -inf }
 0x604   : > { %v863_v52 = vpop.f32.mrb[19].mxu1  ;;  %v877_v53 = vsel %vm307_vm3, %v874_v50, -inf  ;;  %v1104_v51 = vld [vmem:[%s212_s13 + $0x8] sm:$0xf] }
 0x605   : > { %v875_v55 = vsel %vm229_vm4, %v863_v52, -1e+09  ;;  %878 = vmax.xlane.f32.xlu0 %v877_v53  ;;  %v1265_v52 = vld [vmem:[%s212_s13] sm:$0xff]  }
 0x606   : > { %v880_v56 = vsel %vm307_vm3, %v875_v55, -inf  ;;  %v1235_v53 = vld [vmem:[%s1741_s2] ss:$0 sm:$0xff] }
 0x607   : > { %881 = vmax.xlane.f32.xlu1 %v880_v56  ;;  %v1266_v56 = vunpack.c.l.bf16 %v1265_v52 }
 0x609   : > { %884 = vmax.xlane.f32.xlu0 %v883_v57 }
 0x692   : > { %v879_v8 = vpop.xlane.xlu0 %878 }
 0x693   : > { %v886_v59 = vsub.f32 %v874_v50, %v879_v8 }
 0x694   : > { %v882_v58 = vpop.xlane.xlu1 %881 }
 0x695   : > { %v887_v60 = vsub.f32 %v875_v55, %v882_v58  ;;  %v889_v9 = vmul.f32 1.442695, %v886_v59 }
 0x696   : > { %v885_v61 = vpop.xlane.xlu0 %884 }
 0x697   : > { %v891_v62 = vmul.f32 1.442695, %v887_v60  ;;  %v888_v63 = vsub.f32 %v876_v54, %v885_v61  ;;  %v1107_v54 = vunpack.c.l.bf16 %v1104_v51  ;;  %v1267_v60 = vunpack.c.h.bf16 %v1265_v52 }
 0x699   : > { %1458 = vpow2.f32 %v891_v62  ;;  %v893_v0 = vmul.f32 1.442695, %v888_v63 }
 0x69b   : > { %1460 = vpow2.f32 %v893_v0 }
 0x69c   : > { %1462 = vpow2.f32 %v889_v9 }
 0x6a3   : > { %v1459_v10 = vpop.eup %1458 }
 0x6a4   : > { %v898_v11 = vsel %vm307_vm3, %v1459_v10, 0.0 }
 0x6a5   : > { %v1461_v1 = vpop.eup %1460  ;;  %899 = vadd.xlane.f32.xlu1 %v898_v11 }
 0x6a6   : > { %v901_v3 = vsel %vm307_vm3, %v1461_v1, 0.0  ;;  %v1463_v4 = vpop.eup %1462 }
 0x6a7   : > { %902 = vadd.xlane.f32.xlu0 %v901_v3  ;;  %v895_v5 = vsel %vm307_vm3, %v1463_v4, 0.0 }
 0x6ab   : > { %896 = vadd.xlane.f32.xlu0 %v895_v5 }
 0x6b6   : > { %912 = vrot.lane.b32.xlu1 %v1576_v37, %s1484_s27 }
 0x6ba   : > { %602 = vrot.lane.b32.xlu1 %v1252_v6, %s1483_s26 }
 0x6be   : > { %604 = vrot.lane.b32.xlu1 %v1253_v7, %s1483_s26 }
 0x6c1   : > { %914 = vrot.lane.b32.xlu0 %v1578_v38, %s1484_s27 }
 0x6c2   : > { %793 = vrot.lane.b32.xlu1 %v1255_v12, %s1479_s22 }
 0x6c5   : > { %606 = vrot.lane.b32.xlu0 %v1254_v13, %s1483_s26 }
 0x6c6   : > { %797 = vrot.lane.b32.xlu1 %v1257_v2, %s1479_s22 }
 0x6c9   : > { %795 = vrot.lane.b32.xlu0 %v1256_v14, %s1479_s22 }
 0x732   : > { %v900_v37 = vpop.xlane.xlu1 %899 }
 0x734   : > { %v903_v15 = vpop.xlane.xlu0 %902 }
 0x735   : > { %1464 = vrcp.f32 %v903_v15 }
 0x736   : > { %v913_v16 = vpop.permute.xlu1 %912  ;;  %1466 = vrcp.f32 %v900_v37 }
 0x737   : > { %1362 = vmatprep.subr.bf16.mxu0 %v913_v16 }
 0x738   : > { %v897_v17 = vpop.xlane.xlu0 %896  ;;  %1363 = vmatpush3.bf16.msra.mxu0 %v913_v16 }
 0x739   : > { %1468 = vrcp.f32 %v897_v17 }
 0x73a   : > { %v603_v38 = vpop.permute.xlu1 %602 }
 0x73b   : > { %612 = vst.msk [vmem:[#allocation2] sm:$0xf] %vm611_vm7, %v603_v38 }
 0x73c   : > { %v915_v18 = vpop.permute.xlu0 %914 }
 0x73d   : > { %v924_v19 = vsel %vm355_vm5, %v915_v18, 0  ;;  %1393 = vmatprep.subr.msk.bf16.mxu0 %vm355_vm5, %v915_v18 }
 0x73e   : > { %v605_v20 = vpop.permute.xlu1 %604  ;;  %1365 = vmatpush3.bf16.msra.mxu0 %v924_v19 }
 0x73f   : > { %613 = vst.msk [vmem:[#allocation2 + $0x4] sm:$0xf] %vm611_vm7, %v605_v20  ;;  %v1465_v21 = vpop.eup %1464  ;;  %1370 = vmatprep.subr.bf16.mxu0 %v1416_v33 }
 0x740   : > { %v607_v22 = vpop.permute.xlu0 %606  ;;  %v1467_v23 = vpop.eup %1466  ;;  %v909_v26 = vmul.f32 %v1465_v21, %v1461_v1 }
 0x741   : > { %614 = vst.msk [vmem:[#allocation2 + $0x8] sm:$0xf] %vm611_vm7, %v607_v22  ;;  %v908_v29 = vmul.f32 %v1467_v23, %v1459_v10 }
 0x742   : > { %v794_v24 = vpop.permute.xlu1 %793  ;;  %v911_v32 = vpack.c.bf16 %v909_v26, %v909_v26 }
 0x743   : > { %v1469_v25 = vpop.eup %1468  ;;  %803 = vst.msk [vmem:[#allocation2] sm:$0xf] %vm802_vm8, %v794_v24 }
 0x744   : > { %v796_v27 = vpop.permute.xlu0 %795  ;;  %v907_v28 = vmul.f32 %v1469_v25, %v1463_v4 }
 0x745   : > { %804 = vst.msk [vmem:[#allocation2 + $0x4] sm:$0xf] %vm802_vm8, %v796_v27 }
 0x746   : > { %v798_v30 = vpop.permute.xlu1 %797  ;;  %v910_v31 = vpack.c.bf16 %v908_v29, %v907_v28 }
 0x747   : > { %805 = vst.msk [vmem:[#allocation2 + $0x8] sm:$0xf] %vm802_vm8, %v798_v30 }
 0x748   : > { %1366 = vmatprep.mubr.msk.bf16.mxu0 %vm307_vm3, %v910_v31 }
 0x749   : > { %1367 = vmatmul.mubr.msk.bf16.vlgmr.msra.gmra.mrb[8].mxu0 %vm307_vm3, %v911_v32 }
 0x74a   : > { %1371 = vmatpush3.bf16.msra.mxu0 %v1416_v33 }
 0x74b   : > { %1372 = vmatprep.subr.bf16.mxu0 %v1417_v34 }
 0x74e   : > { %1373 = vmatpush3.bf16.msra.mxu0 %v1417_v34 }
 0x74f   : > { %1374 = vmatprep.subr.bf16.mxu0 %v1418_v35 }
 0x752   : > { %1375 = vmatpush3.bf16.msra.mxu0 %v1418_v35 }
 0x753   : > { %1376 = vmatprep.subr.bf16.mxu0 %v1419_v36 }
 0x756   : > { %1377 = vmatpush3.bf16.msra.mxu0 %v1419_v36 }
 0x81c   : > { %v1368_v39 = vpop.f32.mrb[8].mxu0 }
 0x81d   : > { %v960_v40 = vpop.f32.mrb[9].mxu0  ;;  %v1260_v45 = vpack.c.bf16 %v1368_v39, %v1368_v39 }
 0x81e   : > { %v1258_v41 = vpack.c.bf16 %v960_v40, %v960_v40  ;;  %v1369_v42 = vpop.f32.mrb[10].mxu0 }
 0x81f   : > { %v963_v43 = vpop.f32.mrb[11].mxu0 }
 0x820   : > { %v1259_v44 = vpack.c.bf16 %v963_v43, %v963_v43  ;;  %984 = vrot.lane.b32.xlu0 %v1258_v41, %s1480_s23 }
 0x822   : > { %986 = vrot.lane.b32.xlu1 %v1259_v44, %s1480_s23 }
 0x824   : > { %988 = vrot.lane.b32.xlu0 %v1260_v45, %s1480_s23 }
 0x892   : > { %v985_v46 = vpop.permute.xlu0 %984 }
 0x893   : > { %994 = vst.msk [vmem:[#allocation2] sm:$0xf] %vm993_vm9, %v985_v46 }
 0x894   : > { %v987_v47 = vpop.permute.xlu1 %986 }
 0x895   : > { %995 = vst.msk [vmem:[#allocation2 + $0x4] sm:$0xf] %vm993_vm9, %v987_v47 }
 0x896   : > { %v989_v48 = vpop.permute.xlu0 %988 }
 0x897   : > { %996 = vst.msk [vmem:[#allocation2 + $0x8] sm:$0xf] %vm993_vm9, %v989_v48 }
 0x89c   : > { %v1420_v49 = vld [vmem:[#allocation2] sm:$0xff]  }
 0x89d   : > { %1378 = vmatprep.mubr.msk.bf16.mxu0 %vm1047_vm10, %v1420_v49 }
 0x89e   : > { %v1421_v50 = vld [vmem:[#allocation2 + $0x8] ss:$0 sps:$4 sm:$0xff]  }
 0x89f   : > { %1379 = vmatmul.mubr.msk.bf16.vlgmr.msra.gmra.mrb[12].mxu0 %vm1047_vm10, %v1421_v50 }
 0x972   : > { %v1380_v55 = vpop.f32.mrb[12].mxu0 }
 0x973   : > { %v1097_v57 = vadd.f32 %v1380_v55, %v1235_v53  ;;  %v1088_v8 = vpop.f32.mrb[13].mxu0 }
 0x974   : > { %v1089_v58 = vadd.f32 %v1235_v53, %v1088_v8  ;;  %v1381_v59 = vpop.f32.mrb[14].mxu0 }
 0x975   : > { %v1110_v61 = vadd.f32 %v1107_v54, %v1097_v57  ;;  %v1091_v62 = vpop.f32.mrb[15].mxu0 }
 0x976   : > { %v1108_v63 = vadd.f32 %v1266_v56, %v1089_v58  ;;  %v1092_v9 = vadd.f32 %v1235_v53, %v1091_v62 }
 0x977   : > { %v1263_v0 = vpack.c.bf16 %v1110_v61, %v1110_v61 }
 0x978   : > { %v1261_v10 = vpack.c.bf16 %v1108_v63, %v1108_v63  ;;  %v1109_v11 = vadd.f32 %v1267_v60, %v1092_v9 }
 0x979   : > { %1127 = vst.msk [vmem:[%s217_s19 + $0x8] sm:$0xf] %vm1124_vm11, %v1263_v0 }
 0x97a   : > { %1125 = vst.msk [vmem:[%s217_s19] sm:$0xf] %vm1124_vm11, %v1261_v10  ;;  %v1262_v1 = vpack.c.bf16 %v1109_v11, %v1109_v11 }
 0x97c   : > { %1126 = vst.msk [vmem:[%s217_s19 + $0x4] sm:$0xf] %vm1124_vm11, %v1262_v1 }
 0x97d PF: > { %s14_s15 = sadd.s32 1, %s1476_s15  }
 0x97e   : > { %p11_p4 = scmp.ge.s32.totalorder %s14_s15, 6  }
 0x980   :  { %13 = sbr.rel (!%p11_p4) target bundleno = 1 (0x1), region = 69 }

// kernel: _lambda_.41
= control target key start
LH: loop header
LB: loop body
LE: loop exit
PB: predicated region body
PF: predicated region fallthrough
CT: control target
= control target key end

     0   :  { %s206_s0 = inlined_call_operand.vmem [shape: f32[2,64], index: 0, kind: input, shape index: {}]   ;;  %s207_s1 = inlined_call_operand.vmem [shape: f32[4,64], index: 1, kind: input, shape index: {}]   ;;  %s208_s2 = inlined_call_operand.<no memory space> [shape: f32[1,1], index: 2, kind: input, shape index: {}]   ;;  %s209_s3 = inlined_call_operand.hbm [shape: f32[2,4], index: 3, kind: output, shape index: {}]  }
   0x1   :  { %v8_v0 = vstv %s208_s2 }
   0x2   :  { %9 = vst [vmem:[#allocation2] sm:$0x1] %v8_v0 }
   0x3   :  { %v18_v1 = vld [vmem:[%s207_s1] sm:$0xf]  ;;  %vm19_vm0 = vcmask 523264   ;;  %v162_v2 = vmov 0.0   ;;  %vm163_vm1 = vmmov 0  }
   0x4   :  { %124 = vmatprep.subr.mxu0 %v162_v2  ;;  %126 = vmatprep.mubr.msk.f32.mxu0 %vm163_vm1, %v162_v2 }
   0x9   :  { %v96_v3 = vld [vmem:[#allocation2] sm:$0x1] }
   0xa   :  { %10 = vsyncpa [#allocation4], 0  ;;  %125 = vmatpush3.xpose.msk.msra.mxu0 %vm19_vm0, %v18_v1  ;;  %v17_v4 = vld [vmem:[%s206_s0] sm:$0x3]  ;;  %129 = vpush %v96_v3  ;;  %s164_s18 = smov [#allocation3]   ;;  %vm104_vm2 = vcmask 25600  }
   0xb   :  { %s112_s19 = sshll.u32 %s164_s18, 4  ;;  %s113_s19 = int_to_ptr.vmem [resolvable:$true] %s112_s19 }
   0xc   :  { %s138_s20 = scalar_lea.vmem %s113_s19, 32  ;;  %p143_p1 = scmp.lt.s32.totalorder %s113_s19, %s113_s19 }
   0xd   :  { %127 = vmatmul.mubr.msk.f32.vlgmr.msra.gmra.mrb[0].mxu0 %vm19_vm0, %v17_v4  ;;  %p139_p0 = scmp.ne.s32.totalorder %s113_s19, %s138_s20  ;;  %p144_p2 = scmp.lt.s32.totalorder %s138_s20, %s138_s20 }
   0xf   :  { %p145_p3 = por %p144_p2, %p143_p1 }
  0x11   :  { %p146_p4 = pnand %p145_p3, %p139_p0 }
  0x3b   :  { %s130_s2 = spop %129 }
  0x3c   :  { %v98_v5 = vstv %s130_s2 }
  0x3d   :  { %v99_v6 = vmul.f32 1.442695, %v98_v5 }
  0x3f   :  { %136 = vpow2.f32 %v99_v6 }
  0x49   :  { %v137_v7 = vpop.eup %136 }
  0x4a   :  { %131 = vpush %v137_v7 }
  0x7b   :  { %s132_s1 = spop %131 }
  0x7c   :  { %v102_v8 = vstv %s132_s1 }
  0xe0   :  { %v92_v9 = vpop.f32.mrb[0].mxu0 }
  0xe1   :  { %v103_v10 = vmul.f32 %v102_v8, %v92_v9  ;;  %v128_v11 = vpop.f32.mrb[1].mxu0 }
  0xe3   :  { %105 = vst.msk [vmem:[#allocation3] sm:$0x3] %vm104_vm2, %v103_v10 }
  0xe4   :  { %149 = shalt.err (!%p146_p4)
}
  0xe5   :  { %s150_s22 = scalar_lea.hbm %s209_s3, 32 }
  0xe6   :  { %p151_p5 = scmp.ne.s32.totalorder %s209_s3, %s150_s22  ;;  %p154_p6 = scmp.lt.u32.totalorder %s150_s22, %s209_s3 }
  0xe8   :  { %p156_p7 = pnand %p154_p6, %p151_p5 }
  0xea   :  { %159 = shalt.err (!%p156_p7)
}
  0xeb   :  { %115 = dma.vmem_to_hbm [thread:$0]  %s113_s19, 32, %s209_s3, [#allocation4]  }
  0xec   :  { %160 = dma.done.wait [#allocation4], 32  }
  0xed   :  { %161 = vsyncadd [#allocation4], 4294967264 }
  0xee   :  { %119 = vsyncpa [#allocation4], 1 }

// kernel: _lambda_.40
= control target key start
LH: loop header
LB: loop body
LE: loop exit
PB: predicated region body
PF: predicated region fallthrough
CT: control target
= control target key end

     0   :  { %vm24_vm0 = vcmask 519168   ;;  %v182_v9 = vmov 0.0   ;;  %vm183_vm1 = vmmov 0   ;;  %vm56_vm2 = vcmask 517120   ;;  %s237_s0 = inlined_call_operand.vmem [shape: bf16[4,64], index: 0, kind: input, shape index: {}]   ;;  %s238_s3 = inlined_call_operand.vmem [shape: bf16[64,64], index: 3, kind: input, shape index: {}]   ;;  %s239_s1 = inlined_call_operand.vmem [shape: f32[1,64], index: 1, kind: input, shape index: {}]   ;;  %s240_s2 = inlined_call_operand.vmem [shape: f32[1,64], index: 2, kind: input, shape index: {}]   ;;  %s241_s4 = inlined_call_operand.vmem [shape: f32[4,64], index: 4, kind: output, shape index: {}]  }
   0x1   :  { %v22_v0 = vld [vmem:[%s237_s0] sm:$0x3]  ;;  %160 = vmatprep.subr.bf16.mxu0 %v182_v9  ;;  %v175_v10 = vld [vmem:[%s238_s3 + $0x8] sm:$0xff]   ;;  %v176_v11 = vld [vmem:[%s238_s3 + $0x10] sm:$0xff]   ;;  %168 = vmatprep.mubr.msk.bf16.mxu0 %vm183_vm1, %v182_v9  ;;  %vm91_vm3 = vcmask 523264  }
   0x2   :  { %v23_v1 = vunpack.c.l.bf16 %v22_v0  ;;  %v174_v8 = vld [vmem:[%s238_s3] sm:$0xff]   ;;  %v177_v12 = vld [vmem:[%s238_s3 + $0x18] sm:$0xff]  }
   0x3   :  { %161 = vmatpush3.bf16.msra.mxu0 %v174_v8  ;;  %v148_v17 = vld [vmem:[%s239_s1] ss:$0 sm:$0xff] }
   0x4   :  { %v25_v2 = vsel %vm24_vm0, %v23_v1, 0.0  ;;  %162 = vmatprep.subr.bf16.mxu0 %v182_v9  ;;  %v149_v19 = vld [vmem:[%s240_s2] ss:$0 sm:$0xff] }
   0x5   :  { %26 = vadd.xlane.f32.xlu0 %v25_v2 }
   0x7   :  { %163 = vmatpush3.bf16.msra.mxu0 %v175_v10 }
   0x8   :  { %164 = vmatprep.subr.bf16.mxu0 %v182_v9 }
   0xb   :  { %165 = vmatpush3.bf16.msra.mxu0 %v176_v11 }
   0xc   :  { %166 = vmatprep.subr.bf16.mxu0 %v182_v9 }
   0xf   :  { %167 = vmatpush3.bf16.msra.mxu0 %v177_v12 }
  0x92   :  { %v27_v3 = vpop.xlane.xlu0 %26 }
  0x93   :  { %v29_v4 = vmul.f32 0.015625, %v27_v3 }
  0x95   :  { %v30_v5 = vsub.f32 %v23_v1, %v29_v4 }
  0x97   :  { %v31_v6 = vmul.f32 %v30_v5, %v30_v5 }
  0x99   :  { %v32_v7 = vsel %vm24_vm0, %v31_v6, 0.0 }
  0x9a   :  { %33 = vadd.xlane.f32.xlu0 %v32_v7 }
 0x127   :  { %v34_v13 = vpop.xlane.xlu0 %33 }
 0x128   :  { %v35_v14 = vmul.f32 0.015625, %v34_v13 }
 0x12a   :  { %v36_v15 = vadd.f32 1e-05, %v35_v14 }
 0x12c   :  { %178 = vrsqrt.f32 %v36_v15 }
 0x136   :  { %v179_v16 = vpop.eup %178 }
 0x137   :  { %v38_v18 = vmul.f32 %v179_v16, %v30_v5 }
 0x139   :  { %v46_v20 = vmul.f32 %v148_v17, %v38_v18 }
 0x13b   :  { %v54_v21 = vadd.f32 %v149_v19, %v46_v20 }
 0x13d   :  { %v55_v22 = vpack.c.bf16 %v54_v21, %v54_v21 }
 0x13f   :  { %57 = vst.msk [vmem:[#allocation2] sm:$0x3] %vm56_vm2, %v55_v22 }
 0x146   :  { %v58_v23 = vld [vmem:[#allocation2] sm:$0x3] }
 0x147   :  { %169 = vmatmul.mubr.msk.bf16.vlgmr.msra.gmra.mrb[0].mxu0 %vm91_vm3, %v58_v23 }
 0x21a   :  { %v129_v24 = vpop.f32.mrb[0].mxu0 }
 0x21b   :  { %v170_v25 = vpop.f32.mrb[1].mxu0  ;;  %v135_v26 = vmul.f32 %v129_v24, %v129_v24 }
 0x21c   :  { %v132_v27 = vpop.f32.mrb[2].mxu0 }
 0x21d   :  { %v171_v28 = vpop.f32.mrb[3].mxu0  ;;  %v137_v29 = vsel %vm24_vm0, %v135_v26, 0.0 }
 0x21e   :  { %138 = vadd.xlane.f32.xlu1 %v137_v29 }
 0x2ab   :  { %v139_v30 = vpop.xlane.xlu1 %138 }
 0x2ac   :  { %v140_v31 = vmax.f32 %v139_v30, 1e-12 }
 0x2ae   :  { %180 = vrsqrt.f32 %v140_v31 }
 0x2b8   :  { %v181_v32 = vpop.eup %180 }
 0x2b9   :  { %v142_v33 = vmul.f32 %v181_v32, %v129_v24 }
 0x2bb   :  { %143 = vst.msk [vmem:[%s241_s4] sm:$0xf] %vm24_vm0, %v142_v33 }

</bundles_post_ra>
